<compile_context>
chip_gen: v6e
topology: v6e:2x2x1
jax: 0.10.0
libtpu: 0.0.40
codegen_flags: <defaults>
</compile_context>

<pallas_src>
import functools

import jax
import jax.numpy as jnp
from jax.experimental import pallas as pl
from jax.experimental.pallas import tpu as pltpu


# ------------------------------ BN folding --------------------------------- #

def fold_bn(gamma, beta, mean, var, eps=1e-5):
    scale = gamma / jnp.sqrt(var + eps)
    shift = beta - mean * scale
    return scale, shift


# --------------------------- in-kernel helpers ------------------------------ #

def _zero_border(pad_ref):
    """Zero only the 1-px pad border of a (H+2, W+2, C) VMEM window.
    The interior is fully overwritten by the caller, so a full-window zero
    pass (a whole VPU+store sweep per grid step) is unnecessary."""
    hp, wp, c = pad_ref.shape
    row = jnp.zeros((1, wp, c), pad_ref.dtype)
    col = jnp.zeros((hp, 1, c), pad_ref.dtype)
    pad_ref[0:1, :, :] = row
    pad_ref[hp - 1:hp, :, :] = row
    pad_ref[:, 0:1, :] = col
    pad_ref[:, wp - 1:wp, :] = col


def _conv3x3_accum(pad_ref, w_ref, *, stride, ho, wo, cin, cout):
    """3x3 conv (pad already applied in the VMEM window) as 9 accumulated MXU
    dots: bf16 operands, f32 accumulation.  stride-2 taps are read directly
    with strided pl.ds (no decimated phase copies)."""
    acc = jnp.zeros((ho * wo, cout), jnp.float32)
    for kh in range(3):
        for kw in range(3):
            if stride == 1:
                tap = pad_ref[kh:kh + ho, kw:kw + wo, :]
            else:
                tap = pad_ref[pl.ds(kh, ho, stride), pl.ds(kw, wo, stride), :]
            tap = tap.reshape(ho * wo, cin).astype(jnp.bfloat16)
            acc = acc + jnp.dot(tap, w_ref[kh * 3 + kw],
                                preferred_element_type=jnp.float32)
    return acc


# ------------------------------ Pallas kernel ------------------------------- #

def _ibasic_block_kernel(x_ref, s1_ref, b1_ref, w1_ref, s2_ref, b2_ref,
                         w2_ref, s3_ref, b3_ref, *rest,
                         h, w, ho, wo, cin, cout, stride, ds_kind):
    """Fully fused IBasicBlock forward for one batch element:
        bn1 -> conv1(3x3,s1) -> bn2 -> relu -> conv2(3x3,stride) -> bn3 -> relu
        (+ downsample conv+BN | identity) -> residual add
    x is read from HBM once; out1 and padded windows stay in VMEM scratch."""
    if ds_kind == "identity":
        o_ref, xpad_ref, ypad_ref = rest
        wd_ref = sd_ref = bd_ref = None
    else:
        wd_ref, sd_ref, bd_ref, o_ref, xpad_ref, ypad_ref = rest

    _zero_border(xpad_ref)
    _zero_border(ypad_ref)

    x = x_ref[...]                                   # (h, w, cin): one HBM read

    # ---- identity / downsample path (consumes raw x) ----
    if ds_kind == "conv3x3":                         # 3x3 stride-2 conv + BN
        xpad_ref[1:h + 1, 1:w + 1, :] = x
        idn = _conv3x3_accum(xpad_ref, wd_ref, stride=stride,
                             ho=ho, wo=wo, cin=cin, cout=cout)
        idn = idn * sd_ref[0] + bd_ref[0]
    elif ds_kind == "conv1x1":                       # 1x1 stride-1 conv + BN
        idn = jnp.dot(x.reshape(h * w, cin).astype(jnp.bfloat16), wd_ref[...],
                      preferred_element_type=jnp.float32)
        idn = idn * sd_ref[0] + bd_ref[0]
    else:                                            # plain identity shortcut
        idn = x.reshape(h * w, cout)

    # ---- main path: bn1 -> conv1 (3x3, stride 1, pad 1) -> bn2 -> relu ----
    # (reuses the same padded window; border stays zero = post-bn1 zero pad)
    xpad_ref[1:h + 1, 1:w + 1, :] = x * s1_ref[0] + b1_ref[0]
    y = _conv3x3_accum(xpad_ref, w1_ref, stride=1, ho=h, wo=w,
                       cin=cin, cout=cout)
    y = jnp.maximum(y * s2_ref[0] + b2_ref[0], 0.0)
    ypad_ref[1:h + 1, 1:w + 1, :] = y.reshape(h, w, cout)   # out1 never hits HBM

    # ---- conv2 (3x3, given stride, pad 1) -> bn3 -> relu, residual add ----
    out = _conv3x3_accum(ypad_ref, w2_ref, stride=stride, ho=ho, wo=wo,
                         cin=cout, cout=cout)
    out = jnp.maximum(out * s3_ref[0] + b3_ref[0], 0.0)
    o_ref[...] = (out + idn).reshape(ho, wo, cout).astype(o_ref.dtype)


# ------------------------------ JAX wrappers -------------------------------- #

def ibasic_block_forward_nhwc(x, params, stride):
    """x: (N, H, W, Cin) f32.  Single fused pallas_call over the batch grid."""
    assert stride in (1, 2)
    n, h, w_sz, cin = x.shape
    cout = params["w1"].shape[-1]
    ho = (h - 1) // stride + 1
    wo = (w_sz - 1) // stride + 1

    s1, b1 = fold_bn(*params["bn1"])
    s2, b2 = fold_bn(*params["bn2"])
    s3, b3 = fold_bn(*params["bn3"])
    # tap-major (9, Cin, Cout) bf16 weights (MXU operands); f32 accumulation.
    w1 = params["w1"].reshape(9, cin, cout).astype(jnp.bfloat16)
    w2 = params["w2"].reshape(9, cout, cout).astype(jnp.bfloat16)

    inputs = [x,
              s1.reshape(1, cin), b1.reshape(1, cin), w1,
              s2.reshape(1, cout), b2.reshape(1, cout), w2,
              s3.reshape(1, cout), b3.reshape(1, cout)]
    in_specs = [
        pl.BlockSpec((None, h, w_sz, cin), lambda i: (i, 0, 0, 0)),
        pl.BlockSpec((1, cin), lambda i: (0, 0)),
        pl.BlockSpec((1, cin), lambda i: (0, 0)),
        pl.BlockSpec((9, cin, cout), lambda i: (0, 0, 0)),
        pl.BlockSpec((1, cout), lambda i: (0, 0)),
        pl.BlockSpec((1, cout), lambda i: (0, 0)),
        pl.BlockSpec((9, cout, cout), lambda i: (0, 0, 0)),
        pl.BlockSpec((1, cout), lambda i: (0, 0)),
        pl.BlockSpec((1, cout), lambda i: (0, 0)),
    ]

    if "w_ds" in params:
        kd = params["w_ds"].shape[0]
        ds_kind = "conv3x3" if kd == 3 else "conv1x1"
        sd, bd = fold_bn(*params["bn_ds"])
        if ds_kind == "conv3x3":
            wd = params["w_ds"].reshape(9, cin, cout).astype(jnp.bfloat16)
            wd_spec = pl.BlockSpec((9, cin, cout), lambda i: (0, 0, 0))
        else:
            assert stride == 1           # module: 1x1 downsample only at stride 1
            wd = params["w_ds"].reshape(cin, cout).astype(jnp.bfloat16)
            wd_spec = pl.BlockSpec((cin, cout), lambda i: (0, 0))
        inputs += [wd, sd.reshape(1, cout), bd.reshape(1, cout)]
        in_specs += [wd_spec,
                     pl.BlockSpec((1, cout), lambda i: (0, 0)),
                     pl.BlockSpec((1, cout), lambda i: (0, 0))]
    else:
        assert stride == 1 and cin == cout
        ds_kind = "identity"

    kernel = functools.partial(_ibasic_block_kernel, h=h, w=w_sz, ho=ho, wo=wo,
                               cin=cin, cout=cout, stride=stride,
                               ds_kind=ds_kind)
    return pl.pallas_call(
        kernel,
        out_shape=jax.ShapeDtypeStruct((n, ho, wo, cout), jnp.float32),
        grid=(n,),
        in_specs=in_specs,
        out_specs=pl.BlockSpec((None, ho, wo, cout), lambda i: (i, 0, 0, 0)),
        scratch_shapes=[
            pltpu.VMEM((h + 2, w_sz + 2, cin), jnp.float32),    # padded x / bn1(x)
            pltpu.VMEM((h + 2, w_sz + 2, cout), jnp.float32),   # padded out1
        ],
        compiler_params=pltpu.CompilerParams(
            dimension_semantics=("parallel",)),
    )(*inputs)


def ibasic_block_forward(x_nchw, params, stride):
    """NCHW adapter matching the PyTorch module interface (prefer the NHWC
    entry point above in an NHWC model to avoid these transposes)."""
    x = jnp.transpose(x_nchw, (0, 2, 3, 1))
    out = ibasic_block_forward_nhwc(x, params, stride)
    return jnp.transpose(out, (0, 3, 1, 2))


# ------------------------- plain-JAX reference ------------------------------ #

def ref_forward(x_nchw, params, stride, eps=1e-5):
    x = jnp.transpose(x_nchw, (0, 2, 3, 1))

    def bn(v, p):
        g, b, m, var = p
        return (v - m) / jnp.sqrt(var + eps) * g + b

    def conv(v, w, s, p):
        return jax.lax.conv_general_dilated(
            v, w, (s, s), [(p, p), (p, p)],
            dimension_numbers=("NHWC", "HWIO", "NHWC"))

    out = bn(x, params["bn1"])
    out = jnp.maximum(bn(conv(out, params["w1"], 1, 1), params["bn2"]), 0.0)
    out = jnp.maximum(bn(conv(out, params["w2"], stride, 1), params["bn3"]), 0.0)
    if "w_ds" in params:
        kd = params["w_ds"].shape[0]
        pad = 1 if kd == 3 else 0
        identity = bn(conv(x, params["w_ds"], stride, pad), params["bn_ds"])
    else:
        identity = x
    out = out + identity
    return jnp.transpose(out, (0, 3, 1, 2))


# ---------------------------------- main ------------------------------------ #

def _bn_params(key, c):
    k1, k2, k3, k4 = jax.random.split(key, 4)
    gamma = 1.0 + 0.1 * jax.random.normal(k1, (c,), jnp.float32)
    beta = 0.1 * jax.random.normal(k2, (c,), jnp.float32)
    mean = 0.1 * jax.random.normal(k3, (c,), jnp.float32)
    var = jax.random.uniform(k4, (c,), jnp.float32, minval=0.5, maxval=1.5)
    return (gamma, beta, mean, var)


def _make_params(key, cin, cout, stride):
    ks = jax.random.split(key, 7)
    params = {
        "bn1": _bn_params(ks[0], cin),
        "w1": 0.1 * jax.random.normal(ks[1], (3, 3, cin, cout), jnp.float32),
        "bn2": _bn_params(ks[2], cout),
        "w2": 0.1 * jax.random.normal(ks[3], (3, 3, cout, cout), jnp.float32),
        "bn3": _bn_params(ks[4], cout),
    }
    if not (stride == 1 and cin == cout):
        kd = 3 if stride == 2 else 1
        params["w_ds"] = 0.1 * jax.random.normal(
            ks[5], (kd, kd, cin, cout), jnp.float32)
        params["bn_ds"] = _bn_params(ks[6], cout)
    return params


if __name__ == "__main__":
    N, H, W = 2, 16, 16
    root = jax.random.PRNGKey(0)

    # Exercise all three shortcut variants of IBasicBlock.
    configs = [
        (8, 16, 2),   # downsample = 3x3 stride-2 conv + BN
        (8, 16, 1),   # downsample = 1x1 stride-1 conv + BN
        (16, 16, 1),  # identity shortcut (no downsample)
    ]

    for idx, (cin, cout, stride) in enumerate(configs):
        kp, kx = jax.random.split(jax.random.fold_in(root, idx))
        params = _make_params(kp, cin, cout, stride)
        x = jax.random.normal(kx, (N, cin, H, W), jnp.float32)  # NCHW like PyTorch

        out = jax.block_until_ready(ibasic_block_forward(x, params, stride))
        ref = jax.block_until_ready(ref_forward(x, params, stride))

        assert out.shape == (N, cout, H // stride, W // stride), out.shape
        max_err = float(jnp.max(jnp.abs(out - ref)))
        mean_err = float(jnp.mean(jnp.abs(out - ref)))
        # bf16 MXU operands (f32 accumulation): tolerance relaxed vs f32-only.
        assert jnp.allclose(out, ref, rtol=5e-2, atol=1e-1), (max_err, mean_err)
        assert mean_err < 2e-2, mean_err

    print("KERNEL_OK")
</pallas_src>

<mosaic_0001>
module attributes {stable_mosaic.version = 11 : i64} {
  func.func @_ibasic_block_kernel(%arg0: i32, %arg1: memref<1x16x16x8xf32, #tpu.memory_space<vmem>>, %arg2: memref<1x8xf32, #tpu.memory_space<vmem>>, %arg3: memref<1x8xf32, #tpu.memory_space<vmem>>, %arg4: memref<9x8x16xbf16, #tpu.memory_space<vmem>>, %arg5: memref<1x16xf32, #tpu.memory_space<vmem>>, %arg6: memref<1x16xf32, #tpu.memory_space<vmem>>, %arg7: memref<9x16x16xbf16, #tpu.memory_space<vmem>>, %arg8: memref<1x16xf32, #tpu.memory_space<vmem>>, %arg9: memref<1x16xf32, #tpu.memory_space<vmem>>, %arg10: memref<9x8x16xbf16, #tpu.memory_space<vmem>>, %arg11: memref<1x16xf32, #tpu.memory_space<vmem>>, %arg12: memref<1x16xf32, #tpu.memory_space<vmem>>, %arg13: memref<1x8x8x16xf32, #tpu.memory_space<vmem>>, %arg14: memref<18x18x8xf32, #tpu.memory_space<vmem>>, %arg15: memref<18x18x16xf32, #tpu.memory_space<vmem>>) attributes {dimension_semantics = [#tpu.dimension_semantics<parallel>], iteration_bounds = array<i64: 2>, scalar_prefetch = 0 : i64, scratch_operands = 2 : i64, tpu.core_type = #tpu.core_type<tc>, window_params = [{transform_indices = @transform_0, window_bounds = array<i64: 1, 16, 16, 8>}, {pipeline_mode = #tpu.pipeline_mode<synchronous>, transform_indices = @transform_1, window_bounds = array<i64: 1, 8>}, {pipeline_mode = #tpu.pipeline_mode<synchronous>, transform_indices = @transform_2, window_bounds = array<i64: 1, 8>}, {pipeline_mode = #tpu.pipeline_mode<synchronous>, transform_indices = @transform_3, window_bounds = array<i64: 9, 8, 16>}, {pipeline_mode = #tpu.pipeline_mode<synchronous>, transform_indices = @transform_4, window_bounds = array<i64: 1, 16>}, {pipeline_mode = #tpu.pipeline_mode<synchronous>, transform_indices = @transform_5, window_bounds = array<i64: 1, 16>}, {pipeline_mode = #tpu.pipeline_mode<synchronous>, transform_indices = @transform_6, window_bounds = array<i64: 9, 16, 16>}, {pipeline_mode = #tpu.pipeline_mode<synchronous>, transform_indices = @transform_7, window_bounds = array<i64: 1, 16>}, {pipeline_mode = #tpu.pipeline_mode<synchronous>, transform_indices = @transform_8, window_bounds = array<i64: 1, 16>}, {pipeline_mode = #tpu.pipeline_mode<synchronous>, transform_indices = @transform_9, window_bounds = array<i64: 9, 8, 16>}, {pipeline_mode = #tpu.pipeline_mode<synchronous>, transform_indices = @transform_10, window_bounds = array<i64: 1, 16>}, {pipeline_mode = #tpu.pipeline_mode<synchronous>, transform_indices = @transform_11, window_bounds = array<i64: 1, 16>}, {transform_indices = @transform_12, window_bounds = array<i64: 1, 8, 8, 16>}]} {
    %cst = arith.constant 0.000000e+00 : f32
    %0 = vector.broadcast %cst : f32 to vector<1x18x8xf32>
    %cst_0 = arith.constant 0.000000e+00 : f32
    %1 = vector.broadcast %cst_0 : f32 to vector<18x1x8xf32>
    %c0 = arith.constant 0 : index
    %c0_1 = arith.constant 0 : index
    %c0_2 = arith.constant 0 : index
    %2 = vector.load %arg14[%c0, %c0_1, %c0_2] : memref<18x18x8xf32, #tpu.memory_space<vmem>>, vector<1x18x8xf32>
    tpu.vector_store %arg14[%c0, %c0_1, %c0_2], %0 {strides = array<i32>} : memref<18x18x8xf32, #tpu.memory_space<vmem>>, vector<1x18x8xf32>,
    %c17 = arith.constant 17 : index
    %c0_3 = arith.constant 0 : index
    %c0_4 = arith.constant 0 : index
    %3 = vector.load %arg14[%c17, %c0_3, %c0_4] : memref<18x18x8xf32, #tpu.memory_space<vmem>>, vector<1x18x8xf32>
    tpu.vector_store %arg14[%c17, %c0_3, %c0_4], %0 {strides = array<i32>} : memref<18x18x8xf32, #tpu.memory_space<vmem>>, vector<1x18x8xf32>,
    %c0_5 = arith.constant 0 : index
    %c0_6 = arith.constant 0 : index
    %c0_7 = arith.constant 0 : index
    %4 = vector.load %arg14[%c0_5, %c0_6, %c0_7] : memref<18x18x8xf32, #tpu.memory_space<vmem>>, vector<18x1x8xf32>
    tpu.vector_store %arg14[%c0_5, %c0_6, %c0_7], %1 {strides = array<i32>} : memref<18x18x8xf32, #tpu.memory_space<vmem>>, vector<18x1x8xf32>,
    %c0_8 = arith.constant 0 : index
    %c17_9 = arith.constant 17 : index
    %c0_10 = arith.constant 0 : index
    %5 = vector.load %arg14[%c0_8, %c17_9, %c0_10] : memref<18x18x8xf32, #tpu.memory_space<vmem>>, vector<18x1x8xf32>
    tpu.vector_store %arg14[%c0_8, %c17_9, %c0_10], %1 {strides = array<i32>} : memref<18x18x8xf32, #tpu.memory_space<vmem>>, vector<18x1x8xf32>,
    %cst_11 = arith.constant 0.000000e+00 : f32
    %6 = vector.broadcast %cst_11 : f32 to vector<1x18x16xf32>
    %cst_12 = arith.constant 0.000000e+00 : f32
    %7 = vector.broadcast %cst_12 : f32 to vector<18x1x16xf32>
    %c0_13 = arith.constant 0 : index
    %c0_14 = arith.constant 0 : index
    %c0_15 = arith.constant 0 : index
    %8 = vector.load %arg15[%c0_13, %c0_14, %c0_15] : memref<18x18x16xf32, #tpu.memory_space<vmem>>, vector<1x18x16xf32>
    tpu.vector_store %arg15[%c0_13, %c0_14, %c0_15], %6 {strides = array<i32>} : memref<18x18x16xf32, #tpu.memory_space<vmem>>, vector<1x18x16xf32>,
    %c17_16 = arith.constant 17 : index
    %c0_17 = arith.constant 0 : index
    %c0_18 = arith.constant 0 : index
    %9 = vector.load %arg15[%c17_16, %c0_17, %c0_18] : memref<18x18x16xf32, #tpu.memory_space<vmem>>, vector<1x18x16xf32>
    tpu.vector_store %arg15[%c17_16, %c0_17, %c0_18], %6 {strides = array<i32>} : memref<18x18x16xf32, #tpu.memory_space<vmem>>, vector<1x18x16xf32>,
    %c0_19 = arith.constant 0 : index
    %c0_20 = arith.constant 0 : index
    %c0_21 = arith.constant 0 : index
    %10 = vector.load %arg15[%c0_19, %c0_20, %c0_21] : memref<18x18x16xf32, #tpu.memory_space<vmem>>, vector<18x1x16xf32>
    tpu.vector_store %arg15[%c0_19, %c0_20, %c0_21], %7 {strides = array<i32>} : memref<18x18x16xf32, #tpu.memory_space<vmem>>, vector<18x1x16xf32>,
    %c0_22 = arith.constant 0 : index
    %c17_23 = arith.constant 17 : index
    %c0_24 = arith.constant 0 : index
    %11 = vector.load %arg15[%c0_22, %c17_23, %c0_24] : memref<18x18x16xf32, #tpu.memory_space<vmem>>, vector<18x1x16xf32>
    tpu.vector_store %arg15[%c0_22, %c17_23, %c0_24], %7 {strides = array<i32>} : memref<18x18x16xf32, #tpu.memory_space<vmem>>, vector<18x1x16xf32>,
    %c0_25 = arith.constant 0 : index
    %c0_26 = arith.constant 0 : index
    %c0_27 = arith.constant 0 : index
    %c0_28 = arith.constant 0 : index
    %12 = vector.load %arg1[%c0_25, %c0_26, %c0_27, %c0_28] : memref<1x16x16x8xf32, #tpu.memory_space<vmem>>, vector<1x16x16x8xf32>
    %13 = vector.shape_cast %12 : vector<1x16x16x8xf32> to vector<16x16x8xf32>
    %c1 = arith.constant 1 : index
    %c1_29 = arith.constant 1 : index
    %c0_30 = arith.constant 0 : index
    %14 = vector.load %arg14[%c1, %c1_29, %c0_30] : memref<18x18x8xf32, #tpu.memory_space<vmem>>, vector<16x16x8xf32>
    tpu.vector_store %arg14[%c1, %c1_29, %c0_30], %13 {strides = array<i32>} : memref<18x18x8xf32, #tpu.memory_space<vmem>>, vector<16x16x8xf32>,
    %cst_31 = arith.constant 0.000000e+00 : f32
    %15 = vector.broadcast %cst_31 : f32 to vector<64x16xf32>
    %c0_32 = arith.constant 0 : index
    %c0_33 = arith.constant 0 : index
    %c0_34 = arith.constant 0 : index
    %16 = tpu.strided_load %arg14[%c0_32, %c0_33, %c0_34] {strides = array<i32: 2, 2, 1>} : memref<18x18x8xf32, #tpu.memory_space<vmem>>, vector<8x8x8xf32>
    %17 = vector.shape_cast %16 : vector<8x8x8xf32> to vector<64x8xf32>
    %18 = arith.truncf %17 : vector<64x8xf32> to vector<64x8xbf16>
    %c0_35 = arith.constant 0 : index
    %c0_36 = arith.constant 0 : index
    %c0_37 = arith.constant 0 : index
    %19 = vector.load %arg10[%c0_35, %c0_36, %c0_37] : memref<9x8x16xbf16, #tpu.memory_space<vmem>>, vector<1x8x16xbf16>
    %20 = vector.shape_cast %19 : vector<1x8x16xbf16> to vector<8x16xbf16>
    %cst_38 = arith.constant dense<0.000000e+00> : vector<64x16xf32>
    %21 = tpu.matmul %18, %20, %cst_38 {dimension_numbers = #tpu.dot_dimension_numbers<[1], [0], [0], [1], [0, 0, 1, 1], [], []>} : vector<64x8xbf16>, vector<8x16xbf16>, vector<64x16xf32> -> vector<64x16xf32>
    %22 = arith.addf %15, %21 : vector<64x16xf32>
    %c0_39 = arith.constant 0 : index
    %c1_40 = arith.constant 1 : index
    %c0_41 = arith.constant 0 : index
    %23 = tpu.strided_load %arg14[%c0_39, %c1_40, %c0_41] {strides = array<i32: 2, 2, 1>} : memref<18x18x8xf32, #tpu.memory_space<vmem>>, vector<8x8x8xf32>
    %24 = vector.shape_cast %23 : vector<8x8x8xf32> to vector<64x8xf32>
    %25 = arith.truncf %24 : vector<64x8xf32> to vector<64x8xbf16>
    %c1_42 = arith.constant 1 : index
    %c0_43 = arith.constant 0 : index
    %c0_44 = arith.constant 0 : index
    %26 = vector.load %arg10[%c1_42, %c0_43, %c0_44] : memref<9x8x16xbf16, #tpu.memory_space<vmem>>, vector<1x8x16xbf16>
    %27 = vector.shape_cast %26 : vector<1x8x16xbf16> to vector<8x16xbf16>
    %cst_45 = arith.constant dense<0.000000e+00> : vector<64x16xf32>
    %28 = tpu.matmul %25, %27, %cst_45 {dimension_numbers = #tpu.dot_dimension_numbers<[1], [0], [0], [1], [0, 0, 1, 1], [], []>} : vector<64x8xbf16>, vector<8x16xbf16>, vector<64x16xf32> -> vector<64x16xf32>
    %29 = arith.addf %22, %28 : vector<64x16xf32>
    %c0_46 = arith.constant 0 : index
    %c2 = arith.constant 2 : index
    %c0_47 = arith.constant 0 : index
    %30 = tpu.strided_load %arg14[%c0_46, %c2, %c0_47] {strides = array<i32: 2, 2, 1>} : memref<18x18x8xf32, #tpu.memory_space<vmem>>, vector<8x8x8xf32>
    %31 = vector.shape_cast %30 : vector<8x8x8xf32> to vector<64x8xf32>
    %32 = arith.truncf %31 : vector<64x8xf32> to vector<64x8xbf16>
    %c2_48 = arith.constant 2 : index
    %c0_49 = arith.constant 0 : index
    %c0_50 = arith.constant 0 : index
    %33 = vector.load %arg10[%c2_48, %c0_49, %c0_50] : memref<9x8x16xbf16, #tpu.memory_space<vmem>>, vector<1x8x16xbf16>
    %34 = vector.shape_cast %33 : vector<1x8x16xbf16> to vector<8x16xbf16>
    %cst_51 = arith.constant dense<0.000000e+00> : vector<64x16xf32>
    %35 = tpu.matmul %32, %34, %cst_51 {dimension_numbers = #tpu.dot_dimension_numbers<[1], [0], [0], [1], [0, 0, 1, 1], [], []>} : vector<64x8xbf16>, vector<8x16xbf16>, vector<64x16xf32> -> vector<64x16xf32>
    %36 = arith.addf %29, %35 : vector<64x16xf32>
    %c1_52 = arith.constant 1 : index
    %c0_53 = arith.constant 0 : index
    %c0_54 = arith.constant 0 : index
    %37 = tpu.strided_load %arg14[%c1_52, %c0_53, %c0_54] {strides = array<i32: 2, 2, 1>} : memref<18x18x8xf32, #tpu.memory_space<vmem>>, vector<8x8x8xf32>
    %38 = vector.shape_cast %37 : vector<8x8x8xf32> to vector<64x8xf32>
    %39 = arith.truncf %38 : vector<64x8xf32> to vector<64x8xbf16>
    %c3 = arith.constant 3 : index
    %c0_55 = arith.constant 0 : index
    %c0_56 = arith.constant 0 : index
    %40 = vector.load %arg10[%c3, %c0_55, %c0_56] : memref<9x8x16xbf16, #tpu.memory_space<vmem>>, vector<1x8x16xbf16>
    %41 = vector.shape_cast %40 : vector<1x8x16xbf16> to vector<8x16xbf16>
    %cst_57 = arith.constant dense<0.000000e+00> : vector<64x16xf32>
    %42 = tpu.matmul %39, %41, %cst_57 {dimension_numbers = #tpu.dot_dimension_numbers<[1], [0], [0], [1], [0, 0, 1, 1], [], []>} : vector<64x8xbf16>, vector<8x16xbf16>, vector<64x16xf32> -> vector<64x16xf32>
    %43 = arith.addf %36, %42 : vector<64x16xf32>
    %c1_58 = arith.constant 1 : index
    %c1_59 = arith.constant 1 : index
    %c0_60 = arith.constant 0 : index
    %44 = tpu.strided_load %arg14[%c1_58, %c1_59, %c0_60] {strides = array<i32: 2, 2, 1>} : memref<18x18x8xf32, #tpu.memory_space<vmem>>, vector<8x8x8xf32>
    %45 = vector.shape_cast %44 : vector<8x8x8xf32> to vector<64x8xf32>
    %46 = arith.truncf %45 : vector<64x8xf32> to vector<64x8xbf16>
    %c4 = arith.constant 4 : index
    %c0_61 = arith.constant 0 : index
    %c0_62 = arith.constant 0 : index
    %47 = vector.load %arg10[%c4, %c0_61, %c0_62] : memref<9x8x16xbf16, #tpu.memory_space<vmem>>, vector<1x8x16xbf16>
    %48 = vector.shape_cast %47 : vector<1x8x16xbf16> to vector<8x16xbf16>
    %cst_63 = arith.constant dense<0.000000e+00> : vector<64x16xf32>
    %49 = tpu.matmul %46, %48, %cst_63 {dimension_numbers = #tpu.dot_dimension_numbers<[1], [0], [0], [1], [0, 0, 1, 1], [], []>} : vector<64x8xbf16>, vector<8x16xbf16>, vector<64x16xf32> -> vector<64x16xf32>
    %50 = arith.addf %43, %49 : vector<64x16xf32>
    %c1_64 = arith.constant 1 : index
    %c2_65 = arith.constant 2 : index
    %c0_66 = arith.constant 0 : index
    %51 = tpu.strided_load %arg14[%c1_64, %c2_65, %c0_66] {strides = array<i32: 2, 2, 1>} : memref<18x18x8xf32, #tpu.memory_space<vmem>>, vector<8x8x8xf32>
    %52 = vector.shape_cast %51 : vector<8x8x8xf32> to vector<64x8xf32>
    %53 = arith.truncf %52 : vector<64x8xf32> to vector<64x8xbf16>
    %c5 = arith.constant 5 : index
    %c0_67 = arith.constant 0 : index
    %c0_68 = arith.constant 0 : index
    %54 = vector.load %arg10[%c5, %c0_67, %c0_68] : memref<9x8x16xbf16, #tpu.memory_space<vmem>>, vector<1x8x16xbf16>
    %55 = vector.shape_cast %54 : vector<1x8x16xbf16> to vector<8x16xbf16>
    %cst_69 = arith.constant dense<0.000000e+00> : vector<64x16xf32>
    %56 = tpu.matmul %53, %55, %cst_69 {dimension_numbers = #tpu.dot_dimension_numbers<[1], [0], [0], [1], [0, 0, 1, 1], [], []>} : vector<64x8xbf16>, vector<8x16xbf16>, vector<64x16xf32> -> vector<64x16xf32>
    %57 = arith.addf %50, %56 : vector<64x16xf32>
    %c2_70 = arith.constant 2 : index
    %c0_71 = arith.constant 0 : index
    %c0_72 = arith.constant 0 : index
    %58 = tpu.strided_load %arg14[%c2_70, %c0_71, %c0_72] {strides = array<i32: 2, 2, 1>} : memref<18x18x8xf32, #tpu.memory_space<vmem>>, vector<8x8x8xf32>
    %59 = vector.shape_cast %58 : vector<8x8x8xf32> to vector<64x8xf32>
    %60 = arith.truncf %59 : vector<64x8xf32> to vector<64x8xbf16>
    %c6 = arith.constant 6 : index
    %c0_73 = arith.constant 0 : index
    %c0_74 = arith.constant 0 : index
    %61 = vector.load %arg10[%c6, %c0_73, %c0_74] : memref<9x8x16xbf16, #tpu.memory_space<vmem>>, vector<1x8x16xbf16>
    %62 = vector.shape_cast %61 : vector<1x8x16xbf16> to vector<8x16xbf16>
    %cst_75 = arith.constant dense<0.000000e+00> : vector<64x16xf32>
    %63 = tpu.matmul %60, %62, %cst_75 {dimension_numbers = #tpu.dot_dimension_numbers<[1], [0], [0], [1], [0, 0, 1, 1], [], []>} : vector<64x8xbf16>, vector<8x16xbf16>, vector<64x16xf32> -> vector<64x16xf32>
    %64 = arith.addf %57, %63 : vector<64x16xf32>
    %c2_76 = arith.constant 2 : index
    %c1_77 = arith.constant 1 : index
    %c0_78 = arith.constant 0 : index
    %65 = tpu.strided_load %arg14[%c2_76, %c1_77, %c0_78] {strides = array<i32: 2, 2, 1>} : memref<18x18x8xf32, #tpu.memory_space<vmem>>, vector<8x8x8xf32>
    %66 = vector.shape_cast %65 : vector<8x8x8xf32> to vector<64x8xf32>
    %67 = arith.truncf %66 : vector<64x8xf32> to vector<64x8xbf16>
    %c7 = arith.constant 7 : index
    %c0_79 = arith.constant 0 : index
    %c0_80 = arith.constant 0 : index
    %68 = vector.load %arg10[%c7, %c0_79, %c0_80] : memref<9x8x16xbf16, #tpu.memory_space<vmem>>, vector<1x8x16xbf16>
    %69 = vector.shape_cast %68 : vector<1x8x16xbf16> to vector<8x16xbf16>
    %cst_81 = arith.constant dense<0.000000e+00> : vector<64x16xf32>
    %70 = tpu.matmul %67, %69, %cst_81 {dimension_numbers = #tpu.dot_dimension_numbers<[1], [0], [0], [1], [0, 0, 1, 1], [], []>} : vector<64x8xbf16>, vector<8x16xbf16>, vector<64x16xf32> -> vector<64x16xf32>
    %71 = arith.addf %64, %70 : vector<64x16xf32>
    %c2_82 = arith.constant 2 : index
    %c2_83 = arith.constant 2 : index
    %c0_84 = arith.constant 0 : index
    %72 = tpu.strided_load %arg14[%c2_82, %c2_83, %c0_84] {strides = array<i32: 2, 2, 1>} : memref<18x18x8xf32, #tpu.memory_space<vmem>>, vector<8x8x8xf32>
    %73 = vector.shape_cast %72 : vector<8x8x8xf32> to vector<64x8xf32>
    %74 = arith.truncf %73 : vector<64x8xf32> to vector<64x8xbf16>
    %c8 = arith.constant 8 : index
    %c0_85 = arith.constant 0 : index
    %c0_86 = arith.constant 0 : index
    %75 = vector.load %arg10[%c8, %c0_85, %c0_86] : memref<9x8x16xbf16, #tpu.memory_space<vmem>>, vector<1x8x16xbf16>
    %76 = vector.shape_cast %75 : vector<1x8x16xbf16> to vector<8x16xbf16>
    %cst_87 = arith.constant dense<0.000000e+00> : vector<64x16xf32>
    %77 = tpu.matmul %74, %76, %cst_87 {dimension_numbers = #tpu.dot_dimension_numbers<[1], [0], [0], [1], [0, 0, 1, 1], [], []>} : vector<64x8xbf16>, vector<8x16xbf16>, vector<64x16xf32> -> vector<64x16xf32>
    %78 = arith.addf %71, %77 : vector<64x16xf32>
    %c0_88 = arith.constant 0 : index
    %c0_89 = arith.constant 0 : index
    %79 = vector.load %arg11[%c0_88, %c0_89] : memref<1x16xf32, #tpu.memory_space<vmem>>, vector<1x16xf32>
    %80 = vector.shape_cast %79 : vector<1x16xf32> to vector<16xf32>
    %81 = vector.shape_cast %80 : vector<16xf32> to vector<1x16xf32>
    %82 = vector.broadcast %81 : vector<1x16xf32> to vector<64x16xf32>
    %83 = arith.mulf %78, %82 : vector<64x16xf32>
    %c0_90 = arith.constant 0 : index
    %c0_91 = arith.constant 0 : index
    %84 = vector.load %arg12[%c0_90, %c0_91] : memref<1x16xf32, #tpu.memory_space<vmem>>, vector<1x16xf32>
    %85 = vector.shape_cast %84 : vector<1x16xf32> to vector<16xf32>
    %86 = vector.shape_cast %85 : vector<16xf32> to vector<1x16xf32>
    %87 = vector.broadcast %86 : vector<1x16xf32> to vector<64x16xf32>
    %88 = arith.addf %83, %87 : vector<64x16xf32>
    %c0_92 = arith.constant 0 : index
    %c0_93 = arith.constant 0 : index
    %89 = vector.load %arg2[%c0_92, %c0_93] : memref<1x8xf32, #tpu.memory_space<vmem>>, vector<1x8xf32>
    %90 = vector.shape_cast %89 : vector<1x8xf32> to vector<8xf32>
    %91 = vector.shape_cast %90 : vector<8xf32> to vector<1x1x8xf32>
    %92 = vector.broadcast %91 : vector<1x1x8xf32> to vector<16x16x8xf32>
    %93 = arith.mulf %13, %92 : vector<16x16x8xf32>
    %c0_94 = arith.constant 0 : index
    %c0_95 = arith.constant 0 : index
    %94 = vector.load %arg3[%c0_94, %c0_95] : memref<1x8xf32, #tpu.memory_space<vmem>>, vector<1x8xf32>
    %95 = vector.shape_cast %94 : vector<1x8xf32> to vector<8xf32>
    %96 = vector.shape_cast %95 : vector<8xf32> to vector<1x1x8xf32>
    %97 = vector.broadcast %96 : vector<1x1x8xf32> to vector<16x16x8xf32>
    %98 = arith.addf %93, %97 : vector<16x16x8xf32>
    %c1_96 = arith.constant 1 : index
    %c1_97 = arith.constant 1 : index
    %c0_98 = arith.constant 0 : index
    %99 = vector.load %arg14[%c1_96, %c1_97, %c0_98] : memref<18x18x8xf32, #tpu.memory_space<vmem>>, vector<16x16x8xf32>
    tpu.vector_store %arg14[%c1_96, %c1_97, %c0_98], %98 {strides = array<i32>} : memref<18x18x8xf32, #tpu.memory_space<vmem>>, vector<16x16x8xf32>,
    %cst_99 = arith.constant 0.000000e+00 : f32
    %100 = vector.broadcast %cst_99 : f32 to vector<256x16xf32>
    %c0_100 = arith.constant 0 : index
    %c0_101 = arith.constant 0 : index
    %c0_102 = arith.constant 0 : index
    %101 = vector.load %arg14[%c0_100, %c0_101, %c0_102] : memref<18x18x8xf32, #tpu.memory_space<vmem>>, vector<16x16x8xf32>
    %102 = vector.shape_cast %101 : vector<16x16x8xf32> to vector<256x8xf32>
    %103 = arith.truncf %102 : vector<256x8xf32> to vector<256x8xbf16>
    %c0_103 = arith.constant 0 : index
    %c0_104 = arith.constant 0 : index
    %c0_105 = arith.constant 0 : index
    %104 = vector.load %arg4[%c0_103, %c0_104, %c0_105] : memref<9x8x16xbf16, #tpu.memory_space<vmem>>, vector<1x8x16xbf16>
    %105 = vector.shape_cast %104 : vector<1x8x16xbf16> to vector<8x16xbf16>
    %cst_106 = arith.constant dense<0.000000e+00> : vector<256x16xf32>
    %106 = tpu.matmul %103, %105, %cst_106 {dimension_numbers = #tpu.dot_dimension_numbers<[1], [0], [0], [1], [0, 0, 1, 1], [], []>} : vector<256x8xbf16>, vector<8x16xbf16>, vector<256x16xf32> -> vector<256x16xf32>
    %107 = arith.addf %100, %106 : vector<256x16xf32>
    %c0_107 = arith.constant 0 : index
    %c1_108 = arith.constant 1 : index
    %c0_109 = arith.constant 0 : index
    %108 = vector.load %arg14[%c0_107, %c1_108, %c0_109] : memref<18x18x8xf32, #tpu.memory_space<vmem>>, vector<16x16x8xf32>
    %109 = vector.shape_cast %108 : vector<16x16x8xf32> to vector<256x8xf32>
    %110 = arith.truncf %109 : vector<256x8xf32> to vector<256x8xbf16>
    %c1_110 = arith.constant 1 : index
    %c0_111 = arith.constant 0 : index
    %c0_112 = arith.constant 0 : index
    %111 = vector.load %arg4[%c1_110, %c0_111, %c0_112] : memref<9x8x16xbf16, #tpu.memory_space<vmem>>, vector<1x8x16xbf16>
    %112 = vector.shape_cast %111 : vector<1x8x16xbf16> to vector<8x16xbf16>
    %cst_113 = arith.constant dense<0.000000e+00> : vector<256x16xf32>
    %113 = tpu.matmul %110, %112, %cst_113 {dimension_numbers = #tpu.dot_dimension_numbers<[1], [0], [0], [1], [0, 0, 1, 1], [], []>} : vector<256x8xbf16>, vector<8x16xbf16>, vector<256x16xf32> -> vector<256x16xf32>
    %114 = arith.addf %107, %113 : vector<256x16xf32>
    %c0_114 = arith.constant 0 : index
    %c2_115 = arith.constant 2 : index
    %c0_116 = arith.constant 0 : index
    %115 = vector.load %arg14[%c0_114, %c2_115, %c0_116] : memref<18x18x8xf32, #tpu.memory_space<vmem>>, vector<16x16x8xf32>
    %116 = vector.shape_cast %115 : vector<16x16x8xf32> to vector<256x8xf32>
    %117 = arith.truncf %116 : vector<256x8xf32> to vector<256x8xbf16>
    %c2_117 = arith.constant 2 : index
    %c0_118 = arith.constant 0 : index
    %c0_119 = arith.constant 0 : index
    %118 = vector.load %arg4[%c2_117, %c0_118, %c0_119] : memref<9x8x16xbf16, #tpu.memory_space<vmem>>, vector<1x8x16xbf16>
    %119 = vector.shape_cast %118 : vector<1x8x16xbf16> to vector<8x16xbf16>
    %cst_120 = arith.constant dense<0.000000e+00> : vector<256x16xf32>
    %120 = tpu.matmul %117, %119, %cst_120 {dimension_numbers = #tpu.dot_dimension_numbers<[1], [0], [0], [1], [0, 0, 1, 1], [], []>} : vector<256x8xbf16>, vector<8x16xbf16>, vector<256x16xf32> -> vector<256x16xf32>
    %121 = arith.addf %114, %120 : vector<256x16xf32>
    %c1_121 = arith.constant 1 : index
    %c0_122 = arith.constant 0 : index
    %c0_123 = arith.constant 0 : index
    %122 = vector.load %arg14[%c1_121, %c0_122, %c0_123] : memref<18x18x8xf32, #tpu.memory_space<vmem>>, vector<16x16x8xf32>
    %123 = vector.shape_cast %122 : vector<16x16x8xf32> to vector<256x8xf32>
    %124 = arith.truncf %123 : vector<256x8xf32> to vector<256x8xbf16>
    %c3_124 = arith.constant 3 : index
    %c0_125 = arith.constant 0 : index
    %c0_126 = arith.constant 0 : index
    %125 = vector.load %arg4[%c3_124, %c0_125, %c0_126] : memref<9x8x16xbf16, #tpu.memory_space<vmem>>, vector<1x8x16xbf16>
    %126 = vector.shape_cast %125 : vector<1x8x16xbf16> to vector<8x16xbf16>
    %cst_127 = arith.constant dense<0.000000e+00> : vector<256x16xf32>
    %127 = tpu.matmul %124, %126, %cst_127 {dimension_numbers = #tpu.dot_dimension_numbers<[1], [0], [0], [1], [0, 0, 1, 1], [], []>} : vector<256x8xbf16>, vector<8x16xbf16>, vector<256x16xf32> -> vector<256x16xf32>
    %128 = arith.addf %121, %127 : vector<256x16xf32>
    %c1_128 = arith.constant 1 : index
    %c1_129 = arith.constant 1 : index
    %c0_130 = arith.constant 0 : index
    %129 = vector.load %arg14[%c1_128, %c1_129, %c0_130] : memref<18x18x8xf32, #tpu.memory_space<vmem>>, vector<16x16x8xf32>
    %130 = vector.shape_cast %129 : vector<16x16x8xf32> to vector<256x8xf32>
    %131 = arith.truncf %130 : vector<256x8xf32> to vector<256x8xbf16>
    %c4_131 = arith.constant 4 : index
    %c0_132 = arith.constant 0 : index
    %c0_133 = arith.constant 0 : index
    %132 = vector.load %arg4[%c4_131, %c0_132, %c0_133] : memref<9x8x16xbf16, #tpu.memory_space<vmem>>, vector<1x8x16xbf16>
    %133 = vector.shape_cast %132 : vector<1x8x16xbf16> to vector<8x16xbf16>
    %cst_134 = arith.constant dense<0.000000e+00> : vector<256x16xf32>
    %134 = tpu.matmul %131, %133, %cst_134 {dimension_numbers = #tpu.dot_dimension_numbers<[1], [0], [0], [1], [0, 0, 1, 1], [], []>} : vector<256x8xbf16>, vector<8x16xbf16>, vector<256x16xf32> -> vector<256x16xf32>
    %135 = arith.addf %128, %134 : vector<256x16xf32>
    %c1_135 = arith.constant 1 : index
    %c2_136 = arith.constant 2 : index
    %c0_137 = arith.constant 0 : index
    %136 = vector.load %arg14[%c1_135, %c2_136, %c0_137] : memref<18x18x8xf32, #tpu.memory_space<vmem>>, vector<16x16x8xf32>
    %137 = vector.shape_cast %136 : vector<16x16x8xf32> to vector<256x8xf32>
    %138 = arith.truncf %137 : vector<256x8xf32> to vector<256x8xbf16>
    %c5_138 = arith.constant 5 : index
    %c0_139 = arith.constant 0 : index
    %c0_140 = arith.constant 0 : index
    %139 = vector.load %arg4[%c5_138, %c0_139, %c0_140] : memref<9x8x16xbf16, #tpu.memory_space<vmem>>, vector<1x8x16xbf16>
    %140 = vector.shape_cast %139 : vector<1x8x16xbf16> to vector<8x16xbf16>
    %cst_141 = arith.constant dense<0.000000e+00> : vector<256x16xf32>
    %141 = tpu.matmul %138, %140, %cst_141 {dimension_numbers = #tpu.dot_dimension_numbers<[1], [0], [0], [1], [0, 0, 1, 1], [], []>} : vector<256x8xbf16>, vector<8x16xbf16>, vector<256x16xf32> -> vector<256x16xf32>
    %142 = arith.addf %135, %141 : vector<256x16xf32>
    %c2_142 = arith.constant 2 : index
    %c0_143 = arith.constant 0 : index
    %c0_144 = arith.constant 0 : index
    %143 = vector.load %arg14[%c2_142, %c0_143, %c0_144] : memref<18x18x8xf32, #tpu.memory_space<vmem>>, vector<16x16x8xf32>
    %144 = vector.shape_cast %143 : vector<16x16x8xf32> to vector<256x8xf32>
    %145 = arith.truncf %144 : vector<256x8xf32> to vector<256x8xbf16>
    %c6_145 = arith.constant 6 : index
    %c0_146 = arith.constant 0 : index
    %c0_147 = arith.constant 0 : index
    %146 = vector.load %arg4[%c6_145, %c0_146, %c0_147] : memref<9x8x16xbf16, #tpu.memory_space<vmem>>, vector<1x8x16xbf16>
    %147 = vector.shape_cast %146 : vector<1x8x16xbf16> to vector<8x16xbf16>
    %cst_148 = arith.constant dense<0.000000e+00> : vector<256x16xf32>
    %148 = tpu.matmul %145, %147, %cst_148 {dimension_numbers = #tpu.dot_dimension_numbers<[1], [0], [0], [1], [0, 0, 1, 1], [], []>} : vector<256x8xbf16>, vector<8x16xbf16>, vector<256x16xf32> -> vector<256x16xf32>
    %149 = arith.addf %142, %148 : vector<256x16xf32>
    %c2_149 = arith.constant 2 : index
    %c1_150 = arith.constant 1 : index
    %c0_151 = arith.constant 0 : index
    %150 = vector.load %arg14[%c2_149, %c1_150, %c0_151] : memref<18x18x8xf32, #tpu.memory_space<vmem>>, vector<16x16x8xf32>
    %151 = vector.shape_cast %150 : vector<16x16x8xf32> to vector<256x8xf32>
    %152 = arith.truncf %151 : vector<256x8xf32> to vector<256x8xbf16>
    %c7_152 = arith.constant 7 : index
    %c0_153 = arith.constant 0 : index
    %c0_154 = arith.constant 0 : index
    %153 = vector.load %arg4[%c7_152, %c0_153, %c0_154] : memref<9x8x16xbf16, #tpu.memory_space<vmem>>, vector<1x8x16xbf16>
    %154 = vector.shape_cast %153 : vector<1x8x16xbf16> to vector<8x16xbf16>
    %cst_155 = arith.constant dense<0.000000e+00> : vector<256x16xf32>
    %155 = tpu.matmul %152, %154, %cst_155 {dimension_numbers = #tpu.dot_dimension_numbers<[1], [0], [0], [1], [0, 0, 1, 1], [], []>} : vector<256x8xbf16>, vector<8x16xbf16>, vector<256x16xf32> -> vector<256x16xf32>
    %156 = arith.addf %149, %155 : vector<256x16xf32>
    %c2_156 = arith.constant 2 : index
    %c2_157 = arith.constant 2 : index
    %c0_158 = arith.constant 0 : index
    %157 = vector.load %arg14[%c2_156, %c2_157, %c0_158] : memref<18x18x8xf32, #tpu.memory_space<vmem>>, vector<16x16x8xf32>
    %158 = vector.shape_cast %157 : vector<16x16x8xf32> to vector<256x8xf32>
    %159 = arith.truncf %158 : vector<256x8xf32> to vector<256x8xbf16>
    %c8_159 = arith.constant 8 : index
    %c0_160 = arith.constant 0 : index
    %c0_161 = arith.constant 0 : index
    %160 = vector.load %arg4[%c8_159, %c0_160, %c0_161] : memref<9x8x16xbf16, #tpu.memory_space<vmem>>, vector<1x8x16xbf16>
    %161 = vector.shape_cast %160 : vector<1x8x16xbf16> to vector<8x16xbf16>
    %cst_162 = arith.constant dense<0.000000e+00> : vector<256x16xf32>
    %162 = tpu.matmul %159, %161, %cst_162 {dimension_numbers = #tpu.dot_dimension_numbers<[1], [0], [0], [1], [0, 0, 1, 1], [], []>} : vector<256x8xbf16>, vector<8x16xbf16>, vector<256x16xf32> -> vector<256x16xf32>
    %163 = arith.addf %156, %162 : vector<256x16xf32>
    %c0_163 = arith.constant 0 : index
    %c0_164 = arith.constant 0 : index
    %164 = vector.load %arg5[%c0_163, %c0_164] : memref<1x16xf32, #tpu.memory_space<vmem>>, vector<1x16xf32>
    %165 = vector.shape_cast %164 : vector<1x16xf32> to vector<16xf32>
    %166 = vector.shape_cast %165 : vector<16xf32> to vector<1x16xf32>
    %167 = vector.broadcast %166 : vector<1x16xf32> to vector<256x16xf32>
    %168 = arith.mulf %163, %167 : vector<256x16xf32>
    %c0_165 = arith.constant 0 : index
    %c0_166 = arith.constant 0 : index
    %169 = vector.load %arg6[%c0_165, %c0_166] : memref<1x16xf32, #tpu.memory_space<vmem>>, vector<1x16xf32>
    %170 = vector.shape_cast %169 : vector<1x16xf32> to vector<16xf32>
    %171 = vector.shape_cast %170 : vector<16xf32> to vector<1x16xf32>
    %172 = vector.broadcast %171 : vector<1x16xf32> to vector<256x16xf32>
    %173 = arith.addf %168, %172 : vector<256x16xf32>
    %cst_167 = arith.constant 0.000000e+00 : f32
    %174 = vector.broadcast %cst_167 : f32 to vector<256x16xf32>
    %175 = arith.maximumf %173, %174 : vector<256x16xf32>
    %176 = vector.shape_cast %175 : vector<256x16xf32> to vector<16x16x16xf32>
    %c1_168 = arith.constant 1 : index
    %c1_169 = arith.constant 1 : index
    %c0_170 = arith.constant 0 : index
    %177 = vector.load %arg15[%c1_168, %c1_169, %c0_170] : memref<18x18x16xf32, #tpu.memory_space<vmem>>, vector<16x16x16xf32>
    tpu.vector_store %arg15[%c1_168, %c1_169, %c0_170], %176 {strides = array<i32>} : memref<18x18x16xf32, #tpu.memory_space<vmem>>, vector<16x16x16xf32>,
    %cst_171 = arith.constant 0.000000e+00 : f32
    %178 = vector.broadcast %cst_171 : f32 to vector<64x16xf32>
    %c0_172 = arith.constant 0 : index
    %c0_173 = arith.constant 0 : index
    %c0_174 = arith.constant 0 : index
    %179 = tpu.strided_load %arg15[%c0_172, %c0_173, %c0_174] {strides = array<i32: 2, 2, 1>} : memref<18x18x16xf32, #tpu.memory_space<vmem>>, vector<8x8x16xf32>
    %180 = vector.shape_cast %179 : vector<8x8x16xf32> to vector<64x16xf32>
    %181 = arith.truncf %180 : vector<64x16xf32> to vector<64x16xbf16>
    %c0_175 = arith.constant 0 : index
    %c0_176 = arith.constant 0 : index
    %c0_177 = arith.constant 0 : index
    %182 = vector.load %arg7[%c0_175, %c0_176, %c0_177] : memref<9x16x16xbf16, #tpu.memory_space<vmem>>, vector<1x16x16xbf16>
    %183 = vector.shape_cast %182 : vector<1x16x16xbf16> to vector<16x16xbf16>
    %cst_178 = arith.constant dense<0.000000e+00> : vector<64x16xf32>
    %184 = tpu.matmul %181, %183, %cst_178 {dimension_numbers = #tpu.dot_dimension_numbers<[1], [0], [0], [1], [0, 0, 1, 1], [], []>} : vector<64x16xbf16>, vector<16x16xbf16>, vector<64x16xf32> -> vector<64x16xf32>
    %185 = arith.addf %178, %184 : vector<64x16xf32>
    %c0_179 = arith.constant 0 : index
    %c1_180 = arith.constant 1 : index
    %c0_181 = arith.constant 0 : index
    %186 = tpu.strided_load %arg15[%c0_179, %c1_180, %c0_181] {strides = array<i32: 2, 2, 1>} : memref<18x18x16xf32, #tpu.memory_space<vmem>>, vector<8x8x16xf32>
    %187 = vector.shape_cast %186 : vector<8x8x16xf32> to vector<64x16xf32>
    %188 = arith.truncf %187 : vector<64x16xf32> to vector<64x16xbf16>
    %c1_182 = arith.constant 1 : index
    %c0_183 = arith.constant 0 : index
    %c0_184 = arith.constant 0 : index
    %189 = vector.load %arg7[%c1_182, %c0_183, %c0_184] : memref<9x16x16xbf16, #tpu.memory_space<vmem>>, vector<1x16x16xbf16>
    %190 = vector.shape_cast %189 : vector<1x16x16xbf16> to vector<16x16xbf16>
    %cst_185 = arith.constant dense<0.000000e+00> : vector<64x16xf32>
    %191 = tpu.matmul %188, %190, %cst_185 {dimension_numbers = #tpu.dot_dimension_numbers<[1], [0], [0], [1], [0, 0, 1, 1], [], []>} : vector<64x16xbf16>, vector<16x16xbf16>, vector<64x16xf32> -> vector<64x16xf32>
    %192 = arith.addf %185, %191 : vector<64x16xf32>
    %c0_186 = arith.constant 0 : index
    %c2_187 = arith.constant 2 : index
    %c0_188 = arith.constant 0 : index
    %193 = tpu.strided_load %arg15[%c0_186, %c2_187, %c0_188] {strides = array<i32: 2, 2, 1>} : memref<18x18x16xf32, #tpu.memory_space<vmem>>, vector<8x8x16xf32>
    %194 = vector.shape_cast %193 : vector<8x8x16xf32> to vector<64x16xf32>
    %195 = arith.truncf %194 : vector<64x16xf32> to vector<64x16xbf16>
    %c2_189 = arith.constant 2 : index
    %c0_190 = arith.constant 0 : index
    %c0_191 = arith.constant 0 : index
    %196 = vector.load %arg7[%c2_189, %c0_190, %c0_191] : memref<9x16x16xbf16, #tpu.memory_space<vmem>>, vector<1x16x16xbf16>
    %197 = vector.shape_cast %196 : vector<1x16x16xbf16> to vector<16x16xbf16>
    %cst_192 = arith.constant dense<0.000000e+00> : vector<64x16xf32>
    %198 = tpu.matmul %195, %197, %cst_192 {dimension_numbers = #tpu.dot_dimension_numbers<[1], [0], [0], [1], [0, 0, 1, 1], [], []>} : vector<64x16xbf16>, vector<16x16xbf16>, vector<64x16xf32> -> vector<64x16xf32>
    %199 = arith.addf %192, %198 : vector<64x16xf32>
    %c1_193 = arith.constant 1 : index
    %c0_194 = arith.constant 0 : index
    %c0_195 = arith.constant 0 : index
    %200 = tpu.strided_load %arg15[%c1_193, %c0_194, %c0_195] {strides = array<i32: 2, 2, 1>} : memref<18x18x16xf32, #tpu.memory_space<vmem>>, vector<8x8x16xf32>
    %201 = vector.shape_cast %200 : vector<8x8x16xf32> to vector<64x16xf32>
    %202 = arith.truncf %201 : vector<64x16xf32> to vector<64x16xbf16>
    %c3_196 = arith.constant 3 : index
    %c0_197 = arith.constant 0 : index
    %c0_198 = arith.constant 0 : index
    %203 = vector.load %arg7[%c3_196, %c0_197, %c0_198] : memref<9x16x16xbf16, #tpu.memory_space<vmem>>, vector<1x16x16xbf16>
    %204 = vector.shape_cast %203 : vector<1x16x16xbf16> to vector<16x16xbf16>
    %cst_199 = arith.constant dense<0.000000e+00> : vector<64x16xf32>
    %205 = tpu.matmul %202, %204, %cst_199 {dimension_numbers = #tpu.dot_dimension_numbers<[1], [0], [0], [1], [0, 0, 1, 1], [], []>} : vector<64x16xbf16>, vector<16x16xbf16>, vector<64x16xf32> -> vector<64x16xf32>
    %206 = arith.addf %199, %205 : vector<64x16xf32>
    %c1_200 = arith.constant 1 : index
    %c1_201 = arith.constant 1 : index
    %c0_202 = arith.constant 0 : index
    %207 = tpu.strided_load %arg15[%c1_200, %c1_201, %c0_202] {strides = array<i32: 2, 2, 1>} : memref<18x18x16xf32, #tpu.memory_space<vmem>>, vector<8x8x16xf32>
    %208 = vector.shape_cast %207 : vector<8x8x16xf32> to vector<64x16xf32>
    %209 = arith.truncf %208 : vector<64x16xf32> to vector<64x16xbf16>
    %c4_203 = arith.constant 4 : index
    %c0_204 = arith.constant 0 : index
    %c0_205 = arith.constant 0 : index
    %210 = vector.load %arg7[%c4_203, %c0_204, %c0_205] : memref<9x16x16xbf16, #tpu.memory_space<vmem>>, vector<1x16x16xbf16>
    %211 = vector.shape_cast %210 : vector<1x16x16xbf16> to vector<16x16xbf16>
    %cst_206 = arith.constant dense<0.000000e+00> : vector<64x16xf32>
    %212 = tpu.matmul %209, %211, %cst_206 {dimension_numbers = #tpu.dot_dimension_numbers<[1], [0], [0], [1], [0, 0, 1, 1], [], []>} : vector<64x16xbf16>, vector<16x16xbf16>, vector<64x16xf32> -> vector<64x16xf32>
    %213 = arith.addf %206, %212 : vector<64x16xf32>
    %c1_207 = arith.constant 1 : index
    %c2_208 = arith.constant 2 : index
    %c0_209 = arith.constant 0 : index
    %214 = tpu.strided_load %arg15[%c1_207, %c2_208, %c0_209] {strides = array<i32: 2, 2, 1>} : memref<18x18x16xf32, #tpu.memory_space<vmem>>, vector<8x8x16xf32>
    %215 = vector.shape_cast %214 : vector<8x8x16xf32> to vector<64x16xf32>
    %216 = arith.truncf %215 : vector<64x16xf32> to vector<64x16xbf16>
    %c5_210 = arith.constant 5 : index
    %c0_211 = arith.constant 0 : index
    %c0_212 = arith.constant 0 : index
    %217 = vector.load %arg7[%c5_210, %c0_211, %c0_212] : memref<9x16x16xbf16, #tpu.memory_space<vmem>>, vector<1x16x16xbf16>
    %218 = vector.shape_cast %217 : vector<1x16x16xbf16> to vector<16x16xbf16>
    %cst_213 = arith.constant dense<0.000000e+00> : vector<64x16xf32>
    %219 = tpu.matmul %216, %218, %cst_213 {dimension_numbers = #tpu.dot_dimension_numbers<[1], [0], [0], [1], [0, 0, 1, 1], [], []>} : vector<64x16xbf16>, vector<16x16xbf16>, vector<64x16xf32> -> vector<64x16xf32>
    %220 = arith.addf %213, %219 : vector<64x16xf32>
    %c2_214 = arith.constant 2 : index
    %c0_215 = arith.constant 0 : index
    %c0_216 = arith.constant 0 : index
    %221 = tpu.strided_load %arg15[%c2_214, %c0_215, %c0_216] {strides = array<i32: 2, 2, 1>} : memref<18x18x16xf32, #tpu.memory_space<vmem>>, vector<8x8x16xf32>
    %222 = vector.shape_cast %221 : vector<8x8x16xf32> to vector<64x16xf32>
    %223 = arith.truncf %222 : vector<64x16xf32> to vector<64x16xbf16>
    %c6_217 = arith.constant 6 : index
    %c0_218 = arith.constant 0 : index
    %c0_219 = arith.constant 0 : index
    %224 = vector.load %arg7[%c6_217, %c0_218, %c0_219] : memref<9x16x16xbf16, #tpu.memory_space<vmem>>, vector<1x16x16xbf16>
    %225 = vector.shape_cast %224 : vector<1x16x16xbf16> to vector<16x16xbf16>
    %cst_220 = arith.constant dense<0.000000e+00> : vector<64x16xf32>
    %226 = tpu.matmul %223, %225, %cst_220 {dimension_numbers = #tpu.dot_dimension_numbers<[1], [0], [0], [1], [0, 0, 1, 1], [], []>} : vector<64x16xbf16>, vector<16x16xbf16>, vector<64x16xf32> -> vector<64x16xf32>
    %227 = arith.addf %220, %226 : vector<64x16xf32>
    %c2_221 = arith.constant 2 : index
    %c1_222 = arith.constant 1 : index
    %c0_223 = arith.constant 0 : index
    %228 = tpu.strided_load %arg15[%c2_221, %c1_222, %c0_223] {strides = array<i32: 2, 2, 1>} : memref<18x18x16xf32, #tpu.memory_space<vmem>>, vector<8x8x16xf32>
    %229 = vector.shape_cast %228 : vector<8x8x16xf32> to vector<64x16xf32>
    %230 = arith.truncf %229 : vector<64x16xf32> to vector<64x16xbf16>
    %c7_224 = arith.constant 7 : index
    %c0_225 = arith.constant 0 : index
    %c0_226 = arith.constant 0 : index
    %231 = vector.load %arg7[%c7_224, %c0_225, %c0_226] : memref<9x16x16xbf16, #tpu.memory_space<vmem>>, vector<1x16x16xbf16>
    %232 = vector.shape_cast %231 : vector<1x16x16xbf16> to vector<16x16xbf16>
    %cst_227 = arith.constant dense<0.000000e+00> : vector<64x16xf32>
    %233 = tpu.matmul %230, %232, %cst_227 {dimension_numbers = #tpu.dot_dimension_numbers<[1], [0], [0], [1], [0, 0, 1, 1], [], []>} : vector<64x16xbf16>, vector<16x16xbf16>, vector<64x16xf32> -> vector<64x16xf32>
    %234 = arith.addf %227, %233 : vector<64x16xf32>
    %c2_228 = arith.constant 2 : index
    %c2_229 = arith.constant 2 : index
    %c0_230 = arith.constant 0 : index
    %235 = tpu.strided_load %arg15[%c2_228, %c2_229, %c0_230] {strides = array<i32: 2, 2, 1>} : memref<18x18x16xf32, #tpu.memory_space<vmem>>, vector<8x8x16xf32>
    %236 = vector.shape_cast %235 : vector<8x8x16xf32> to vector<64x16xf32>
    %237 = arith.truncf %236 : vector<64x16xf32> to vector<64x16xbf16>
    %c8_231 = arith.constant 8 : index
    %c0_232 = arith.constant 0 : index
    %c0_233 = arith.constant 0 : index
    %238 = vector.load %arg7[%c8_231, %c0_232, %c0_233] : memref<9x16x16xbf16, #tpu.memory_space<vmem>>, vector<1x16x16xbf16>
    %239 = vector.shape_cast %238 : vector<1x16x16xbf16> to vector<16x16xbf16>
    %cst_234 = arith.constant dense<0.000000e+00> : vector<64x16xf32>
    %240 = tpu.matmul %237, %239, %cst_234 {dimension_numbers = #tpu.dot_dimension_numbers<[1], [0], [0], [1], [0, 0, 1, 1], [], []>} : vector<64x16xbf16>, vector<16x16xbf16>, vector<64x16xf32> -> vector<64x16xf32>
    %241 = arith.addf %234, %240 : vector<64x16xf32>
    %c0_235 = arith.constant 0 : index
    %c0_236 = arith.constant 0 : index
    %242 = vector.load %arg8[%c0_235, %c0_236] : memref<1x16xf32, #tpu.memory_space<vmem>>, vector<1x16xf32>
    %243 = vector.shape_cast %242 : vector<1x16xf32> to vector<16xf32>
    %244 = vector.shape_cast %243 : vector<16xf32> to vector<1x16xf32>
    %245 = vector.broadcast %244 : vector<1x16xf32> to vector<64x16xf32>
    %246 = arith.mulf %241, %245 : vector<64x16xf32>
    %c0_237 = arith.constant 0 : index
    %c0_238 = arith.constant 0 : index
    %247 = vector.load %arg9[%c0_237, %c0_238] : memref<1x16xf32, #tpu.memory_space<vmem>>, vector<1x16xf32>
    %248 = vector.shape_cast %247 : vector<1x16xf32> to vector<16xf32>
    %249 = vector.shape_cast %248 : vector<16xf32> to vector<1x16xf32>
    %250 = vector.broadcast %249 : vector<1x16xf32> to vector<64x16xf32>
    %251 = arith.addf %246, %250 : vector<64x16xf32>
    %cst_239 = arith.constant 0.000000e+00 : f32
    %252 = vector.broadcast %cst_239 : f32 to vector<64x16xf32>
    %253 = arith.maximumf %251, %252 : vector<64x16xf32>
    %254 = arith.addf %253, %88 : vector<64x16xf32>
    %255 = vector.shape_cast %254 : vector<64x16xf32> to vector<8x8x16xf32>
    %c0_240 = arith.constant 0 : index
    %c0_241 = arith.constant 0 : index
    %c0_242 = arith.constant 0 : index
    %c0_243 = arith.constant 0 : index
    %256 = vector.load %arg13[%c0_240, %c0_241, %c0_242, %c0_243] : memref<1x8x8x16xf32, #tpu.memory_space<vmem>>, vector<1x8x8x16xf32>
    %257 = vector.shape_cast %256 : vector<1x8x8x16xf32> to vector<8x8x16xf32>
    %258 = vector.shape_cast %255 : vector<8x8x16xf32> to vector<1x8x8x16xf32>
    tpu.vector_store %arg13[%c0_240, %c0_241, %c0_242, %c0_243], %258 {strides = array<i32>} : memref<1x8x8x16xf32, #tpu.memory_space<vmem>>, vector<1x8x8x16xf32>,
    return
  }
  func.func @transform_0(%arg0: i32) -> (i32, i32, i32, i32) {
    %c0_i32 = arith.constant 0 : i32
    %c0_i32_0 = arith.constant 0 : i32
    %c0_i32_1 = arith.constant 0 : i32
    %c0_i32_2 = arith.constant 0 : i32
    return %arg0, %c0_i32, %c0_i32_0, %c0_i32_1 : i32, i32, i32, i32
  }
  func.func @transform_1(%arg0: i32) -> (i32, i32) {
    %c0_i32 = arith.constant 0 : i32
    %c0_i32_0 = arith.constant 0 : i32
    %c0_i32_1 = arith.constant 0 : i32
    return %c0_i32, %c0_i32_0 : i32, i32
  }
  func.func @transform_2(%arg0: i32) -> (i32, i32) {
    %c0_i32 = arith.constant 0 : i32
    %c0_i32_0 = arith.constant 0 : i32
    %c0_i32_1 = arith.constant 0 : i32
    return %c0_i32, %c0_i32_0 : i32, i32
  }
  func.func @transform_3(%arg0: i32) -> (i32, i32, i32) {
    %c0_i32 = arith.constant 0 : i32
    %c0_i32_0 = arith.constant 0 : i32
    %c0_i32_1 = arith.constant 0 : i32
    %c0_i32_2 = arith.constant 0 : i32
    return %c0_i32, %c0_i32_0, %c0_i32_1 : i32, i32, i32
  }
  func.func @transform_4(%arg0: i32) -> (i32, i32) {
    %c0_i32 = arith.constant 0 : i32
    %c0_i32_0 = arith.constant 0 : i32
    %c0_i32_1 = arith.constant 0 : i32
    return %c0_i32, %c0_i32_0 : i32, i32
  }
  func.func @transform_5(%arg0: i32) -> (i32, i32) {
    %c0_i32 = arith.constant 0 : i32
    %c0_i32_0 = arith.constant 0 : i32
    %c0_i32_1 = arith.constant 0 : i32
    return %c0_i32, %c0_i32_0 : i32, i32
  }
  func.func @transform_6(%arg0: i32) -> (i32, i32, i32) {
    %c0_i32 = arith.constant 0 : i32
    %c0_i32_0 = arith.constant 0 : i32
    %c0_i32_1 = arith.constant 0 : i32
    %c0_i32_2 = arith.constant 0 : i32
    return %c0_i32, %c0_i32_0, %c0_i32_1 : i32, i32, i32
  }
  func.func @transform_7(%arg0: i32) -> (i32, i32) {
    %c0_i32 = arith.constant 0 : i32
    %c0_i32_0 = arith.constant 0 : i32
    %c0_i32_1 = arith.constant 0 : i32
    return %c0_i32, %c0_i32_0 : i32, i32
  }
  func.func @transform_8(%arg0: i32) -> (i32, i32) {
    %c0_i32 = arith.constant 0 : i32
    %c0_i32_0 = arith.constant 0 : i32
    %c0_i32_1 = arith.constant 0 : i32
    return %c0_i32, %c0_i32_0 : i32, i32
  }
  func.func @transform_9(%arg0: i32) -> (i32, i32, i32) {
    %c0_i32 = arith.constant 0 : i32
    %c0_i32_0 = arith.constant 0 : i32
    %c0_i32_1 = arith.constant 0 : i32
    %c0_i32_2 = arith.constant 0 : i32
    return %c0_i32, %c0_i32_0, %c0_i32_1 : i32, i32, i32
  }
  func.func @transform_10(%arg0: i32) -> (i32, i32) {
    %c0_i32 = arith.constant 0 : i32
    %c0_i32_0 = arith.constant 0 : i32
    %c0_i32_1 = arith.constant 0 : i32
    return %c0_i32, %c0_i32_0 : i32, i32
  }
  func.func @transform_11(%arg0: i32) -> (i32, i32) {
    %c0_i32 = arith.constant 0 : i32
    %c0_i32_0 = arith.constant 0 : i32
    %c0_i32_1 = arith.constant 0 : i32
    return %c0_i32, %c0_i32_0 : i32, i32
  }
  func.func @transform_12(%arg0: i32) -> (i32, i32, i32, i32) {
    %c0_i32 = arith.constant 0 : i32
    %c0_i32_0 = arith.constant 0 : i32
    %c0_i32_1 = arith.constant 0 : i32
    %c0_i32_2 = arith.constant 0 : i32
    return %arg0, %c0_i32, %c0_i32_0, %c0_i32_1 : i32, i32, i32, i32
  }
}

</mosaic_0001>

<bundles_post_ra>
// kernel: tpu_custom_call.1
= control target key start
LH: loop header
LB: loop body
LE: loop exit
PB: predicated region body
PF: predicated region fallthrough
CT: control target
= control target key end

     0   :  { %s8872_s0 = inlined_call_operand.vmem [shape: f32[2,16,16,8], index: 0, kind: input, shape index: {}]   ;;  %s8873_s1 = inlined_call_operand.vmem [shape: f32[1,8], index: 1, kind: input, shape index: {}]   ;;  %s8874_s2 = inlined_call_operand.vmem [shape: f32[1,8], index: 2, kind: input, shape index: {}]   ;;  %s8875_s3 = inlined_call_operand.vmem [shape: bf16[9,8,16], index: 3, kind: input, shape index: {}]   ;;  %s8876_s4 = inlined_call_operand.vmem [shape: f32[1,16], index: 4, kind: input, shape index: {}]   ;;  %s8877_s5 = inlined_call_operand.vmem [shape: f32[1,16], index: 5, kind: input, shape index: {}]   ;;  %s8878_s6 = inlined_call_operand.vmem [shape: bf16[9,16,16], index: 6, kind: input, shape index: {}]   ;;  %s8879_s7 = inlined_call_operand.vmem [shape: f32[1,16], index: 7, kind: input, shape index: {}]   ;;  %s8880_s8 = inlined_call_operand.vmem [shape: f32[1,16], index: 8, kind: input, shape index: {}]   ;;  %s8881_s9 = inlined_call_operand.vmem [shape: bf16[9,8,16], index: 9, kind: input, shape index: {}]   ;;  %s8882_s10 = inlined_call_operand.vmem [shape: f32[1,16], index: 10, kind: input, shape index: {}]   ;;  %s8883_s11 = inlined_call_operand.vmem [shape: f32[1,16], index: 11, kind: input, shape index: {}]   ;;  %s8884_s12 = inlined_call_operand.hbm [shape: f32[2,8,8,16], index: 12, kind: output, shape index: {}]  }
   0x1   :  { %8889 = sst [smem:[#allocation77_spill]] %s8872_s0 }
   0x2   :  { %8890 = sst [smem:[#allocation78_spill]] %s8873_s1 }
   0x3   :  { %17 = vsyncpa [#allocation5], 0 }
   0x4   :  { %19 = vsyncpa [#allocation5 + $0x1], 0  ;;  %s6843_s21 = smov 0   ;;  %s6845_s22 = smov 0  }
   0x5   :  { %s6847_s23 = smov 0   ;;  %s6849_s24 = smov 0  }
   0x6 LB: > { %s6864_s25 = sadd.s32 4294967295, %s6772_s24   ;;  %s5635_s26 = sadd.s32 4294967294, %s6772_s24   ;;  %s6772_s24 = sphi %s6849_s24, %s9049_s24   ;;  %s6768_s23 = sphi %s6847_s23, %s9048_s23   ;;  %s6764_s22 = sphi %s6845_s22, %s9047_s22   ;;  %s6760_s21 = sphi %s6843_s21, %s9046_s21  }
   0x7   : > { %s6868_s27 = sadd.s32 1, %s6772_s24   ;;  %s289_s28 = sadd.s32 1, %s6768_s23 }
   0x8   : > { %s286_s29 = ssub.s32 %s6772_s24, %s6868_s27  ;;  %p299_p0 = scmp.ne.s32.totalorder %s6768_s23, %s6764_s22 }
   0x9   : > { %p287_p1 = scmp.eq.s32.totalorder %s286_s29, 0  ;;  %p300_p2 = scmp.eq.s32.totalorder %s6864_s25, 1 }
   0xa   : > { %p305_p3 = scmp.ne.s32.totalorder %s6764_s22, %s6760_s21  ;;  %p306_p4 = scmp.eq.s32.totalorder %s5635_s26, 1 }
   0xb   : > { %s6879_s30 = scalar_select %p287_p1, %s6768_s23, %s289_s28  }
   0xc   : > { %p6881_p5 = por %p300_p2, %p299_p0  ;;  %p6885_p6 = por %p306_p4, %p305_p3 }
   0xd   : > { %p5638_p7 = scmp.ge.s32.totalorder %s6772_s24, 1  ;;  %p365_p8 = scmp.lt.s32.totalorder %s6772_s24, 3 }
   0xf   : > { %p366_p9 = pnand %p5638_p7, %p365_p8 }
  0x11   : > { %369 = sbr.rel (%p366_p9) target bundleno = 946 (0x3b2), region = 68 }
  0x16   : > { %v589_v0 = vld [vmem:[%s8881_s9] sm:$0xf]  ;;  %vm624_vm0 = vcmask 1043456   ;;  %v5642_v1 = vld [vmem:[%s8881_s9 + $0x4] sm:$0xf]  ;;  %p407_p10 = scmp.lt.s32.totalorder %s6864_s25, 1 }
  0x17   : > { %6644 = vmatprep.subr.msk.bf16.mxu1 %vm624_vm0, %v589_v0  ;;  %6643 = vmatprep.subr.msk.bf16.mxu0 %vm624_vm0, %v5642_v1  ;;  %v706_v2 = vsel %vm624_vm0, %v589_v0, 0  ;;  %v626_v3 = vsel %vm624_vm0, %v5642_v1, 0  ;;  %vm413_vm1 = vcmask 64512   ;;  %v8885_v4 = vmov 0.0   ;;  %v6916_v5 = vld [vmem:[%s8881_s9 + $0xc] sm:$0xf] }
  0x18   : > { %6168 = vmatpush3.bf16.msra.mxu1 %v706_v2  ;;  %6158 = vmatpush3.bf16.msra.mxu0 %v626_v3  ;;  %s6903_s19 = scalar_select %p407_p10, %s6864_s25, 1  ;;  %414 = vst.msk [vmem:[#allocation2] sm:$0xff] %vm413_vm1, %v8885_v4  ;;  %415 = vst.msk [vmem:[#allocation2 + $0x8] sm:$0xff] %vm413_vm1, %v8885_v4  ;;  %vm422_vm2 = vcmask 57344   ;;  %v5651_v6 = vld [vmem:[%s8881_s9 + $0x8] sm:$0xf] }
  0x19   : > { %419 = vst.msk [vmem:[#allocation2 + $0x198] sm:$0xff] %vm413_vm1, %v8885_v4  ;;  %420 = vst.msk [vmem:[#allocation2 + $0x1a0] sm:$0xff] %vm413_vm1, %v8885_v4  ;;  %6646 = vmatprep.subr.msk.bf16.mxu1 %vm624_vm0, %v6916_v5  ;;  %vm416_vm3 = vcmask 58368   ;;  %6645 = vmatprep.subr.msk.bf16.mxu0 %vm624_vm0, %v5651_v6  ;;  %s8893_s0 = sld [smem:[#allocation77_spill]]  ;;  %v917_v33 = vsel %vm624_vm0, %v6916_v5, 0  ;;  %v808_v34 = vsel %vm624_vm0, %v5651_v6, 0 }
  0x1a   : > { %423 = vst.msk [vmem:[#allocation2] sm:$0x1] %vm422_vm2, %v8885_v4  ;;  %425 = vst.msk [vmem:[#allocation2 + $0x30] sm:$0x1] %vm422_vm2, %v8885_v4  ;;  %s5912_s15 = sshll.u32 %s6903_s19, 8  ;;  %s8894_s1 = sld [smem:[#allocation78_spill]] }
  0x1b   : > { %424 = vst.msk [vmem:[#allocation2 + $0x18] sm:$0x1] %vm422_vm2, %v8885_v4  ;;  %426 = vst.msk [vmem:[#allocation2 + $0x48] sm:$0x1] %vm422_vm2, %v8885_v4  ;;  %v5666_v41 = vld [vmem:[%s8881_s9 + $0x14] sm:$0xf] }
  0x1c   : > { %427 = vst.msk [vmem:[#allocation2 + $0x60] sm:$0x1] %vm422_vm2, %v8885_v4  ;;  %428 = vst.msk [vmem:[#allocation2 + $0x78] sm:$0x1] %vm422_vm2, %v8885_v4  ;;  %v7104_v42 = vld [vmem:[%s8874_s2] ss:$0 sm:$0xff] }
  0x1d   : > { %429 = vst.msk [vmem:[#allocation2 + $0x90] sm:$0x1] %vm422_vm2, %v8885_v4  ;;  %430 = vst.msk [vmem:[#allocation2 + $0xa8] sm:$0x1] %vm422_vm2, %v8885_v4  ;;  %v5661_v58 = vld [vmem:[%s8881_s9 + $0x10] sm:$0xf] }
  0x1e   : > { %431 = vst.msk [vmem:[#allocation2 + $0xc0] sm:$0x1] %vm422_vm2, %v8885_v4  ;;  %432 = vst.msk [vmem:[#allocation2 + $0xd8] sm:$0x1] %vm422_vm2, %v8885_v4  ;;  %v7136_v6 = vsel %vm624_vm0, %v5666_v41, 0  ;;  %vm459_vm4 = vcmask 130048  }
  0x1f   : > { %433 = vst.msk [vmem:[#allocation2 + $0xf0] sm:$0x1] %vm422_vm2, %v8885_v4  ;;  %434 = vst.msk [vmem:[#allocation2 + $0x108] sm:$0x1] %vm422_vm2, %v8885_v4  ;;  %s6998_s18 = scalar_lea.vmem %s8893_s0, %s5912_s15  ;;  %v591_v18 = vld [vmem:[#allocation2 + $0x1] ss:$2 sm:$0xff] }
  0x20   : > { %435 = vst.msk [vmem:[#allocation2 + $0x120] sm:$0x1] %vm422_vm2, %v8885_v4  ;;  %436 = vst.msk [vmem:[#allocation2 + $0x138] sm:$0x1] %vm422_vm2, %v8885_v4  ;;  %v7005_v7 = vld [vmem:[%s6998_s18 + $0x10] sm:$0xff]  ;;  %v7008_v8 = vld [vmem:[%s6998_s18 + $0x18] sm:$0xff] }
  0x21   : > { %437 = vst.msk [vmem:[#allocation2 + $0x150] sm:$0x1] %vm422_vm2, %v8885_v4  ;;  %438 = vst.msk [vmem:[#allocation2 + $0x168] sm:$0x1] %vm422_vm2, %v8885_v4  ;;  %v7011_v9 = vld [vmem:[%s6998_s18 + $0x30] sm:$0xff]  ;;  %v7018_v10 = vld [vmem:[%s6998_s18 + $0x38] sm:$0xff] }
  0x22   : > { %439 = vst.msk [vmem:[#allocation2 + $0x180] sm:$0x1] %vm422_vm2, %v8885_v4  ;;  %440 = vst.msk [vmem:[#allocation2 + $0x198] sm:$0x1] %vm422_vm2, %v8885_v4  ;;  %v7021_v11 = vld [vmem:[%s6998_s18 + $0x50] sm:$0xff]  ;;  %v7024_v12 = vld [vmem:[%s6998_s18 + $0x58] sm:$0xff] }
  0x23   : > { %442 = vst.msk [vmem:[#allocation2 + $0x29] sm:$0x1] %vm422_vm2, %v8885_v4  ;;  %443 = vst.msk [vmem:[#allocation2 + $0x41] sm:$0x1] %vm422_vm2, %v8885_v4  ;;  %v7035_v13 = vld [vmem:[%s6998_s18 + $0x70] sm:$0xff]  ;;  %v7038_v14 = vld [vmem:[%s6998_s18 + $0x78] sm:$0xff] }
  0x24   : > { %444 = vst.msk [vmem:[#allocation2 + $0x59] sm:$0x1] %vm422_vm2, %v8885_v4  ;;  %445 = vst.msk [vmem:[#allocation2 + $0x71] sm:$0x1] %vm422_vm2, %v8885_v4  ;;  %v7041_v15 = vld [vmem:[%s6998_s18 + $0x90] sm:$0xff]  ;;  %v7044_v16 = vld [vmem:[%s6998_s18 + $0x98] sm:$0xff] }
  0x25   : > { %446 = vst.msk [vmem:[#allocation2 + $0x89] sm:$0x1] %vm422_vm2, %v8885_v4  ;;  %447 = vst.msk [vmem:[#allocation2 + $0xa1] sm:$0x1] %vm422_vm2, %v8885_v4  ;;  %v7053_v17 = vld [vmem:[%s6998_s18 + $0xb0] sm:$0xff]  ;;  %v7058_v19 = vld [vmem:[%s6998_s18 + $0xb8] sm:$0xff] }
  0x26   : > { %448 = vst.msk [vmem:[#allocation2 + $0xb9] sm:$0x1] %vm422_vm2, %v8885_v4  ;;  %449 = vst.msk [vmem:[#allocation2 + $0xd1] sm:$0x1] %vm422_vm2, %v8885_v4  ;;  %v7061_v20 = vld [vmem:[%s6998_s18 + $0xd0] sm:$0xff]  ;;  %v7071_v23 = vld [vmem:[%s6998_s18 + $0xd8] sm:$0xff] }
  0x27   : > { %450 = vst.msk [vmem:[#allocation2 + $0xe9] sm:$0x1] %vm422_vm2, %v8885_v4  ;;  %451 = vst.msk [vmem:[#allocation2 + $0x101] sm:$0x1] %vm422_vm2, %v8885_v4  ;;  %v7068_v21 = vld [vmem:[%s8894_s1] ss:$0 sm:$0xff] }
  0x28   : > { %452 = vst.msk [vmem:[#allocation2 + $0x119] sm:$0x1] %vm422_vm2, %v8885_v4  ;;  %453 = vst.msk [vmem:[#allocation2 + $0x131] sm:$0x1] %vm422_vm2, %v8885_v4  ;;  %v570_v22 = vld [vmem:[#allocation2] ss:$2 sm:$0xff] }
  0x29   : > { %454 = vst.msk [vmem:[#allocation2 + $0x149] sm:$0x1] %vm422_vm2, %v8885_v4  ;;  %455 = vst.msk [vmem:[#allocation2 + $0x161] sm:$0x1] %vm422_vm2, %v8885_v4  ;;  %v505_v24 = vld [vmem:[%s6998_s18] sm:$0xff]  ;;  %v506_v25 = vld [vmem:[%s6998_s18 + $0x8] sm:$0xff] }
  0x2a   : > { %456 = vst.msk [vmem:[#allocation2 + $0x179] sm:$0x1] %vm422_vm2, %v8885_v4  ;;  %457 = vst.msk [vmem:[#allocation2 + $0x191] sm:$0x1] %vm422_vm2, %v8885_v4  ;;  %v509_v26 = vld [vmem:[%s6998_s18 + $0x20] sm:$0xff]  ;;  %v510_v27 = vld [vmem:[%s6998_s18 + $0x28] sm:$0xff]  ;;  %v1579_v47 = vmul.f32 %v7068_v21, %v505_v24  ;;  %v1580_v52 = vmul.f32 %v7068_v21, %v506_v25 }
  0x2b   : > { %417 = vst.msk [vmem:[#allocation2 + $0x10] sm:$0x3] %vm416_vm3, %v8885_v4  ;;  %421 = vst.msk [vmem:[#allocation2 + $0x1a8] sm:$0x3] %vm416_vm3, %v8885_v4  ;;  %v513_v28 = vld [vmem:[%s6998_s18 + $0x40] sm:$0xff]  ;;  %v514_v29 = vld [vmem:[%s6998_s18 + $0x48] sm:$0xff]  ;;  %v1583_v53 = vmul.f32 %v7068_v21, %v509_v26  ;;  %v1584_v59 = vmul.f32 %v7068_v21, %v510_v27 }
  0x2c   : > { %458 = vst.msk [vmem:[#allocation2 + $0x1a9] sm:$0x1] %vm422_vm2, %v8885_v4  ;;  %441 = vst.msk [vmem:[#allocation2 + $0x11] sm:$0x1] %vm422_vm2, %v8885_v4  ;;  %v517_v30 = vld [vmem:[%s6998_s18 + $0x60] sm:$0xff]  ;;  %v1587_v60 = vmul.f32 %v7068_v21, %v513_v28  ;;  %v518_v63 = vld [vmem:[%s6998_s18 + $0x68] sm:$0xff]  ;;  %v1588_v0 = vmul.f32 %v7068_v21, %v514_v29 }
  0x2d   : > { %540 = vst.msk [vmem:[#allocation2 + $0x31] sm:$0xff] %vm413_vm1, %v7005_v7  ;;  %541 = vst.msk [vmem:[#allocation2 + $0x39] sm:$0xff] %vm413_vm1, %v7008_v8  ;;  %v1591_v1 = vmul.f32 %v7068_v21, %v517_v30  ;;  %vm468_vm5 = vcmask 122880   ;;  %vm462_vm6 = vcmask 123904   ;;  %s404_s16 = sand.u32 1, %s6764_s22   ;;  %s5913_s28 = sshll.u32 %s6864_s25, 10 }
  0x2e   : > { %544 = vst.msk [vmem:[#allocation2 + $0x61] sm:$0xff] %vm413_vm1, %v7011_v9  ;;  %545 = vst.msk [vmem:[#allocation2 + $0x69] sm:$0xff] %vm413_vm1, %v7018_v10  ;;  %s5639_s20 = sshll.u32 %s404_s16, 6  ;;  %s8822_s17 = scalar_lea.hbm %s8884_s12, %s5913_s28 }
  0x2f   : > { %548 = vst.msk [vmem:[#allocation2 + $0x91] sm:$0xff] %vm413_vm1, %v7021_v11  ;;  %549 = vst.msk [vmem:[#allocation2 + $0x99] sm:$0xff] %vm413_vm1, %v7024_v12  ;;  %s8781_s26 = scalar_lea.vmem [#allocation4], %s5639_s20  ;;  %s8832_s25 = scalar_lea.sflag [#allocation5], %s404_s16 }
  0x30   : > { %552 = vst.msk [vmem:[#allocation2 + $0xc1] sm:$0xff] %vm413_vm1, %v7035_v13  ;;  %553 = vst.msk [vmem:[#allocation2 + $0xc9] sm:$0xff] %vm413_vm1, %v7038_v14  ;;  %s6775_s20 = smov [#allocation4]  }
  0x31   : > { %556 = vst.msk [vmem:[#allocation2 + $0xf1] sm:$0xff] %vm413_vm1, %v7041_v15  ;;  %557 = vst.msk [vmem:[#allocation2 + $0xf9] sm:$0xff] %vm413_vm1, %v7044_v16  ;;  %s6716_s28 = sshll.u32 %s6775_s20, 4  ;;  %s6717_s28 = int_to_ptr.vmem [resolvable:$false] %s6716_s28 }
  0x32   : > { %560 = vst.msk [vmem:[#allocation2 + $0x121] sm:$0xff] %vm413_vm1, %v7053_v17  ;;  %561 = vst.msk [vmem:[#allocation2 + $0x129] sm:$0xff] %vm413_vm1, %v7058_v19  ;;  %v7096_v40 = vld [vmem:[#allocation2 + $0x2] ss:$2 sm:$0xff]  ;;  %s6718_s29 = scalar_lea.vmem %s6717_s28, 2048 }
  0x33   : > { %564 = vst.msk [vmem:[#allocation2 + $0x151] sm:$0xff] %vm413_vm1, %v7061_v20  ;;  %565 = vst.msk [vmem:[#allocation2 + $0x159] sm:$0xff] %vm413_vm1, %v7071_v23 }
  0x34   : > { %538 = vst.msk [vmem:[#allocation2 + $0x19] sm:$0xff] %vm413_vm1, %v505_v24  ;;  %539 = vst.msk [vmem:[#allocation2 + $0x21] sm:$0xff] %vm413_vm1, %v506_v25  ;;  %v593_v31 = vld [vmem:[#allocation2 + $0x31] ss:$2 sm:$0xff]  ;;  %v572_v32 = vld [vmem:[#allocation2 + $0x30] ss:$2 sm:$0xff]  ;;  %v1618_v25 = vadd.f32 %v7104_v42, %v1579_v47 }
  0x35   : > { %542 = vst.msk [vmem:[#allocation2 + $0x49] sm:$0xff] %vm413_vm1, %v509_v26  ;;  %543 = vst.msk [vmem:[#allocation2 + $0x51] sm:$0xff] %vm413_vm1, %v510_v27  ;;  %v606_v35 = vpack.c.bf16 %v593_v31, %v591_v18  ;;  %v585_v36 = vpack.c.bf16 %v572_v32, %v570_v22  ;;  %v595_v37 = vld [vmem:[#allocation2 + $0x61] ss:$2 sm:$0xff]  ;;  %v574_v39 = vld [vmem:[#allocation2 + $0x60] ss:$2 sm:$0xff]  ;;  %v1592_v18 = vmul.f32 %v7068_v21, %v518_v63 }
  0x36   : > { %546 = vst.msk [vmem:[#allocation2 + $0x79] sm:$0xff] %vm413_vm1, %v513_v28  ;;  %547 = vst.msk [vmem:[#allocation2 + $0x81] sm:$0xff] %vm413_vm1, %v514_v29  ;;  %v597_v38 = vld [vmem:[#allocation2 + $0x91] ss:$2 sm:$0xff]  ;;  %v576_v44 = vld [vmem:[#allocation2 + $0x90] ss:$2 sm:$0xff]  ;;  %v1619_v26 = vadd.f32 %v7104_v42, %v1580_v52  ;;  %v1622_v27 = vadd.f32 %v7104_v42, %v1583_v53 }
  0x37   : > { %550 = vst.msk [vmem:[#allocation2 + $0xa9] sm:$0xff] %vm413_vm1, %v517_v30  ;;  %v607_v43 = vpack.c.bf16 %v597_v38, %v595_v37  ;;  %v599_v45 = vld [vmem:[#allocation2 + $0xc1] ss:$2 sm:$0xff]  ;;  %v578_v46 = vld [vmem:[#allocation2 + $0xc0] ss:$2 sm:$0xff]  ;;  %6159 = vmatprep.mubr.msk.bf16.mxu0 %vm413_vm1, %v606_v35  ;;  %6169 = vmatprep.mubr.msk.bf16.mxu1 %vm413_vm1, %v585_v36  ;;  %v586_v48 = vpack.c.bf16 %v576_v44, %v574_v39  ;;  %551 = vst.msk [vmem:[#allocation2 + $0xb1] sm:$0xff] %vm413_vm1, %v518_v63 }
  0x38   : > { %v601_v49 = vld [vmem:[#allocation2 + $0xf1] ss:$2 sm:$0xff]  ;;  %v580_v50 = vld [vmem:[#allocation2 + $0xf0] ss:$2 sm:$0xff]  ;;  %v521_v22 = vld [vmem:[%s6998_s18 + $0x80] sm:$0xff]  ;;  %v7143_v24 = vsel %vm624_vm0, %v5661_v58, 0  ;;  %v1627_v37 = vadd.f32 %v7104_v42, %v1588_v0  ;;  %v1630_v38 = vadd.f32 %v7104_v42, %v1591_v1  ;;  %v1631_v39 = vadd.f32 %v7104_v42, %v1592_v18 }
  0x39   : > { %v7109_v51 = vld [vmem:[#allocation2 + $0x32] ss:$2 sm:$0xff]  ;;  %6160 = vmatmul.mubr.msk.bf16.vlgmr.msra.gmra.mxu0 %vm413_vm1, %v607_v43  ;;  %v608_v54 = vpack.c.bf16 %v601_v49, %v599_v45  ;;  %v587_v55 = vpack.c.bf16 %v580_v50, %v578_v46  ;;  %v603_v56 = vld [vmem:[#allocation2 + $0x121] ss:$2 sm:$0xff]  ;;  %6170 = vmatmul.mubr.msk.bf16.vlgmr.msra.gmra.mxu1 %vm413_vm1, %v586_v48  ;;  %554 = vst.msk [vmem:[#allocation2 + $0xd9] sm:$0xff] %vm413_vm1, %v521_v22 }
  0x3a   : > { %v7114_v57 = vld [vmem:[#allocation2 + $0x120] ss:$2 sm:$0xff]  ;;  %v605_v61 = vld [vmem:[#allocation2 + $0x151] ss:$2 sm:$0xff]  ;;  %v7122_v62 = vld [vmem:[#allocation2 + $0x150] ss:$2 sm:$0xff]  ;;  %6178 = vmatpush3.bf16.msra.mxu0 %v808_v34  ;;  %6188 = vmatpush3.bf16.msra.mxu1 %v917_v33  ;;  %v789_v2 = vpack.c.bf16 %v7109_v51, %v7096_v40  ;;  %v1623_v33 = vadd.f32 %v7104_v42, %v1584_v59  ;;  %v1626_v34 = vadd.f32 %v7104_v42, %v1587_v60 }
  0x3b   : > { %6163 = vmatprep.mubr.msk.bf16.mxu0 %vm413_vm1, %v608_v54  ;;  %v7130_v3 = vld [vmem:[#allocation2 + $0x18] ss:$2 sm:$0xff]  ;;  %6173 = vmatprep.mubr.msk.bf16.mxu1 %vm413_vm1, %v587_v55  ;;  %v609_v28 = vpack.c.bf16 %v605_v61, %v603_v56  ;;  %v588_v29 = vpack.c.bf16 %v7122_v62, %v7114_v57  ;;  %v522_v30 = vld [vmem:[%s6998_s18 + $0x88] sm:$0xff]  ;;  %v1595_v47 = vmul.f32 %v7068_v21, %v521_v22  ;;  %v7183_v51 = vld [vmem:[#allocation2 + $0x19] ss:$2 sm:$0xff] }
  0x3c   : > { %v7132_v5 = vld [vmem:[#allocation2 + $0x48] ss:$2 sm:$0xff]  ;;  %6648 = vmatprep.subr.msk.bf16.mxu1 %vm624_vm0, %v5666_v41  ;;  %v525_v31 = vld [vmem:[%s6998_s18 + $0xa0] sm:$0xff]  ;;  %6647 = vmatprep.subr.msk.bf16.mxu0 %vm624_vm0, %v5661_v58  ;;  %555 = vst.msk [vmem:[#allocation2 + $0xe1] sm:$0xff] %vm413_vm1, %v522_v30  ;;  %v1596_v48 = vmul.f32 %v7068_v21, %v522_v30  ;;  %v7185_v52 = vld [vmem:[#allocation2 + $0x49] ss:$2 sm:$0xff]  ;;  %v1581_v61 = vmul.f32 %v7068_v21, %v7005_v7 }
  0x3d   : > { %v526_v32 = vld [vmem:[%s6998_s18 + $0xa8] sm:$0xff]  ;;  %v898_v35 = vpack.c.bf16 %v7132_v5, %v7130_v3  ;;  %558 = vst.msk [vmem:[#allocation2 + $0x109] sm:$0xff] %vm413_vm1, %v525_v31  ;;  %v529_v36 = vld [vmem:[%s6998_s18 + $0xc0] sm:$0xff]  ;;  %v1599_v49 = vmul.f32 %v7068_v21, %v525_v31  ;;  %v1582_v62 = vmul.f32 %v7068_v21, %v7008_v8  ;;  %v1585_v22 = vmul.f32 %v7068_v21, %v7011_v9 }
  0x3e   : > { %559 = vst.msk [vmem:[#allocation2 + $0x111] sm:$0xff] %vm413_vm1, %v526_v32  ;;  %v7166_v40 = vld [vmem:[#allocation2 + $0x62] ss:$2 sm:$0xff]  ;;  %v7168_v41 = vld [vmem:[#allocation2 + $0x92] ss:$2 sm:$0xff]  ;;  %562 = vst.msk [vmem:[#allocation2 + $0x139] sm:$0xff] %vm413_vm1, %v529_v36  ;;  %v1600_v50 = vmul.f32 %v7068_v21, %v526_v32  ;;  %v1603_v57 = vmul.f32 %v7068_v21, %v529_v36  ;;  %v1635_v3 = vadd.f32 %v7104_v42, %v1596_v48 }
  0x3f   : > { %v7170_v43 = vld [vmem:[#allocation2 + $0x78] ss:$2 sm:$0xff]  ;;  %v530_v44 = vld [vmem:[%s6998_s18 + $0xc8] sm:$0xff]  ;;  %v7194_v55 = vld [vmem:[#allocation2 + $0x79] ss:$2 sm:$0xff]  ;;  %v1638_v5 = vadd.f32 %v7104_v42, %v1599_v49 }
  0x40   : > { %v533_v45 = vld [vmem:[%s6998_s18 + $0xe0] sm:$0xff]  ;;  %v534_v46 = vld [vmem:[%s6998_s18 + $0xe8] sm:$0xff]  ;;  %563 = vst.msk [vmem:[#allocation2 + $0x141] sm:$0xff] %vm413_vm1, %v530_v44  ;;  %v1604_v58 = vmul.f32 %v7068_v21, %v530_v44  ;;  %v1639_v18 = vadd.f32 %v7104_v42, %v1600_v50  ;;  %v1642_v31 = vadd.f32 %v7104_v42, %v1603_v57  ;;  %v1621_v44 = vadd.f32 %v7104_v42, %v1582_v62  ;;  %v535_v62 = vld [vmem:[%s6998_s18 + $0xf0] sm:$0xff] }
  0x41   : > { %566 = vst.msk [vmem:[#allocation2 + $0x169] sm:$0xff] %vm413_vm1, %v533_v45  ;;  %567 = vst.msk [vmem:[#allocation2 + $0x171] sm:$0xff] %vm413_vm1, %v534_v46  ;;  %v7187_v53 = vld [vmem:[#allocation2 + $0x1a] ss:$2 sm:$0xff]  ;;  %6164 = vmatmul.mubr.msk.bf16.gmra.mxu0 %vm413_vm1, %v609_v28  ;;  %v7190_v54 = vld [vmem:[#allocation2 + $0x4a] ss:$2 sm:$0xff]  ;;  %v1607_v59 = vmul.f32 %v7068_v21, %v533_v45  ;;  %v1608_v60 = vmul.f32 %v7068_v21, %v534_v46  ;;  %6174 = vmatmul.mubr.msk.bf16.gmra.mxu1 %vm413_vm1, %v588_v29 }
  0x42   : > { %1650 = vst.msk [vmem:[#allocation2 + $0x19] sm:$0xff] %vm413_vm1, %v1618_v25  ;;  %1651 = vst.msk [vmem:[#allocation2 + $0x21] sm:$0xff] %vm413_vm1, %v1619_v26  ;;  %v7196_v56 = vld [vmem:[#allocation2 + $0x7a] ss:$2 sm:$0xff]  ;;  %6179 = vmatprep.mubr.msk.bf16.mxu0 %vm413_vm1, %v789_v2  ;;  %v7212_v0 = vld [vmem:[#allocation2 + $0xa9] ss:$2 sm:$0xff]  ;;  %6189 = vmatprep.mubr.msk.bf16.mxu1 %vm413_vm1, %v898_v35  ;;  %v1634_v2 = vadd.f32 %v7104_v42, %v1595_v47  ;;  %v1586_v25 = vmul.f32 %v7068_v21, %v7018_v10 }
  0x43   : > { %v7208_v63 = vld [vmem:[#allocation2 + $0xa8] ss:$2 sm:$0xff]  ;;  %1654 = vst.msk [vmem:[#allocation2 + $0x49] sm:$0xff] %vm413_vm1, %v1622_v27  ;;  %1655 = vst.msk [vmem:[#allocation2 + $0x51] sm:$0xff] %vm413_vm1, %v1623_v33  ;;  %v1589_v26 = vmul.f32 %v7068_v21, %v7021_v11  ;;  %v790_v27 = vpack.c.bf16 %v7168_v41, %v7166_v40  ;;  %v891_v28 = vld [vmem:[#allocation2 + $0xd8] ss:$2 sm:$0xff]  ;;  %v1643_v32 = vadd.f32 %v7104_v42, %v1604_v58 }
  0x44   : > { %v7214_v1 = vld [vmem:[#allocation2 + $0xaa] ss:$2 sm:$0xff]  ;;  %1658 = vst.msk [vmem:[#allocation2 + $0x79] sm:$0xff] %vm413_vm1, %v1626_v34  ;;  %1659 = vst.msk [vmem:[#allocation2 + $0x81] sm:$0xff] %vm413_vm1, %v1627_v37  ;;  %v7233_v30 = vld [vmem:[#allocation2 + $0xd9] ss:$2 sm:$0xff]  ;;  %v1646_v33 = vadd.f32 %v7104_v42, %v1607_v59  ;;  %v1647_v9 = vadd.f32 %v7104_v42, %v1608_v60  ;;  %v1590_v10 = vmul.f32 %v7068_v21, %v7024_v12 }
  0x45   : > { %v782_v7 = vld [vmem:[#allocation2 + $0xc2] ss:$2 sm:$0xff]  ;;  %v784_v8 = vld [vmem:[#allocation2 + $0xf2] ss:$2 sm:$0xff]  ;;  %1662 = vst.msk [vmem:[#allocation2 + $0xa9] sm:$0xff] %vm413_vm1, %v1630_v38  ;;  %1663 = vst.msk [vmem:[#allocation2 + $0xb1] sm:$0xff] %vm413_vm1, %v1631_v39  ;;  %v1593_v11 = vmul.f32 %v7068_v21, %v7035_v13  ;;  %v899_v34 = vpack.c.bf16 %v7208_v63, %v7170_v43  ;;  %v1594_v39 = vmul.f32 %v7068_v21, %v7038_v14 }
  0x46   : > { %v893_v29 = vld [vmem:[#allocation2 + $0x108] ss:$2 sm:$0xff]  ;;  %v791_v35 = vpack.c.bf16 %v784_v8, %v782_v7  ;;  %v7245_v36 = vld [vmem:[#allocation2 + $0x109] ss:$2 sm:$0xff]  ;;  %v1597_v40 = vmul.f32 %v7068_v21, %v7041_v15  ;;  %v1598_v12 = vmul.f32 %v7068_v21, %v7044_v16  ;;  %v1620_v15 = vadd.f32 %v7104_v42, %v1581_v61  ;;  %568 = vst.msk [vmem:[#allocation2 + $0x181] sm:$0xff] %vm413_vm1, %v535_v62 }
  0x47   : > { %v7247_v37 = vld [vmem:[#allocation2 + $0xda] ss:$2 sm:$0xff]  ;;  %v7249_v38 = vld [vmem:[#allocation2 + $0x10a] ss:$2 sm:$0xff]  ;;  %v900_v13 = vpack.c.bf16 %v893_v29, %v891_v28  ;;  %v7265_v14 = vld [vmem:[#allocation2 + $0x139] ss:$2 sm:$0xff]  ;;  %v1624_v16 = vadd.f32 %v7104_v42, %v1585_v22  ;;  %v1601_v45 = vmul.f32 %v7068_v21, %v7053_v17  ;;  %v1625_v49 = vadd.f32 %v7104_v42, %v1586_v25 }
  0x48   : > { %v7257_v41 = vld [vmem:[#allocation2 + $0x138] ss:$2 sm:$0xff]  ;;  %v7259_v43 = vld [vmem:[#allocation2 + $0x168] ss:$2 sm:$0xff]  ;;  %1666 = vst.msk [vmem:[#allocation2 + $0xd9] sm:$0xff] %vm413_vm1, %v1634_v2  ;;  %1667 = vst.msk [vmem:[#allocation2 + $0xe1] sm:$0xff] %vm413_vm1, %v1635_v3  ;;  %v1602_v50 = vmul.f32 %v7068_v21, %v7058_v19  ;;  %v1605_v57 = vmul.f32 %v7068_v21, %v7061_v20  ;;  %v1606_v58 = vmul.f32 %v7068_v21, %v7071_v23 }
  0x49   : > { %1670 = vst.msk [vmem:[#allocation2 + $0x109] sm:$0xff] %vm413_vm1, %v1638_v5  ;;  %1671 = vst.msk [vmem:[#allocation2 + $0x111] sm:$0xff] %vm413_vm1, %v1639_v18  ;;  %v7272_v46 = vld [vmem:[#allocation2 + $0x169] ss:$2 sm:$0xff]  ;;  %v7274_v47 = vld [vmem:[#allocation2 + $0x13a] ss:$2 sm:$0xff]  ;;  %6180 = vmatmul.mubr.msk.bf16.vlgmr.msra.gmra.mxu0 %vm413_vm1, %v790_v27  ;;  %v1628_v20 = vadd.f32 %v7104_v42, %v1589_v26  ;;  %v1629_v23 = vadd.f32 %v7104_v42, %v1590_v10  ;;  %v1632_v59 = vadd.f32 %v7104_v42, %v1593_v11 }
  0x4a   : > { %v7276_v48 = vld [vmem:[#allocation2 + $0x16a] ss:$2 sm:$0xff]  ;;  %v7289_v17 = vld [vmem:[%s8881_s9 + $0x1c] sm:$0xf]  ;;  %1674 = vst.msk [vmem:[#allocation2 + $0x139] sm:$0xff] %vm413_vm1, %v1642_v31  ;;  %1675 = vst.msk [vmem:[#allocation2 + $0x141] sm:$0xff] %vm413_vm1, %v1643_v32  ;;  %6190 = vmatmul.mubr.msk.bf16.vlgmr.msra.gmra.mxu1 %vm413_vm1, %v899_v34  ;;  %6183 = vmatprep.mubr.msk.bf16.mxu0 %vm413_vm1, %v791_v35  ;;  %v1633_v63 = vadd.f32 %v7104_v42, %v1594_v39  ;;  %v1636_v7 = vadd.f32 %v7104_v42, %v1597_v40 }
  0x4b   : > { %1678 = vst.msk [vmem:[#allocation2 + $0x169] sm:$0xff] %vm413_vm1, %v1646_v33  ;;  %1679 = vst.msk [vmem:[#allocation2 + $0x171] sm:$0xff] %vm413_vm1, %v1647_v9  ;;  %v7298_v19 = vld [vmem:[%s8881_s9 + $0x18] sm:$0xf]  ;;  %v786_v60 = vld [vmem:[#allocation2 + $0x122] ss:$2 sm:$0xff]  ;;  %v1637_v8 = vadd.f32 %v7104_v42, %v1598_v12  ;;  %6208 = vmatpush3.bf16.msra.mxu1 %v7136_v6  ;;  %6193 = vmatprep.mubr.msk.bf16.mxu1 %vm413_vm1, %v900_v13  ;;  %v1640_v22 = vadd.f32 %v7104_v42, %v1601_v45 }
  0x4c   : > { %v788_v61 = vld [vmem:[#allocation2 + $0x152] ss:$2 sm:$0xff]  ;;  %v7315_v5 = vld [vmem:[#allocation2 + $0x31] ss:$2 sm:$0xff]  ;;  %6198 = vmatpush3.bf16.msra.mxu0 %v7143_v24  ;;  %6650 = vmatprep.subr.msk.bf16.mxu1 %vm624_vm0, %v7289_v17  ;;  %v7323_v25 = vld [vmem:[#allocation2 + $0x61] ss:$2 sm:$0xff]  ;;  %v1609_v27 = vmul.f32 %v7068_v21, %v535_v62  ;;  %v1641_v29 = vadd.f32 %v7104_v42, %v1602_v50  ;;  %v1644_v31 = vadd.f32 %v7104_v42, %v1605_v57 }
  0x4d   : > { %v7311_v2 = vld [vmem:[#allocation2 + $0x30] ss:$2 sm:$0xff]  ;;  %v7313_v3 = vld [vmem:[#allocation2 + $0x60] ss:$2 sm:$0xff]  ;;  %v7327_v26 = vld [vmem:[#allocation2 + $0x91] ss:$2 sm:$0xff]  ;;  %v1645_v24 = vadd.f32 %v7104_v42, %v1606_v58  ;;  %v792_v32 = vpack.c.bf16 %v788_v61, %v786_v60  ;;  %6649 = vmatprep.subr.msk.bf16.mxu0 %vm624_vm0, %v7298_v19  ;;  %v1008_v34 = vpack.c.bf16 %v7185_v52, %v7183_v51  ;;  %v1118_v51 = vpack.c.bf16 %v7190_v54, %v7187_v53 }
  0x4e   : > { %v536_v18 = vld [vmem:[%s6998_s18 + $0xf8] sm:$0xff]  ;;  %v7337_v33 = vld [vmem:[#allocation2 + $0xc0] ss:$2 sm:$0xff]  ;;  %v7339_v9 = vld [vmem:[#allocation2 + $0xc1] ss:$2 sm:$0xff]  ;;  %v1648_v53 = vadd.f32 %v7104_v42, %v1609_v27  ;;  %v1009_v50 = vpack.c.bf16 %v7212_v0, %v7194_v55  ;;  %v1119_v57 = vpack.c.bf16 %v7214_v1, %v7196_v56  ;;  %v1010_v58 = vpack.c.bf16 %v7245_v36, %v7233_v30  ;;  %s5481_s18 = sshll.u32 %s8781_s26, 4  ;;  %s8824_s18 = int_to_ptr.vmem [resolvable:$true] %s5481_s18 }
  0x4f   : > { %v7325_v6 = vld [vmem:[#allocation2 + $0x90] ss:$2 sm:$0xff]  ;;  %569 = vst.msk [vmem:[#allocation2 + $0x189] sm:$0xff] %vm413_vm1, %v536_v18  ;;  %v1610_v28 = vmul.f32 %v7068_v21, %v536_v18  ;;  %v901_v21 = vpack.c.bf16 %v7259_v43, %v7257_v41  ;;  %v7351_v39 = vld [vmem:[#allocation2 + $0x120] ss:$2 sm:$0xff]  ;;  %v1011_v0 = vpack.c.bf16 %v7272_v46, %v7265_v14  ;;  %v1121_v1 = vpack.c.bf16 %v7276_v48, %v7274_v47  ;;  %s6712_s19 = scalar_lea.vmem %s8824_s18, 1024  ;;  %p6719_p0 = scmp.lt.s32.totalorder %s8824_s18, %s6717_s28 }
  0x50   : > { %v7341_v10 = vld [vmem:[#allocation2 + $0x32] ss:$2 sm:$0xff]  ;;  %v7343_v11 = vld [vmem:[#allocation2 + $0x62] ss:$2 sm:$0xff]  ;;  %v7353_v40 = vld [vmem:[#allocation2 + $0xf1] ss:$2 sm:$0xff]  ;;  %v1228_v30 = vpack.c.bf16 %v7313_v3, %v7311_v2  ;;  %v1338_v36 = vpack.c.bf16 %v7323_v25, %v7315_v5  ;;  %p6713_p11 = scmp.ne.s32.totalorder %s8824_s18, %s6712_s19  ;;  %p6720_p1 = scmp.lt.s32.totalorder %s6718_s29, %s6712_s19 }
  0x51   : > { %v7349_v35 = vld [vmem:[#allocation2 + $0xf0] ss:$2 sm:$0xff]  ;;  %v7355_v12 = vld [vmem:[#allocation2 + $0x121] ss:$2 sm:$0xff]  ;;  %1652 = vst.msk [vmem:[#allocation2 + $0x31] sm:$0xff] %vm413_vm1, %v1620_v15  ;;  %1653 = vst.msk [vmem:[#allocation2 + $0x39] sm:$0xff] %vm413_vm1, %v1621_v44  ;;  %v1649_v54 = vadd.f32 %v7104_v42, %v1610_v28  ;;  %6184 = vmatmul.mubr.msk.bf16.gmra.mxu0 %vm413_vm1, %v792_v32 }
  0x52   : > { %1656 = vst.msk [vmem:[#allocation2 + $0x61] sm:$0xff] %vm413_vm1, %v1624_v16  ;;  %1657 = vst.msk [vmem:[#allocation2 + $0x69] sm:$0xff] %vm413_vm1, %v1625_v49  ;;  %v7361_v13 = vld [vmem:[#allocation2 + $0x92] ss:$2 sm:$0xff]  ;;  %v7367_v41 = vld [vmem:[#allocation2 + $0x151] ss:$2 sm:$0xff]  ;;  %6194 = vmatmul.mubr.msk.bf16.gmra.mxu1 %vm413_vm1, %v901_v21  ;;  %6199 = vmatprep.mubr.msk.bf16.mxu0 %vm413_vm1, %v1008_v34  ;;  %v1230_v14 = vpack.c.bf16 %v7351_v39, %v7349_v35  ;;  %v1340_v46 = vpack.c.bf16 %v7355_v12, %v7353_v40  ;;  %p6714_p12 = pnand %p6713_p11, %p6881_p5  ;;  %p6721_p2 = por %p6720_p1, %p6719_p0 }
  0x53   : > { %v7365_v52 = vld [vmem:[#allocation2 + $0x150] ss:$2 sm:$0xff]  ;;  %1660 = vst.msk [vmem:[#allocation2 + $0x91] sm:$0xff] %vm413_vm1, %v1628_v20  ;;  %1661 = vst.msk [vmem:[#allocation2 + $0x99] sm:$0xff] %vm413_vm1, %v1629_v23  ;;  %6209 = vmatprep.mubr.msk.bf16.mxu1 %vm413_vm1, %v1118_v51  ;;  %v1120_v20 = vpack.c.bf16 %v7249_v38, %v7247_v37  ;;  %v1357_v23 = vsel %vm624_vm0, %v7289_v17, 0  ;;  %v1229_v37 = vpack.c.bf16 %v7337_v33, %v7325_v6  ;;  %v1731_v60 = vld [vmem:[#allocation2 + $0x1] sm:$0xff] }
  0x54   : > { %v7369_v43 = vld [vmem:[#allocation2 + $0xc2] ss:$2 sm:$0xff]  ;;  %v7375_v15 = vld [vmem:[#allocation2 + $0xf2] ss:$2 sm:$0xff]  ;;  %v1339_v38 = vpack.c.bf16 %v7339_v9, %v7327_v26  ;;  %p6715_p13 = pneg %p6714_p12 }
  0x55   : > { %1664 = vst.msk [vmem:[#allocation2 + $0xc1] sm:$0xff] %vm413_vm1, %v1632_v59  ;;  %1665 = vst.msk [vmem:[#allocation2 + $0xc9] sm:$0xff] %vm413_vm1, %v1633_v63  ;;  %v7377_v44 = vld [vmem:[#allocation2 + $0x122] ss:$2 sm:$0xff]  ;;  %v7379_v16 = vld [vmem:[#allocation2 + $0x152] ss:$2 sm:$0xff] }
  0x56   : > { %1668 = vst.msk [vmem:[#allocation2 + $0xf1] sm:$0xff] %vm413_vm1, %v1636_v7  ;;  %1669 = vst.msk [vmem:[#allocation2 + $0xf9] sm:$0xff] %vm413_vm1, %v1637_v8  ;;  %v1227_v42 = vld [vmem:[#allocation2 + $0x180] ss:$2 sm:$0xff]  ;;  %v1337_v45 = vld [vmem:[#allocation2 + $0x181] ss:$2 sm:$0xff]  ;;  %v1448_v7 = vpack.c.bf16 %v7343_v11, %v7341_v10  ;;  %v1450_v6 = vpack.c.bf16 %v7377_v44, %v7375_v15  ;;  %p6722_p3 = pnand %p6721_p2, %p6715_p13 }
  0x57   : > { %1672 = vst.msk [vmem:[#allocation2 + $0x121] sm:$0xff] %vm413_vm1, %v1640_v22  ;;  %1673 = vst.msk [vmem:[#allocation2 + $0x129] sm:$0xff] %vm413_vm1, %v1641_v29  ;;  %v7393_v49 = vld [vmem:[#allocation2 + $0x182] ss:$2 sm:$0xff]  ;;  %v1247_v59 = vsel %vm624_vm0, %v7298_v19, 0  ;;  %v1231_v62 = vpack.c.bf16 %v1227_v42, %v7365_v52  ;;  %v1341_v63 = vpack.c.bf16 %v1337_v45, %v7367_v41  ;;  %v1733_v2 = vld [vmem:[#allocation2 + $0x19] sm:$0xff]  ;;  %v1449_v22 = vpack.c.bf16 %v7369_v43, %v7361_v13 }
  0x58   : > { %1676 = vst.msk [vmem:[#allocation2 + $0x151] sm:$0xff] %vm413_vm1, %v1644_v31  ;;  %1677 = vst.msk [vmem:[#allocation2 + $0x159] sm:$0xff] %vm413_vm1, %v1645_v24  ;;  %v5690_v55 = vld [vmem:[%s8875_s3 + $0x4] sm:$0xf]  ;;  %v5681_v56 = vld [vmem:[%s8881_s9 + $0x20] sm:$0xf]  ;;  %v1451_v21 = vpack.c.bf16 %v7393_v49, %v7379_v16 }
  0x59   : > { %1680 = vst.msk [vmem:[#allocation2 + $0x181] sm:$0xff] %vm413_vm1, %v1648_v53  ;;  %1681 = vst.msk [vmem:[#allocation2 + $0x189] sm:$0xff] %vm413_vm1, %v1649_v54  ;;  %6200 = vmatmul.mubr.msk.bf16.vlgmr.msra.gmra.mxu0 %vm413_vm1, %v1009_v50  ;;  %v1830_v47 = vsel %vm624_vm0, %v5690_v55, 0  ;;  %v1467_v48 = vsel %vm624_vm0, %v5681_v56, 0  ;;  %v5723_v17 = vld [vmem:[%s8875_s3 + $0x8] sm:$0xf] }
  0x5a   : > { %6210 = vmatmul.mubr.msk.bf16.vlgmr.msra.gmra.mxu1 %vm413_vm1, %v1119_v57  ;;  %6203 = vmatprep.mubr.msk.bf16.mxu0 %vm413_vm1, %v1010_v58  ;;  %v1730_v19 = vld [vmem:[%s8875_s3] sm:$0xf]  ;;  %v1732_v61 = vld [vmem:[#allocation2 + $0x9] sm:$0xff]  ;;  %v1735_v5 = vld [vmem:[#allocation2 + $0x31] sm:$0xff]  ;;  %v2304_v27 = vsel %vm624_vm0, %v5723_v17, 0 }
  0x5b   : > { %6228 = vmatpush3.bf16.msra.mxu1 %v1357_v23  ;;  %6213 = vmatprep.mubr.msk.bf16.mxu1 %vm413_vm1, %v1120_v20  ;;  %v1763_v8 = vpack.c.bf16 %v1732_v61, %v1731_v60  ;;  %v1734_v3 = vld [vmem:[#allocation2 + $0x21] sm:$0xff]  ;;  %v1736_v18 = vld [vmem:[#allocation2 + $0x39] sm:$0xff]  ;;  %v2042_v28 = vsel %vm624_vm0, %v1730_v19, 0  ;;  %v7477_v29 = vld [vmem:[%s8875_s3 + $0x10] sm:$0xf] }
  0x5c   : > { %6218 = vmatpush3.bf16.msra.mxu0 %v1247_v59  ;;  %6652 = vmatprep.subr.msk.bf16.mxu1 %vm624_vm0, %v5690_v55  ;;  %v7465_v25 = vpack.c.bf16 %v1734_v3, %v1733_v2  ;;  %v7469_v26 = vpack.c.bf16 %v1736_v18, %v1735_v5  ;;  %v1737_v31 = vld [vmem:[#allocation2 + $0x49] sm:$0xff]  ;;  %v1738_v32 = vld [vmem:[#allocation2 + $0x51] sm:$0xff]  ;;  %v1682_v33 = vld [vmem:[#allocation2] sm:$0xff] }
  0x5d   : > { %6651 = vmatprep.subr.msk.bf16.mxu0 %vm624_vm0, %v5681_v56  ;;  %v5740_v24 = vld [vmem:[%s8875_s3 + $0xc] sm:$0xf]  ;;  %v1739_v10 = vld [vmem:[#allocation2 + $0x61] sm:$0xff]  ;;  %v7492_v34 = vpack.c.bf16 %v1738_v32, %v1737_v31  ;;  %v1741_v40 = vld [vmem:[#allocation2 + $0x79] sm:$0xff] }
  0x5e   : > { %v1683_v9 = vld [vmem:[#allocation2 + $0x8] sm:$0xff]  ;;  %v1684_v12 = vld [vmem:[#allocation2 + $0x18] sm:$0xff]  ;;  %v1685_v13 = vld [vmem:[#allocation2 + $0x20] sm:$0xff]  ;;  %v2598_v42 = vsel %vm624_vm0, %v5740_v24, 0 }
  0x5f   : > { %v1740_v11 = vld [vmem:[#allocation2 + $0x69] sm:$0xff]  ;;  %v1714_v35 = vpack.c.bf16 %v1683_v9, %v1682_v33  ;;  %v1742_v51 = vld [vmem:[#allocation2 + $0x81] sm:$0xff]  ;;  %v1687_v41 = vld [vmem:[#allocation2 + $0x38] sm:$0xff]  ;;  %v7502_v44 = vpack.c.bf16 %v1685_v13, %v1684_v12 }
  0x60   : > { %v7494_v39 = vpack.c.bf16 %v1740_v11, %v1739_v10  ;;  %v1686_v52 = vld [vmem:[#allocation2 + $0x30] sm:$0xff]  ;;  %v1744_v15 = vld [vmem:[#allocation2 + $0x99] sm:$0xff]  ;;  %v7504_v16 = vpack.c.bf16 %v1742_v51, %v1741_v40  ;;  %v1688_v50 = vld [vmem:[#allocation2 + $0x48] sm:$0xff] }
  0x61   : > { %6204 = vmatmul.mubr.msk.bf16.gmra.mxu0 %vm413_vm1, %v1011_v0  ;;  %v1743_v43 = vld [vmem:[#allocation2 + $0x91] sm:$0xff]  ;;  %v7506_v53 = vpack.c.bf16 %v1687_v41, %v1686_v52  ;;  %v1745_v49 = vld [vmem:[#allocation2 + $0xa9] sm:$0xff]  ;;  %v1690_v20 = vld [vmem:[#allocation2 + $0x60] sm:$0xff] }
  0x62   : > { %6214 = vmatmul.mubr.msk.bf16.gmra.mxu1 %vm413_vm1, %v1121_v1  ;;  %6219 = vmatprep.mubr.msk.bf16.mxu0 %vm413_vm1, %v1228_v30  ;;  %v7508_v54 = vpack.c.bf16 %v1744_v15, %v1743_v43  ;;  %v7516_v45 = vld [vmem:[%s8875_s3 + $0x14] sm:$0xf]  ;;  %v1691_v23 = vld [vmem:[#allocation2 + $0x68] sm:$0xff]  ;;  %v1698_v3 = vld [vmem:[#allocation2 + $0xc0] sm:$0xff] }
  0x63   : > { %6229 = vmatprep.mubr.msk.bf16.mxu1 %vm413_vm1, %v1338_v36  ;;  %v1689_v57 = vld [vmem:[#allocation2 + $0x50] sm:$0xff]  ;;  %v1747_v59 = vld [vmem:[#allocation2 + $0xc1] sm:$0xff]  ;;  %v7530_v1 = vpack.c.bf16 %v1691_v23, %v1690_v20  ;;  %v1749_v36 = vld [vmem:[#allocation2 + $0xd9] sm:$0xff] }
  0x64   : > { %v1746_v58 = vld [vmem:[#allocation2 + $0xb1] sm:$0xff]  ;;  %v1748_v55 = vld [vmem:[#allocation2 + $0xc9] sm:$0xff]  ;;  %v7526_v56 = vpack.c.bf16 %v1689_v57, %v1688_v50  ;;  %v1755_v18 = vld [vmem:[#allocation2 + $0x121] sm:$0xff] }
  0x65   : > { %v7528_v0 = vpack.c.bf16 %v1746_v58, %v1745_v49  ;;  %v7532_v30 = vpack.c.bf16 %v1748_v55, %v1747_v59  ;;  %v1754_v2 = vld [vmem:[#allocation2 + $0x111] sm:$0xff]  ;;  %v1699_v5 = vld [vmem:[#allocation2 + $0xc8] sm:$0xff]  ;;  %v1701_v33 = vld [vmem:[#allocation2 + $0xe0] sm:$0xff] }
  0x66   : > { %v1700_v32 = vld [vmem:[#allocation2 + $0xd8] sm:$0xff]  ;;  %v1758_v9 = vld [vmem:[#allocation2 + $0x141] sm:$0xff]  ;;  %v1702_v10 = vld [vmem:[#allocation2 + $0xf0] sm:$0xff] }
  0x67   : > { %v1703_v11 = vld [vmem:[#allocation2 + $0xf8] sm:$0xff]  ;;  %v7574_v40 = vpack.c.bf16 %v1701_v33, %v1700_v32  ;;  %v1761_v52 = vld [vmem:[#allocation2 + $0x169] sm:$0xff] }
  0x68   : > { %v7578_v13 = vpack.c.bf16 %v1703_v11, %v1702_v10  ;;  %v1704_v41 = vld [vmem:[#allocation2 + $0x108] sm:$0xff]  ;;  %v1705_v43 = vld [vmem:[#allocation2 + $0x110] sm:$0xff]  ;;  %v1708_v55 = vld [vmem:[#allocation2 + $0x138] sm:$0xff] }
  0x69   : > { %6220 = vmatmul.mubr.msk.bf16.vlgmr.msra.gmra.mxu0 %vm413_vm1, %v1229_v37  ;;  %v1692_v37 = vld [vmem:[#allocation2 + $0x78] sm:$0xff]  ;;  %v1707_v49 = vld [vmem:[#allocation2 + $0x128] sm:$0xff]  ;;  %v7590_v58 = vpack.c.bf16 %v1705_v43, %v1704_v41 }
  0x6a   : > { %6230 = vmatmul.mubr.msk.bf16.vlgmr.msra.gmra.mxu1 %vm413_vm1, %v1339_v38  ;;  %6223 = vmatprep.mubr.msk.bf16.mxu0 %vm413_vm1, %v1230_v14  ;;  %v1693_v38 = vld [vmem:[#allocation2 + $0x80] sm:$0xff]  ;;  %v1762_v15 = vld [vmem:[#allocation2 + $0x171] sm:$0xff] }
  0x6b   : > { %6248 = vmatpush3.bf16.msra.mxu1 %v1830_v47  ;;  %6233 = vmatprep.mubr.msk.bf16.mxu1 %vm413_vm1, %v1340_v46  ;;  %v1750_v14 = vld [vmem:[#allocation2 + $0xe1] sm:$0xff]  ;;  %v1694_v46 = vld [vmem:[#allocation2 + $0x90] sm:$0xff]  ;;  %v1695_v47 = vld [vmem:[#allocation2 + $0x98] sm:$0xff]  ;;  %v7592_v20 = vpack.c.bf16 %v1762_v15, %v1761_v52  ;;  %v3186_v15 = vsel %vm624_vm0, %v7516_v45, 0 }
  0x6c   : > { %6238 = vmatpush3.bf16.msra.mxu0 %v1467_v48  ;;  %6654 = vmatprep.subr.msk.bf16.mxu1 %vm624_vm0, %v5723_v17  ;;  %v1751_v48 = vld [vmem:[#allocation2 + $0xf1] sm:$0xff]  ;;  %v1752_v17 = vld [vmem:[#allocation2 + $0xf9] sm:$0xff]  ;;  %v7544_v60 = vpack.c.bf16 %v1750_v14, %v1749_v36  ;;  %v7546_v61 = vpack.c.bf16 %v1695_v47, %v1694_v46  ;;  %v2205_v50 = vld [vmem:[#allocation2 + $0x2] sm:$0xff] }
  0x6d   : > { %6653 = vmatprep.subr.msk.bf16.mxu0 %vm624_vm0, %v1730_v19  ;;  %v7542_v19 = vpack.c.bf16 %v1693_v38, %v1692_v37  ;;  %v2206_v57 = vld [vmem:[#allocation2 + $0xa] sm:$0xff]  ;;  %v1709_v36 = vld [vmem:[#allocation2 + $0x140] sm:$0xff]  ;;  %v1711_v46 = vld [vmem:[#allocation2 + $0x158] sm:$0xff] }
  0x6e   : > { %v2237_v59 = vpack.c.bf16 %v2206_v57, %v2205_v50  ;;  %v2207_v37 = vld [vmem:[#allocation2 + $0x1a] sm:$0xff]  ;;  %v2208_v38 = vld [vmem:[#allocation2 + $0x22] sm:$0xff]  ;;  %v1710_v14 = vld [vmem:[#allocation2 + $0x150] sm:$0xff] }
  0x6f   : > { %v2209_v47 = vld [vmem:[#allocation2 + $0x32] sm:$0xff]  ;;  %v2214_v32 = vld [vmem:[#allocation2 + $0x6a] sm:$0xff]  ;;  %v2215_v11 = vld [vmem:[#allocation2 + $0x7a] sm:$0xff] }
  0x70   : > { %v2218_v52 = vld [vmem:[#allocation2 + $0x9a] sm:$0xff]  ;;  %v2222_v50 = vld [vmem:[#allocation2 + $0xca] sm:$0xff] }
  0x71   : > { %6224 = vmatmul.mubr.msk.bf16.gmra.mxu0 %vm413_vm1, %v1231_v62  ;;  %v7548_v62 = vpack.c.bf16 %v1752_v17, %v1751_v48  ;;  %v2210_v48 = vld [vmem:[#allocation2 + $0x3a] sm:$0xff]  ;;  %v7603_v17 = vpack.c.bf16 %v1709_v36, %v1708_v55  ;;  %v2224_v36 = vld [vmem:[#allocation2 + $0xe2] sm:$0xff] }
  0x72   : > { %6234 = vmatmul.mubr.msk.bf16.gmra.mxu1 %vm413_vm1, %v1341_v63  ;;  %6239 = vmatprep.mubr.msk.bf16.mxu0 %vm413_vm1, %v1448_v7  ;;  %v1753_v63 = vld [vmem:[#allocation2 + $0x109] sm:$0xff]  ;;  %v2223_v55 = vld [vmem:[#allocation2 + $0xda] sm:$0xff] }
  0x73   : > { %6249 = vmatprep.mubr.msk.bf16.mxu1 %vm413_vm1, %v1763_v8  ;;  %v1696_v7 = vld [vmem:[#allocation2 + $0xa8] sm:$0xff]  ;;  %v1697_v8 = vld [vmem:[#allocation2 + $0xb0] sm:$0xff] }
  0x79   : > { %6240 = vmatmul.mubr.msk.bf16.vlgmr.msra.gmra.mxu0 %vm413_vm1, %v1449_v22  ;;  %v1756_v22 = vld [vmem:[#allocation2 + $0x129] sm:$0xff] }
  0x7a   : > { %6250 = vmatmul.mubr.msk.bf16.vlgmr.msra.gmra.mxu1 %vm413_vm1, %v7465_v25  ;;  %6243 = vmatprep.mubr.msk.bf16.mxu0 %vm413_vm1, %v1450_v6  ;;  %v7558_v6 = vpack.c.bf16 %v1697_v8, %v1696_v7  ;;  %v7564_v31 = vpack.c.bf16 %v1756_v22, %v1755_v18  ;;  %v7607_v7 = vpack.c.bf16 %v1711_v46, %v1710_v14  ;;  %v1713_v18 = vld [vmem:[#allocation2 + $0x170] sm:$0xff] }
  0x7b   : > { %6316 = vmatpush3.bf16.msra.mxu1 %v2304_v27  ;;  %6253 = vmatprep.mubr.msk.bf16.mxu1 %vm413_vm1, %v7469_v26  ;;  %v7560_v27 = vpack.c.bf16 %v1754_v2, %v1753_v63  ;;  %v7605_v63 = vpack.c.bf16 %v2208_v38, %v2207_v37  ;;  %v7609_v8 = vpack.c.bf16 %v2210_v48, %v2209_v47  ;;  %v2892_v2 = vsel %vm624_vm0, %v7477_v29, 0  ;;  %v2212_v22 = vld [vmem:[#allocation2 + $0x52] sm:$0xff]  ;;  %v2226_v38 = vld [vmem:[#allocation2 + $0xfa] sm:$0xff]  ;;  %v2227_v47 = vld [vmem:[#allocation2 + $0x10a] sm:$0xff] }
  0x7c   : > { %6282 = vmatpush3.bf16.msra.mxu0 %v2042_v28  ;;  %6656 = vmatprep.subr.msk.bf16.mxu1 %vm624_vm0, %v7477_v29  ;;  %v7562_v28 = vpack.c.bf16 %v1699_v5, %v1698_v3  ;;  %v7618_v3 = vld [vmem:[%s8875_s3 + $0x18] sm:$0xf]  ;;  %v1712_v5 = vld [vmem:[#allocation2 + $0x168] sm:$0xff]  ;;  %v7675_v14 = vpack.c.bf16 %v2224_v36, %v2223_v55 }
  0x7d   : > { %6655 = vmatprep.subr.msk.bf16.mxu0 %vm624_vm0, %v5740_v24  ;;  %v1757_v24 = vld [vmem:[#allocation2 + $0x139] sm:$0xff]  ;;  %v2211_v29 = vld [vmem:[#allocation2 + $0x4a] sm:$0xff]  ;;  %v7628_v33 = vpack.c.bf16 %v1713_v18, %v1712_v5 }
  0x7e   : > { %v7576_v12 = vpack.c.bf16 %v1758_v9, %v1757_v24  ;;  %v2213_v24 = vld [vmem:[#allocation2 + $0x62] sm:$0xff]  ;;  %v7630_v9 = vpack.c.bf16 %v2212_v22, %v2211_v29  ;;  %v2225_v37 = vld [vmem:[#allocation2 + $0xf2] sm:$0xff]  ;;  %v2230_v5 = vld [vmem:[#allocation2 + $0x12a] sm:$0xff] }
  0x7f   : > { %v7632_v10 = vpack.c.bf16 %v2214_v32, %v2213_v24  ;;  %v7677_v46 = vpack.c.bf16 %v2226_v38, %v2225_v37  ;;  %v2228_v48 = vld [vmem:[#allocation2 + $0x112] sm:$0xff]  ;;  %v2234_v24 = vld [vmem:[#allocation2 + $0x15a] sm:$0xff] }
  0x80   : > { %v7687_v18 = vpack.c.bf16 %v2228_v48, %v2227_v47  ;;  %v2233_v22 = vld [vmem:[#allocation2 + $0x152] sm:$0xff] }
  0x81   : > { %6244 = vmatmul.mubr.msk.bf16.gmra.mxu0 %vm413_vm1, %v1451_v21  ;;  %v1759_v21 = vld [vmem:[#allocation2 + $0x151] sm:$0xff] }
  0x82   : > { %6254 = vmatmul.mubr.msk.bf16.gmra.mxu1 %vm413_vm1, %v7492_v34  ;;  %6283 = vmatprep.mubr.msk.bf16.mxu0 %vm413_vm1, %v1714_v35  ;;  %v1760_v35 = vld [vmem:[#allocation2 + $0x159] sm:$0xff] }
  0x83   : > { %6257 = vmatprep.mubr.msk.bf16.mxu1 %vm413_vm1, %v7494_v39  ;;  %v7580_v51 = vpack.c.bf16 %v1760_v35, %v1759_v21  ;;  %v2216_v21 = vld [vmem:[#allocation2 + $0x82] sm:$0xff]  ;;  %v2217_v35 = vld [vmem:[#allocation2 + $0x92] sm:$0xff] }
  0x84   : > { %v7642_v41 = vpack.c.bf16 %v2216_v21, %v2215_v11  ;;  %v7644_v43 = vpack.c.bf16 %v2218_v52, %v2217_v35  ;;  %v7701_v11 = vpack.c.bf16 %v2234_v24, %v2233_v22 }
  0x89   : > { %6284 = vmatmul.mubr.msk.bf16.vlgmr.msra.gmra.mxu0 %vm413_vm1, %v7502_v44 }
  0x8a   : > { %6258 = vmatmul.mubr.msk.bf16.gmra.mxu1 %vm413_vm1, %v7504_v16  ;;  %6287 = vmatprep.mubr.msk.bf16.mxu0 %vm413_vm1, %v7506_v53 }
  0x8b   : > { %6261 = vmatprep.mubr.msk.bf16.mxu1 %vm413_vm1, %v7508_v54  ;;  %6350 = vmatpush3.bf16.msra.mxu0 %v2598_v42  ;;  %v1706_v42 = vld [vmem:[#allocation2 + $0x120] sm:$0xff] }
  0x8c   : > { %6657 = vmatprep.subr.msk.bf16.mxu0 %vm624_vm0, %v7516_v45  ;;  %v7594_v23 = vpack.c.bf16 %v1707_v49, %v1706_v42  ;;  %v2219_v42 = vld [vmem:[#allocation2 + $0xaa] sm:$0xff]  ;;  %v2220_v49 = vld [vmem:[#allocation2 + $0xb2] sm:$0xff]  ;;  %v2221_v45 = vld [vmem:[#allocation2 + $0xc2] sm:$0xff] }
  0x8d   : > { %v7663_v57 = vpack.c.bf16 %v2220_v49, %v2219_v42 }
  0x91   : > { %6288 = vmatmul.mubr.msk.bf16.gmra.mxu0 %vm413_vm1, %v7526_v56 }
  0x92   : > { %6262 = vmatmul.mubr.msk.bf16.gmra.mxu1 %vm413_vm1, %v7528_v0  ;;  %6291 = vmatprep.mubr.msk.bf16.mxu0 %vm413_vm1, %v7530_v1 }
  0x93   : > { %6265 = vmatprep.mubr.msk.bf16.mxu1 %vm413_vm1, %v7532_v30 }
  0x99   : > { %6292 = vmatmul.mubr.msk.bf16.gmra.mxu0 %vm413_vm1, %v7542_v19 }
  0x9a   : > { %6266 = vmatmul.mubr.msk.bf16.gmra.mxu1 %vm413_vm1, %v7544_v60  ;;  %6295 = vmatprep.mubr.msk.bf16.mxu0 %vm413_vm1, %v7546_v61 }
  0x9b   : > { %6269 = vmatprep.mubr.msk.bf16.mxu1 %vm413_vm1, %v7548_v62 }
  0xa1   : > { %6296 = vmatmul.mubr.msk.bf16.gmra.mxu0 %vm413_vm1, %v7558_v6 }
  0xa2   : > { %6270 = vmatmul.mubr.msk.bf16.gmra.mxu1 %vm413_vm1, %v7560_v27  ;;  %6299 = vmatprep.mubr.msk.bf16.mxu0 %vm413_vm1, %v7562_v28 }
  0xa3   : > { %6273 = vmatprep.mubr.msk.bf16.mxu1 %vm413_vm1, %v7564_v31 }
  0xa9   : > { %6300 = vmatmul.mubr.msk.bf16.gmra.mxu0 %vm413_vm1, %v7574_v40 }
  0xaa   : > { %6274 = vmatmul.mubr.msk.bf16.gmra.mxu1 %vm413_vm1, %v7576_v12  ;;  %6303 = vmatprep.mubr.msk.bf16.mxu0 %vm413_vm1, %v7578_v13 }
  0xab   : > { %6277 = vmatprep.mubr.msk.bf16.mxu1 %vm413_vm1, %v7580_v51 }
  0xb1   : > { %6304 = vmatmul.mubr.msk.bf16.gmra.mxu0 %vm413_vm1, %v7590_v58 }
  0xb2   : > { %6278 = vmatmul.mubr.msk.bf16.gmra.mxu1 %vm413_vm1, %v7592_v20  ;;  %6307 = vmatprep.mubr.msk.bf16.mxu0 %vm413_vm1, %v7594_v23 }
  0xb3   : > { %6317 = vmatprep.mubr.msk.bf16.mxu1 %vm413_vm1, %v2237_v59  ;;  %v7665_v59 = vpack.c.bf16 %v2222_v50, %v2221_v45 }
  0xb9   : > { %6308 = vmatmul.mubr.msk.bf16.gmra.mxu0 %vm413_vm1, %v7603_v17 }
  0xba   : > { %6318 = vmatmul.mubr.msk.bf16.vlgmr.msra.gmra.mxu1 %vm413_vm1, %v7605_v63  ;;  %6311 = vmatprep.mubr.msk.bf16.mxu0 %vm413_vm1, %v7607_v7 }
  0xbb   : > { %6384 = vmatpush3.bf16.msra.mxu1 %v2892_v2  ;;  %6321 = vmatprep.mubr.msk.bf16.mxu1 %vm413_vm1, %v7609_v8  ;;  %v2229_v2 = vld [vmem:[#allocation2 + $0x122] sm:$0xff] }
  0xbc   : > { %6658 = vmatprep.subr.msk.bf16.mxu1 %vm624_vm0, %v7618_v3  ;;  %v7689_v29 = vpack.c.bf16 %v2230_v5, %v2229_v2 }
  0xc1   : > { %6312 = vmatmul.mubr.msk.bf16.gmra.mxu0 %vm413_vm1, %v7628_v33 }
  0xc2   : > { %6322 = vmatmul.mubr.msk.bf16.gmra.mxu1 %vm413_vm1, %v7630_v9  ;;  %6351 = vmatprep.mubr.msk.bf16.mxu0 %vm413_vm1, %v7502_v44  ;;  %v7653_v44 = vld [vmem:[%s8875_s3 + $0x1c] sm:$0xf] }
  0xc3   : > { %6325 = vmatprep.mubr.msk.bf16.mxu1 %vm413_vm1, %v7632_v10  ;;  %v3774_v24 = vsel %vm624_vm0, %v7653_v44, 0 }
  0xc9   : > { %6352 = vmatmul.mubr.msk.bf16.vlgmr.msra.gmra.mxu0 %vm413_vm1, %v7506_v53 }
  0xca   : > { %6326 = vmatmul.mubr.msk.bf16.gmra.mxu1 %vm413_vm1, %v7642_v41  ;;  %6355 = vmatprep.mubr.msk.bf16.mxu0 %vm413_vm1, %v7526_v56 }
  0xcb   : > { %6329 = vmatprep.mubr.msk.bf16.mxu1 %vm413_vm1, %v7644_v43  ;;  %6418 = vmatpush3.bf16.msra.mxu0 %v3186_v15 }
  0xcc   : > { %6659 = vmatprep.subr.msk.bf16.mxu0 %vm624_vm0, %v7653_v44 }
  0xd1   : > { %6356 = vmatmul.mubr.msk.bf16.gmra.mxu0 %vm413_vm1, %v7530_v1 }
  0xd2   : > { %6330 = vmatmul.mubr.msk.bf16.gmra.mxu1 %vm413_vm1, %v7663_v57  ;;  %6359 = vmatprep.mubr.msk.bf16.mxu0 %vm413_vm1, %v7542_v19 }
  0xd3   : > { %6333 = vmatprep.mubr.msk.bf16.mxu1 %vm413_vm1, %v7665_v59 }
  0xd9   : > { %6360 = vmatmul.mubr.msk.bf16.gmra.mxu0 %vm413_vm1, %v7546_v61  ;;  %v2231_v61 = vld [vmem:[#allocation2 + $0x13a] sm:$0xff] }
  0xda   : > { %6334 = vmatmul.mubr.msk.bf16.gmra.mxu1 %vm413_vm1, %v7675_v14  ;;  %6363 = vmatprep.mubr.msk.bf16.mxu0 %vm413_vm1, %v7558_v6  ;;  %v2232_v6 = vld [vmem:[#allocation2 + $0x142] sm:$0xff] }
  0xdb   : > { %6337 = vmatprep.mubr.msk.bf16.mxu1 %vm413_vm1, %v7677_v46  ;;  %v7699_v32 = vpack.c.bf16 %v2232_v6, %v2231_v61 }
  0xe1   : > { %6364 = vmatmul.mubr.msk.bf16.gmra.mxu0 %vm413_vm1, %v7562_v28  ;;  %v2235_v28 = vld [vmem:[#allocation2 + $0x16a] sm:$0xff] }
  0xe2   : > { %6338 = vmatmul.mubr.msk.bf16.gmra.mxu1 %vm413_vm1, %v7687_v18  ;;  %6367 = vmatprep.mubr.msk.bf16.mxu0 %vm413_vm1, %v7574_v40  ;;  %v2236_v40 = vld [vmem:[#allocation2 + $0x172] sm:$0xff] }
  0xe3   : > { %6341 = vmatprep.mubr.msk.bf16.mxu1 %vm413_vm1, %v7689_v29  ;;  %v7711_v21 = vpack.c.bf16 %v2236_v40, %v2235_v28 }
  0xe9   : > { %6368 = vmatmul.mubr.msk.bf16.gmra.mxu0 %vm413_vm1, %v7578_v13  ;;  %v3480_v13 = vsel %vm624_vm0, %v7618_v3, 0 }
  0xea   : > { %6342 = vmatmul.mubr.msk.bf16.gmra.mxu1 %vm413_vm1, %v7699_v32  ;;  %6371 = vmatprep.mubr.msk.bf16.mxu0 %vm413_vm1, %v7590_v58 }
  0xeb   : > { %6345 = vmatprep.mubr.msk.bf16.mxu1 %vm413_vm1, %v7701_v11 }
  0xf1   : > { %6372 = vmatmul.mubr.msk.bf16.gmra.mxu0 %vm413_vm1, %v7594_v23  ;;  %v7728_v23 = vld [vmem:[%s8875_s3 + $0x20] sm:$0xf] }
  0xf2   : > { %6346 = vmatmul.mubr.msk.bf16.gmra.mxu1 %vm413_vm1, %v7711_v21  ;;  %6375 = vmatprep.mubr.msk.bf16.mxu0 %vm413_vm1, %v7603_v17  ;;  %v2530_v17 = vld [vmem:[#allocation2 + $0x188] sm:$0xff] }
  0xf3   : > { %6385 = vmatprep.mubr.msk.bf16.mxu1 %vm413_vm1, %v7465_v25  ;;  %v2529_v25 = vld [vmem:[#allocation2 + $0x180] sm:$0xff] }
  0xf4   : > { %v7738_v49 = vpack.c.bf16 %v2530_v17, %v2529_v25 }
  0xf9   : > { %v6161_v58 = vpop.f32.mrf.mxu0  ;;  %6376 = vmatmul.mubr.msk.bf16.gmra.mxu0 %vm413_vm1, %v7607_v7  ;;  %v6171_v35 = vpop.f32.mrf.mxu1 }
  0xfa   : > { %6386 = vmatmul.mubr.msk.bf16.vlgmr.msra.gmra.mxu1 %vm413_vm1, %v7469_v26  ;;  %6379 = vmatprep.mubr.msk.bf16.mxu0 %vm413_vm1, %v7628_v33  ;;  %v751_v52 = vadd.f32 %v6171_v35, %v6161_v58 }
  0xfb   : > { %6452 = vmatpush3.bf16.msra.mxu1 %v3480_v13  ;;  %v662_v3 = vpop.f32.mrf.mxu0  ;;  %6389 = vmatprep.mubr.msk.bf16.mxu1 %vm413_vm1, %v7492_v34  ;;  %v742_v7 = vpop.f32.mrf.mxu1 }
  0xfc   : > { %6660 = vmatprep.subr.msk.bf16.mxu1 %vm624_vm0, %v7728_v23  ;;  %v743_v15 = vadd.f32 %v742_v7, %v662_v3 }
  0xfd   : > { %v6162_v42 = vpop.f32.mrf.mxu0  ;;  %v6172_v26 = vpop.f32.mrf.mxu1 }
  0xfe   : > { %v754_v45 = vadd.f32 %v6172_v26, %v6162_v42 }
  0xff   : > { %v665_v50 = vpop.f32.mrf.mxu0  ;;  %v745_v33 = vpop.f32.mrf.mxu1 }
 0x100   : > { %v746_v55 = vadd.f32 %v745_v33, %v665_v50 }
 0x101   : > { %v6165_v36 = vpop.f32.mrf.mxu0  ;;  %6380 = vmatmul.mubr.msk.bf16.gmra.mxu0 %vm413_vm1, %v7738_v49  ;;  %v6175_v37 = vpop.f32.mrf.mxu1 }
 0x102   : > { %6390 = vmatmul.mubr.msk.bf16.gmra.mxu1 %vm413_vm1, %v7494_v39  ;;  %6419 = vmatprep.mubr.msk.bf16.mxu0 %vm413_vm1, %v7605_v63  ;;  %v767_v34 = vadd.f32 %v6175_v37, %v6165_v36 }
 0x103   : > { %v678_v38 = vpop.f32.mrf.mxu0  ;;  %6393 = vmatprep.mubr.msk.bf16.mxu1 %vm413_vm1, %v7504_v16  ;;  %v758_v47 = vpop.f32.mrf.mxu1 }
 0x104   : > { %v759_v48 = vadd.f32 %v758_v47, %v678_v38 }
 0x105   : > { %v6166_v2 = vpop.f32.mrf.mxu0  ;;  %v6176_v5 = vpop.f32.mrf.mxu1 }
 0x106   : > { %v770_v61 = vadd.f32 %v6176_v5, %v6166_v2 }
 0x107   : > { %v681_v6 = vpop.f32.mrf.mxu0  ;;  %v761_v22 = vpop.f32.mrf.mxu1 }
 0x108   : > { %v762_v28 = vadd.f32 %v761_v22, %v681_v6 }
 0x109   : > { %v6181_v39 = vpop.f32.mrf.mxu0  ;;  %6420 = vmatmul.mubr.msk.bf16.vlgmr.msra.gmra.mxu0 %vm413_vm1, %v7609_v8 }
 0x10a   : > { %v877_v63 = vadd.f32 %v6181_v39, %v751_v52  ;;  %v6191_v40 = vpop.f32.mrf.mxu1  ;;  %6394 = vmatmul.mubr.msk.bf16.gmra.mxu1 %vm413_vm1, %v7508_v54  ;;  %6423 = vmatprep.mubr.msk.bf16.mxu0 %vm413_vm1, %v7630_v9 }
 0x10b   : > { %v844_v16 = vpop.f32.mrf.mxu0  ;;  %6397 = vmatprep.mubr.msk.bf16.mxu1 %vm413_vm1, %v7528_v0  ;;  %6486 = vmatpush3.bf16.msra.mxu0 %v3774_v24 }
 0x10c   : > { %v986_v13 = vadd.f32 %v6191_v40, %v877_v63  ;;  %v875_v44 = vadd.f32 %v844_v16, %v743_v15  ;;  %v953_v58 = vpop.f32.mrf.mxu1 }
 0x10d   : > { %v6182_v35 = vpop.f32.mrf.mxu0 }
 0x10e   : > { %v984_v25 = vadd.f32 %v953_v58, %v875_v44  ;;  %v878_v17 = vadd.f32 %v6182_v35, %v754_v45  ;;  %v6192_v8 = vpop.f32.mrf.mxu1 }
 0x10f   : > { %v847_v52 = vpop.f32.mrf.mxu0 }
 0x110   : > { %v987_v3 = vadd.f32 %v6192_v8, %v878_v17  ;;  %v876_v7 = vadd.f32 %v847_v52, %v746_v55  ;;  %v956_v42 = vpop.f32.mrf.mxu1 }
 0x111   : > { %v6185_v54 = vpop.f32.mrf.mxu0  ;;  %6424 = vmatmul.mubr.msk.bf16.gmra.mxu0 %vm413_vm1, %v7632_v10 }
 0x112   : > { %v985_v9 = vadd.f32 %v956_v42, %v876_v7  ;;  %v881_v26 = vadd.f32 %v6185_v54, %v767_v34  ;;  %v6195_v50 = vpop.f32.mrf.mxu1  ;;  %6398 = vmatmul.mubr.msk.bf16.gmra.mxu1 %vm413_vm1, %v7532_v30  ;;  %6427 = vmatprep.mubr.msk.bf16.mxu0 %vm413_vm1, %v7642_v41 }
 0x113   : > { %v860_v0 = vpop.f32.mrf.mxu0  ;;  %6401 = vmatprep.mubr.msk.bf16.mxu1 %vm413_vm1, %v7544_v60 }
 0x114   : > { %v990_v15 = vadd.f32 %v6195_v50, %v881_v26  ;;  %v879_v45 = vadd.f32 %v860_v0, %v759_v48  ;;  %v969_v33 = vpop.f32.mrf.mxu1  ;;  %v2823_v0 = vld [vmem:[#allocation2 + $0x181] sm:$0xff] }
 0x115   : > { %v6186_v55 = vpop.f32.mrf.mxu0 }
 0x116   : > { %v988_v36 = vadd.f32 %v969_v33, %v879_v45  ;;  %v882_v37 = vadd.f32 %v6186_v55, %v770_v61  ;;  %v6196_v10 = vpop.f32.mrf.mxu1 }
 0x117   : > { %v863_v38 = vpop.f32.mrf.mxu0 }
 0x118   : > { %v991_v34 = vadd.f32 %v6196_v10, %v882_v37  ;;  %v880_v47 = vadd.f32 %v863_v38, %v762_v28  ;;  %v972_v2 = vpop.f32.mrf.mxu1 }
 0x119   : > { %v6201_v5 = vpop.f32.mrf.mxu0  ;;  %6428 = vmatmul.mubr.msk.bf16.gmra.mxu0 %vm413_vm1, %v7644_v43 }
 0x11a   : > { %v989_v30 = vadd.f32 %v972_v2, %v880_v47  ;;  %v1096_v41 = vadd.f32 %v6201_v5, %v986_v13  ;;  %v6211_v6 = vpop.f32.mrf.mxu1  ;;  %6402 = vmatmul.mubr.msk.bf16.gmra.mxu1 %vm413_vm1, %v7548_v62  ;;  %6431 = vmatprep.mubr.msk.bf16.mxu0 %vm413_vm1, %v7663_v57 }
 0x11b   : > { %v1063_v60 = vpop.f32.mrf.mxu0  ;;  %6405 = vmatprep.mubr.msk.bf16.mxu1 %vm413_vm1, %v7560_v27 }
 0x11c   : > { %v1206_v48 = vadd.f32 %v6211_v6, %v1096_v41  ;;  %v1094_v61 = vadd.f32 %v1063_v60, %v984_v25  ;;  %v1173_v22 = vpop.f32.mrf.mxu1 }
 0x11d   : > { %v6202_v24 = vpop.f32.mrf.mxu0 }
 0x11e   : > { %v1204_v28 = vadd.f32 %v1173_v22, %v1094_v61  ;;  %v1097_v39 = vadd.f32 %v6202_v24, %v987_v3  ;;  %v6212_v43 = vpop.f32.mrf.mxu1 }
 0x11f   : > { %v1066_v63 = vpop.f32.mrf.mxu0 }
 0x120   : > { %v1207_v40 = vadd.f32 %v6212_v43, %v1097_v39  ;;  %v1095_v16 = vadd.f32 %v1066_v63, %v985_v9  ;;  %v1176_v13 = vpop.f32.mrf.mxu1 }
 0x121   : > { %v6205_v44 = vpop.f32.mrf.mxu0  ;;  %6432 = vmatmul.mubr.msk.bf16.gmra.mxu0 %vm413_vm1, %v7665_v59 }
 0x122   : > { %v1205_v62 = vadd.f32 %v1176_v13, %v1095_v16  ;;  %v1100_v57 = vadd.f32 %v6205_v44, %v990_v15  ;;  %v6215_v58 = vpop.f32.mrf.mxu1  ;;  %6406 = vmatmul.mubr.msk.bf16.gmra.mxu1 %vm413_vm1, %v7564_v31  ;;  %6435 = vmatprep.mubr.msk.bf16.mxu0 %vm413_vm1, %v7675_v14  ;;  %v2824_v15 = vld [vmem:[#allocation2 + $0x189] sm:$0xff] }
 0x123   : > { %v1079_v27 = vpop.f32.mrf.mxu0  ;;  %6409 = vmatprep.mubr.msk.bf16.mxu1 %vm413_vm1, %v7576_v12  ;;  %v7790_v38 = vpack.c.bf16 %v2824_v15, %v2823_v0  ;;  %v3117_v44 = vld [vmem:[#allocation2 + $0x182] sm:$0xff] }
 0x124   : > { %v1210_v35 = vadd.f32 %v6215_v58, %v1100_v57  ;;  %v1098_v25 = vadd.f32 %v1079_v27, %v988_v36  ;;  %v1189_v17 = vpop.f32.mrf.mxu1  ;;  %v3676_v58 = vld [vmem:[#allocation2 + $0x39] sm:$0xff]  ;;  %v3679_v0 = vld [vmem:[#allocation2 + $0x61] sm:$0xff]  ;;  %v3680_v15 = vld [vmem:[#allocation2 + $0x69] sm:$0xff] }
 0x125   : > { %v6206_v8 = vpop.f32.mrf.mxu0 }
 0x126   : > { %v1208_v52 = vadd.f32 %v1189_v17, %v1098_v25  ;;  %v1101_v3 = vadd.f32 %v6206_v8, %v991_v34  ;;  %v6216_v59 = vpop.f32.mrf.mxu1  ;;  %v3390_v25 = vld [vmem:[#allocation2 + $0x98] sm:$0xff] }
 0x127   : > { %v1082_v7 = vpop.f32.mrf.mxu0 }
 0x128   : > { %v1211_v42 = vadd.f32 %v6216_v59, %v1101_v3  ;;  %v1099_v54 = vadd.f32 %v1082_v7, %v989_v30  ;;  %v1192_v9 = vpop.f32.mrf.mxu1 }
 0x129   : > { %v6221_v26 = vpop.f32.mrf.mxu0  ;;  %6436 = vmatmul.mubr.msk.bf16.gmra.mxu0 %vm413_vm1, %v7677_v46 }
 0x12a   : > { %v1209_v31 = vadd.f32 %v1192_v9, %v1099_v54  ;;  %v1316_v14 = vadd.f32 %v6221_v26, %v1206_v48  ;;  %v6231_v50 = vpop.f32.mrf.mxu1  ;;  %6410 = vmatmul.mubr.msk.bf16.gmra.mxu1 %vm413_vm1, %v7580_v51  ;;  %6439 = vmatprep.mubr.msk.bf16.mxu0 %vm413_vm1, %v7687_v18  ;;  %v3391_v26 = vld [vmem:[#allocation2 + $0xa8] sm:$0xff] }
 0x12b   : > { %v1283_v12 = vpop.f32.mrf.mxu0  ;;  %6413 = vmatprep.mubr.msk.bf16.mxu1 %vm413_vm1, %v7592_v20 }
 0x12c   : > { %v1426_v45 = vadd.f32 %v6231_v50, %v1316_v14  ;;  %v1314_v33 = vadd.f32 %v1283_v12, %v1204_v28  ;;  %v1393_v55 = vpop.f32.mrf.mxu1  ;;  %v3678_v14 = vld [vmem:[#allocation2 + $0x51] sm:$0xff] }
 0x12d   : > { %v6222_v36 = vpop.f32.mrf.mxu0  ;;  %v3392_v12 = vld [vmem:[#allocation2 + $0xb0] sm:$0xff] }
 0x12e   : > { %v1424_v46 = vadd.f32 %v1393_v55, %v1314_v33  ;;  %v1317_v37 = vadd.f32 %v6222_v36, %v1207_v40  ;;  %v6232_v10 = vpop.f32.mrf.mxu1  ;;  %v4068_v40 = vsel %vm624_vm0, %v7728_v23, 0  ;;  %v3675_v23 = vld [vmem:[#allocation2 + $0x31] sm:$0xff]  ;;  %v3393_v55 = vld [vmem:[#allocation2 + $0xc0] sm:$0xff]  ;;  %v3394_v36 = vld [vmem:[#allocation2 + $0xc8] sm:$0xff] }
 0x12f   : > { %v1286_v34 = vpop.f32.mrf.mxu0 }
 0x130   : > { %v1427_v51 = vadd.f32 %v6232_v10, %v1317_v37  ;;  %v1315_v47 = vadd.f32 %v1286_v34, %v1205_v62  ;;  %v1396_v2 = vpop.f32.mrf.mxu1  ;;  %v3118_v62 = vld [vmem:[#allocation2 + $0x18a] sm:$0xff]  ;;  %v3418_v34 = vpack.c.bf16 %v3392_v12, %v3391_v26  ;;  %v3687_v26 = vld [vmem:[#allocation2 + $0xc1] sm:$0xff] }
 0x131   : > { %v6225_v18 = vpop.f32.mrf.mxu0  ;;  %6440 = vmatmul.mubr.msk.bf16.gmra.mxu0 %vm413_vm1, %v7689_v29  ;;  %v7814_v8 = vpack.c.bf16 %v3118_v62, %v3117_v44  ;;  %v3402_v12 = vld [vmem:[#allocation2 + $0x128] sm:$0xff] }
 0x132   : > { %v1425_v20 = vadd.f32 %v1396_v2, %v1315_v47  ;;  %v1320_v5 = vadd.f32 %v6225_v18, %v1210_v35  ;;  %v6235_v30 = vpop.f32.mrf.mxu1  ;;  %6414 = vmatmul.mubr.msk.bf16.gmra.mxu1 %vm413_vm1, %v7790_v38  ;;  %6443 = vmatprep.mubr.msk.bf16.mxu0 %vm413_vm1, %v7699_v32  ;;  %v3389_v35 = vld [vmem:[#allocation2 + $0x90] sm:$0xff]  ;;  %v3419_v2 = vpack.c.bf16 %v3394_v36, %v3393_v55 }
 0x133   : > { %v1299_v41 = vpop.f32.mrf.mxu0  ;;  %6453 = vmatprep.mubr.msk.bf16.mxu1 %vm413_vm1, %v7506_v53  ;;  %v3417_v59 = vpack.c.bf16 %v3390_v25, %v3389_v35 }
 0x134   : > { %v1430_v6 = vadd.f32 %v6235_v30, %v1320_v5  ;;  %v1318_v60 = vadd.f32 %v1299_v41, %v1208_v52  ;;  %v1409_v48 = vpop.f32.mrf.mxu1  ;;  %v3707_v52 = vpack.c.bf16 %v3676_v58, %v3675_v23 }
 0x135   : > { %v6226_v61 = vpop.f32.mrf.mxu0 }
 0x136   : > { %v1428_v22 = vadd.f32 %v1409_v48, %v1318_v60  ;;  %v1321_v24 = vadd.f32 %v6226_v61, %v1211_v42  ;;  %v6236_v29 = vpop.f32.mrf.mxu1  ;;  %v3681_v60 = vld [vmem:[#allocation2 + $0x79] sm:$0xff]  ;;  %v3682_v48 = vld [vmem:[#allocation2 + $0x81] sm:$0xff] }
 0x137   : > { %v1302_v28 = vpop.f32.mrf.mxu0 }
 0x138   : > { %v1431_v39 = vadd.f32 %v6236_v29, %v1321_v24  ;;  %v1319_v43 = vadd.f32 %v1302_v28, %v1209_v31  ;;  %v1412_v63 = vpop.f32.mrf.mxu1  ;;  %v3677_v31 = vld [vmem:[#allocation2 + $0x49] sm:$0xff]  ;;  %v3683_v24 = vld [vmem:[#allocation2 + $0x91] sm:$0xff]  ;;  %v3684_v29 = vld [vmem:[#allocation2 + $0x99] sm:$0xff] }
 0x139   : > { %v6241_v16 = vpop.f32.mrf.mxu0  ;;  %6444 = vmatmul.mubr.msk.bf16.gmra.mxu0 %vm413_vm1, %v7701_v11  ;;  %v3708_v37 = vpack.c.bf16 %v3678_v14, %v3677_v31  ;;  %v3711_v62 = vpack.c.bf16 %v3684_v29, %v3683_v24 }
 0x13a   : > { %v1429_v32 = vadd.f32 %v1412_v63, %v1319_v43  ;;  %v7804_v53 = vadd.f32 %v6241_v16, %v1426_v45  ;;  %v6251_v13 = vpop.f32.mrf.mxu1  ;;  %6454 = vmatmul.mubr.msk.bf16.vlgmr.msra.gmra.mxu1 %vm413_vm1, %v7526_v56  ;;  %6447 = vmatprep.mubr.msk.bf16.mxu0 %vm413_vm1, %v7711_v21  ;;  %v3397_v43 = vld [vmem:[#allocation2 + $0xf0] sm:$0xff]  ;;  %v3398_v63 = vld [vmem:[#allocation2 + $0xf8] sm:$0xff]  ;;  %v3710_v16 = vpack.c.bf16 %v3682_v48, %v3681_v60  ;;  %v3690_v60 = vld [vmem:[#allocation2 + $0xe1] sm:$0xff] }
 0x13b   : > { %6520 = vmatpush3.bf16.msra.mxu1 %v4068_v40  ;;  %v1503_v57 = vpop.f32.mrf.mxu0  ;;  %6457 = vmatprep.mubr.msk.bf16.mxu1 %vm413_vm1, %v7530_v1  ;;  %v3421_v23 = vpack.c.bf16 %v3398_v63, %v3397_v43  ;;  %v3405_v43 = vld [vmem:[#allocation2 + $0x150] sm:$0xff]  ;;  %v3406_v63 = vld [vmem:[#allocation2 + $0x158] sm:$0xff] }
 0x13c   : > { %8895 = vst [vmem:[#allocation7_spill] sm:$0xff] %v7804_v53  ;;  %v7812_v11 = vadd.f32 %v1503_v57, %v1424_v46  ;;  %v1866_v27 = vpop.f32.mrf.mxu1 }
 0x13d   : > { %v6242_v17 = vpop.f32.mrf.mxu0 }
 0x13e   : > { %8896 = vst [vmem:[#allocation8_spill] sm:$0xff] %v7812_v11  ;;  %v7816_v56 = vadd.f32 %v6242_v17, %v1427_v51  ;;  %v6252_v21 = vpop.f32.mrf.mxu1  ;;  %v3709_v51 = vpack.c.bf16 %v3680_v15, %v3679_v0 }
 0x13f   : > { %v1506_v3 = vpop.f32.mrf.mxu0 }
 0x140   : > { %8897 = vst [vmem:[#allocation9_spill] sm:$0xff] %v7816_v56  ;;  %v7818_v7 = vadd.f32 %v1506_v3, %v1425_v20  ;;  %v1869_v42 = vpop.f32.mrf.mxu1  ;;  %v3686_v3 = vld [vmem:[#allocation2 + $0xb1] sm:$0xff] }
 0x141   : > { %v6245_v1 = vpop.f32.mrf.mxu0  ;;  %6448 = vmatmul.mubr.msk.bf16.gmra.mxu0 %vm413_vm1, %v7814_v8 }
 0x142   : > { %8898 = vst [vmem:[#allocation10_spill] sm:$0xff] %v7818_v7  ;;  %v7822_v54 = vadd.f32 %v6245_v1, %v1430_v6  ;;  %v6255_v9 = vpop.f32.mrf.mxu1  ;;  %6458 = vmatmul.mubr.msk.bf16.gmra.mxu1 %vm413_vm1, %v7542_v19  ;;  %6487 = vmatprep.mubr.msk.bf16.mxu0 %vm413_vm1, %v3707_v52  ;;  %v3395_v6 = vld [vmem:[#allocation2 + $0xd8] sm:$0xff]  ;;  %v3399_v52 = vld [vmem:[#allocation2 + $0x108] sm:$0xff]  ;;  %v3400_v1 = vld [vmem:[#allocation2 + $0x110] sm:$0xff] }
 0x143   : > { %v1519_v50 = vpop.f32.mrf.mxu0  ;;  %6461 = vmatprep.mubr.msk.bf16.mxu1 %vm413_vm1, %v3417_v59  ;;  %v3422_v36 = vpack.c.bf16 %v3400_v1, %v3399_v52  ;;  %v3693_v1 = vld [vmem:[#allocation2 + $0x109] sm:$0xff] }
 0x144   : > { %8899 = vst [vmem:[#allocation11_spill] sm:$0xff] %v7822_v54  ;;  %v7828_v45 = vadd.f32 %v1519_v50, %v1428_v22  ;;  %v1882_v33 = vpop.f32.mrf.mxu1  ;;  %v3396_v22 = vld [vmem:[#allocation2 + $0xe0] sm:$0xff] }
 0x145   : > { %v6246_v46 = vpop.f32.mrf.mxu0  ;;  %v3420_v44 = vpack.c.bf16 %v3396_v22, %v3395_v6  ;;  %v3401_v50 = vld [vmem:[#allocation2 + $0x120] sm:$0xff]  ;;  %v3403_v6 = vld [vmem:[#allocation2 + $0x138] sm:$0xff] }
 0x146   : > { %8900 = vst [vmem:[#allocation12_spill] sm:$0xff] %v7828_v45  ;;  %v7830_v10 = vadd.f32 %v6246_v46, %v1431_v39  ;;  %v6256_v19 = vpop.f32.mrf.mxu1  ;;  %v3691_v22 = vld [vmem:[#allocation2 + $0xf1] sm:$0xff] }
 0x147   : > { %v1522_v47 = vpop.f32.mrf.mxu0 }
 0x148   : > { %8901 = vst [vmem:[#allocation13_spill] sm:$0xff] %v7830_v10  ;;  %v7832_v18 = vadd.f32 %v1522_v47, %v1429_v32  ;;  %v1885_v20 = vpop.f32.mrf.mxu1 }
 0x149   : > { %v6285_v5 = vpop.f32.mrf.mxu0  ;;  %6488 = vmatmul.mubr.msk.bf16.vlgmr.msra.gmra.mxu0 %vm413_vm1, %v3708_v37 }
 0x14a   : > { %8902 = vst [vmem:[#allocation14_spill] sm:$0xff] %v7832_v18  ;;  %v6259_v30 = vpop.f32.mrf.mxu1  ;;  %v7835_v41 = vadd.f32 %v6285_v5, %v6251_v13  ;;  %6462 = vmatmul.mubr.msk.bf16.gmra.mxu1 %vm413_vm1, %v3418_v34  ;;  %6491 = vmatprep.mubr.msk.bf16.mxu0 %vm413_vm1, %v3709_v51  ;;  %v3423_v34 = vpack.c.bf16 %v3402_v12, %v3401_v50  ;;  %v3408_v50 = vld [vmem:[#allocation2 + $0x170] sm:$0xff]  ;;  %v3695_v12 = vld [vmem:[#allocation2 + $0x121] sm:$0xff] }
 0x14b   : > { %v2078_v61 = vpop.f32.mrf.mxu0  ;;  %6465 = vmatprep.mubr.msk.bf16.mxu1 %vm413_vm1, %v3419_v2 }
 0x14c   : > { %v1898_v28 = vpop.f32.mrf.mxu1  ;;  %v7840_v39 = vadd.f32 %v2078_v61, %v1866_v27  ;;  %v3404_v61 = vld [vmem:[#allocation2 + $0x140] sm:$0xff] }
 0x14d   : > { %v6286_v40 = vpop.f32.mrf.mxu0 }
 0x14e   : > { %v6260_v32 = vpop.f32.mrf.mxu1  ;;  %v7842_v13 = vadd.f32 %v6286_v40, %v6252_v21  ;;  %v3685_v21 = vld [vmem:[#allocation2 + $0xa9] sm:$0xff] }
 0x14f   : > { %v2081_v57 = vpop.f32.mrf.mxu0  ;;  %v3712_v0 = vpack.c.bf16 %v3686_v3, %v3685_v21 }
 0x150   : > { %v1901_v58 = vpop.f32.mrf.mxu1  ;;  %v7844_v35 = vadd.f32 %v2081_v57, %v1869_v42  ;;  %v3688_v42 = vld [vmem:[#allocation2 + $0xc9] sm:$0xff] }
 0x151   : > { %v6289_v25 = vpop.f32.mrf.mxu0  ;;  %6492 = vmatmul.mubr.msk.bf16.gmra.mxu0 %vm413_vm1, %v3710_v16  ;;  %v3713_v46 = vpack.c.bf16 %v3688_v42, %v3687_v26  ;;  %v3694_v26 = vld [vmem:[#allocation2 + $0x111] sm:$0xff] }
 0x152   : > { %v6263_v17 = vpop.f32.mrf.mxu1  ;;  %v7847_v27 = vadd.f32 %v6289_v25, %v6255_v9  ;;  %6466 = vmatmul.mubr.msk.bf16.gmra.mxu1 %vm413_vm1, %v3420_v44  ;;  %6495 = vmatprep.mubr.msk.bf16.mxu0 %vm413_vm1, %v3711_v62  ;;  %v3424_v62 = vpack.c.bf16 %v3404_v61, %v3403_v6  ;;  %v3425_v25 = vpack.c.bf16 %v3406_v63, %v3405_v43  ;;  %v3412_v63 = vld [vmem:[#allocation2 + $0x1a0] sm:$0xff] }
 0x153   : > { %v2094_v59 = vpop.f32.mrf.mxu0  ;;  %6469 = vmatprep.mubr.msk.bf16.mxu1 %vm413_vm1, %v3421_v23 }
 0x154   : > { %v1914_v31 = vpop.f32.mrf.mxu1  ;;  %v7852_v14 = vadd.f32 %v2094_v59, %v1882_v33 }
 0x155   : > { %v6290_v9 = vpop.f32.mrf.mxu0 }
 0x156   : > { %v6264_v15 = vpop.f32.mrf.mxu1  ;;  %v7854_v55 = vadd.f32 %v6290_v9, %v6256_v19  ;;  %v3689_v19 = vld [vmem:[#allocation2 + $0xd9] sm:$0xff] }
 0x157   : > { %v2097_v37 = vpop.f32.mrf.mxu0  ;;  %v3714_v40 = vpack.c.bf16 %v3690_v60, %v3689_v19 }
 0x158   : > { %v1917_v51 = vpop.f32.mrf.mxu1  ;;  %v7856_v47 = vadd.f32 %v2097_v37, %v1885_v20  ;;  %v3692_v20 = vld [vmem:[#allocation2 + $0xf9] sm:$0xff] }
 0x159   : > { %v6293_v2 = vpop.f32.mrf.mxu0  ;;  %6496 = vmatmul.mubr.msk.bf16.gmra.mxu0 %vm413_vm1, %v3712_v0  ;;  %v3715_v57 = vpack.c.bf16 %v3692_v20, %v3691_v22  ;;  %v3698_v20 = vld [vmem:[#allocation2 + $0x141] sm:$0xff] }
 0x15a   : > { %v6267_v5 = vpop.f32.mrf.mxu1  ;;  %v7859_v33 = vadd.f32 %v6293_v2, %v6259_v30  ;;  %6470 = vmatmul.mubr.msk.bf16.gmra.mxu1 %vm413_vm1, %v3422_v36  ;;  %6499 = vmatprep.mubr.msk.bf16.mxu0 %vm413_vm1, %v3713_v46  ;;  %v3716_v46 = vpack.c.bf16 %v3694_v26, %v3693_v1 }
 0x15b   : > { %v2110_v48 = vpop.f32.mrf.mxu0  ;;  %6473 = vmatprep.mubr.msk.bf16.mxu1 %vm413_vm1, %v3423_v34 }
 0x15c   : > { %v1930_v24 = vpop.f32.mrf.mxu1  ;;  %v7864_v29 = vadd.f32 %v2110_v48, %v1898_v28 }
 0x15d   : > { %v6294_v30 = vpop.f32.mrf.mxu0 }
 0x15e   : > { %v6268_v16 = vpop.f32.mrf.mxu1  ;;  %v7866_v44 = vadd.f32 %v6294_v30, %v6260_v32  ;;  %v3407_v32 = vld [vmem:[#allocation2 + $0x168] sm:$0xff]  ;;  %v3700_v30 = vld [vmem:[#allocation2 + $0x159] sm:$0xff] }
 0x15f   : > { %v2113_v23 = vpop.f32.mrf.mxu0  ;;  %v3426_v34 = vpack.c.bf16 %v3408_v50, %v3407_v32 }
 0x160   : > { %v7868_v52 = vpop.f32.mrf.mxu1  ;;  %v7870_v21 = vadd.f32 %v2113_v23, %v1901_v58  ;;  %v3696_v58 = vld [vmem:[#allocation2 + $0x129] sm:$0xff] }
 0x161   : > { %v6297_v3 = vpop.f32.mrf.mxu0  ;;  %6500 = vmatmul.mubr.msk.bf16.gmra.mxu0 %vm413_vm1, %v3714_v40  ;;  %v3717_v2 = vpack.c.bf16 %v3696_v58, %v3695_v12 }
 0x162   : > { %v6271_v28 = vpop.f32.mrf.mxu1  ;;  %v7873_v59 = vadd.f32 %v6297_v3, %v6263_v17  ;;  %6474 = vmatmul.mubr.msk.bf16.gmra.mxu1 %vm413_vm1, %v3424_v62  ;;  %6503 = vmatprep.mubr.msk.bf16.mxu0 %vm413_vm1, %v3715_v57  ;;  %v3969_v57 = vld [vmem:[#allocation2 + $0x32] sm:$0xff] }
 0x163   : > { %v2126_v42 = vpop.f32.mrf.mxu0  ;;  %6477 = vmatprep.mubr.msk.bf16.mxu1 %vm413_vm1, %v3425_v25 }
 0x164   : > { %v1946_v9 = vpop.f32.mrf.mxu1  ;;  %v7878_v0 = vadd.f32 %v2126_v42, %v1914_v31  ;;  %v3411_v31 = vld [vmem:[#allocation2 + $0x198] sm:$0xff] }
 0x165   : > { %v6298_v36 = vpop.f32.mrf.mxu0  ;;  %v3428_v1 = vpack.c.bf16 %v3412_v63, %v3411_v31  ;;  %v3973_v31 = vld [vmem:[#allocation2 + $0x62] sm:$0xff] }
 0x166   : > { %v6272_v17 = vpop.f32.mrf.mxu1  ;;  %v7880_v37 = vadd.f32 %v6298_v36, %v6264_v15  ;;  %v3697_v15 = vld [vmem:[#allocation2 + $0x139] sm:$0xff]  ;;  %v3701_v36 = vld [vmem:[#allocation2 + $0x169] sm:$0xff] }
 0x167   : > { %v2129_v6 = vpop.f32.mrf.mxu0  ;;  %v3718_v25 = vpack.c.bf16 %v3698_v20, %v3697_v15  ;;  %v3974_v15 = vld [vmem:[#allocation2 + $0x6a] sm:$0xff] }
 0x168   : > { %v7882_v19 = vpop.f32.mrf.mxu1  ;;  %v7884_v60 = vadd.f32 %v2129_v6, %v1917_v51  ;;  %v3699_v51 = vld [vmem:[#allocation2 + $0x151] sm:$0xff] }
 0x169   : > { %v6301_v48 = vpop.f32.mrf.mxu0  ;;  %6504 = vmatmul.mubr.msk.bf16.gmra.mxu0 %vm413_vm1, %v3716_v46  ;;  %v3719_v26 = vpack.c.bf16 %v3700_v30, %v3699_v51 }
 0x16a   : > { %v6275_v61 = vpop.f32.mrf.mxu1  ;;  %v7887_v22 = vadd.f32 %v6301_v48, %v6267_v5  ;;  %6478 = vmatmul.mubr.msk.bf16.gmra.mxu1 %vm413_vm1, %v3426_v34  ;;  %6507 = vmatprep.mubr.msk.bf16.mxu0 %vm413_vm1, %v3717_v2  ;;  %v3970_v5 = vld [vmem:[#allocation2 + $0x3a] sm:$0xff]  ;;  %v3971_v34 = vld [vmem:[#allocation2 + $0x4a] sm:$0xff]  ;;  %v3972_v2 = vld [vmem:[#allocation2 + $0x52] sm:$0xff] }
 0x16b   : > { %v2142_v43 = vpop.f32.mrf.mxu0  ;;  %6481 = vmatprep.mubr.msk.bf16.mxu1 %vm413_vm1, %v7738_v49  ;;  %v4001_v50 = vpack.c.bf16 %v3970_v5, %v3969_v57  ;;  %v4002_v51 = vpack.c.bf16 %v3972_v2, %v3971_v34  ;;  %v4003_v57 = vpack.c.bf16 %v3974_v15, %v3973_v31  ;;  %v3978_v34 = vld [vmem:[#allocation2 + $0x9a] sm:$0xff] }
 0x16c   : > { %v1962_v40 = vpop.f32.mrf.mxu1  ;;  %v7893_v62 = vadd.f32 %v2142_v43, %v1930_v24 }
 0x16d   : > { %v6302_v23 = vpop.f32.mrf.mxu0 }
 0x16e   : > { %v6276_v3 = vpop.f32.mrf.mxu1  ;;  %v7895_v32 = vadd.f32 %v6302_v23, %v6268_v16  ;;  %v3702_v16 = vld [vmem:[#allocation2 + $0x171] sm:$0xff] }
 0x16f   : > { %v7897_v42 = vpop.f32.mrf.mxu0  ;;  %v3720_v43 = vpack.c.bf16 %v3702_v16, %v3701_v36  ;;  %v3976_v36 = vld [vmem:[#allocation2 + $0x82] sm:$0xff] }
 0x170   : > { %v7899_v12 = vpop.f32.mrf.mxu1 }
 0x171   : > { %v6305_v49 = vpop.f32.mrf.mxu0  ;;  %6508 = vmatmul.mubr.msk.bf16.gmra.mxu0 %vm413_vm1, %v3718_v25 }
 0x172   : > { %v6279_v58 = vpop.f32.mrf.mxu1  ;;  %v7902_v24 = vadd.f32 %v6305_v49, %v6271_v28  ;;  %6482 = vmatmul.mubr.msk.bf16.gmra.mxu1 %vm413_vm1, %v3428_v1  ;;  %6511 = vmatprep.mubr.msk.bf16.mxu0 %vm413_vm1, %v3719_v26  ;;  %v3705_v1 = vld [vmem:[#allocation2 + $0x199] sm:$0xff] }
 0x173   : > { %v2158_v46 = vpop.f32.mrf.mxu0  ;;  %6521 = vmatprep.mubr.msk.bf16.mxu1 %vm413_vm1, %v4001_v50  ;;  %v3975_v49 = vld [vmem:[#allocation2 + $0x7a] sm:$0xff] }
 0x174   : > { %v1978_v6 = vpop.f32.mrf.mxu1  ;;  %v7907_v48 = vadd.f32 %v2158_v46, %v1946_v9 }
 0x175   : > { %v6306_v20 = vpop.f32.mrf.mxu0 }
 0x176   : > { %v6280_v28 = vpop.f32.mrf.mxu1  ;;  %v7909_v63 = vadd.f32 %v6306_v20, %v6272_v17  ;;  %v3706_v17 = vld [vmem:[#allocation2 + $0x1a1] sm:$0xff] }
 0x177   : > { %v7911_v30 = vpop.f32.mrf.mxu0  ;;  %v3722_v15 = vpack.c.bf16 %v3706_v17, %v3705_v1  ;;  %v3980_v17 = vld [vmem:[#allocation2 + $0xb2] sm:$0xff] }
 0x178   : > { %v7913_v5 = vpop.f32.mrf.mxu1 }
 0x179   : > { %v6309_v23 = vpop.f32.mrf.mxu0  ;;  %6512 = vmatmul.mubr.msk.bf16.gmra.mxu0 %vm413_vm1, %v3720_v43  ;;  %v4004_v43 = vpack.c.bf16 %v3976_v36, %v3975_v49 }
 0x17a   : > { %v7916_v25 = vadd.f32 %v6309_v23, %v6275_v61  ;;  %v6319_v9 = vpop.f32.mrf.mxu1  ;;  %6522 = vmatmul.mubr.msk.bf16.vlgmr.msra.gmra.mxu1 %vm413_vm1, %v4002_v51  ;;  %6515 = vmatprep.mubr.msk.bf16.mxu0 %vm413_vm1, %v7790_v38  ;;  %v3977_v61 = vld [vmem:[#allocation2 + $0x92] sm:$0xff] }
 0x17b   : > { %v2469_v26 = vadd.f32 %v6319_v9, %v7835_v41  ;;  %v2174_v50 = vpop.f32.mrf.mxu0  ;;  %6525 = vmatprep.mubr.msk.bf16.mxu1 %vm413_vm1, %v4003_v57  ;;  %v4005_v57 = vpack.c.bf16 %v3978_v34, %v3977_v61 }
 0x17c   : > { %v7923_v16 = vadd.f32 %v2174_v50, %v1962_v40  ;;  %v2340_v46 = vpop.f32.mrf.mxu1 }
 0x17d   : > { %v2467_v2 = vadd.f32 %v2340_v46, %v7840_v39  ;;  %v6310_v31 = vpop.f32.mrf.mxu0  ;;  %v3982_v46 = vld [vmem:[#allocation2 + $0xca] sm:$0xff] }
 0x17e   : > { %v7926_v20 = vadd.f32 %v6310_v31, %v6276_v3  ;;  %v6320_v38 = vpop.f32.mrf.mxu1 }
 0x17f   : > { %v2470_v41 = vadd.f32 %v6320_v38, %v7842_v13  ;;  %v7929_v51 = vpop.f32.mrf.mxu0  ;;  %v3979_v13 = vld [vmem:[#allocation2 + $0xaa] sm:$0xff] }
 0x180   : > { %v2343_v23 = vpop.f32.mrf.mxu1 }
 0x181   : > { %v7932_v40 = vadd.f32 %v2343_v23, %v7844_v35  ;;  %v6313_v9 = vpop.f32.mrf.mxu0  ;;  %6516 = vmatmul.mubr.msk.bf16.gmra.mxu0 %vm413_vm1, %v3722_v15  ;;  %v3981_v35 = vld [vmem:[#allocation2 + $0xc2] sm:$0xff]  ;;  %v4006_v15 = vpack.c.bf16 %v3980_v17, %v3979_v13 }
 0x182   : > { %v7935_v50 = vadd.f32 %v6313_v9, %v6279_v58  ;;  %v6323_v39 = vpop.f32.mrf.mxu1  ;;  %6526 = vmatmul.mubr.msk.bf16.gmra.mxu1 %vm413_vm1, %v4004_v43  ;;  %v4007_v43 = vpack.c.bf16 %v3982_v46, %v3981_v35  ;;  %v3986_v35 = vld [vmem:[#allocation2 + $0xfa] sm:$0xff] }
 0x183   : > { %v2473_v3 = vadd.f32 %v6323_v39, %v7847_v27  ;;  %v2190_v1 = vpop.f32.mrf.mxu0  ;;  %6529 = vmatprep.mubr.msk.bf16.mxu1 %vm413_vm1, %v4005_v57 }
 0x184   : > { %v7940_v49 = vadd.f32 %v2190_v1, %v1978_v6  ;;  %v2356_v36 = vpop.f32.mrf.mxu1  ;;  %v3983_v1 = vld [vmem:[#allocation2 + $0xda] sm:$0xff] }
 0x185   : > { %v2471_v61 = vadd.f32 %v2356_v36, %v7852_v14  ;;  %v6314_v34 = vpop.f32.mrf.mxu0  ;;  %v3985_v36 = vld [vmem:[#allocation2 + $0xf2] sm:$0xff] }
 0x186   : > { %v7943_v58 = vadd.f32 %v6314_v34, %v6280_v28  ;;  %v6324_v31 = vpop.f32.mrf.mxu1 }
 0x187   : > { %v2474_v38 = vadd.f32 %v6324_v31, %v7854_v55  ;;  %v7946_v27 = vpop.f32.mrf.mxu0  ;;  %v3984_v55 = vld [vmem:[#allocation2 + $0xe2] sm:$0xff] }
 0x188   : > { %v2359_v57 = vpop.f32.mrf.mxu1  ;;  %v4008_v31 = vpack.c.bf16 %v3984_v55, %v3983_v1  ;;  %v3987_v1 = vld [vmem:[#allocation2 + $0x10a] sm:$0xff] }
 0x189   : > { %v7949_v23 = vadd.f32 %v2359_v57, %v7856_v47  ;;  %v6353_v6 = vpop.f32.mrf.mxu0  ;;  %v4009_v57 = vpack.c.bf16 %v3986_v35, %v3985_v36  ;;  %v3989_v36 = vld [vmem:[#allocation2 + $0x122] sm:$0xff]  ;;  %v3990_v35 = vld [vmem:[#allocation2 + $0x12a] sm:$0xff] }
 0x18a   : > { %v6327_v9 = vpop.f32.mrf.mxu1  ;;  %v7951_v39 = vadd.f32 %v6353_v6, %v2469_v26  ;;  %6530 = vmatmul.mubr.msk.bf16.gmra.mxu1 %vm413_vm1, %v4006_v15 }
 0x18b   : > { %v2477_v14 = vadd.f32 %v6327_v9, %v7859_v33  ;;  %v2634_v28 = vpop.f32.mrf.mxu0  ;;  %6533 = vmatprep.mubr.msk.bf16.mxu1 %vm413_vm1, %v4007_v43 }
 0x18c   : > { %v2372_v13 = vpop.f32.mrf.mxu1  ;;  %v7956_v17 = vadd.f32 %v2634_v28, %v2467_v2 }
 0x18d   : > { %v2475_v47 = vadd.f32 %v2372_v13, %v7864_v29  ;;  %v6354_v46 = vpop.f32.mrf.mxu0 }
 0x18e   : > { %v6328_v34 = vpop.f32.mrf.mxu1  ;;  %v7959_v26 = vadd.f32 %v6354_v46, %v2470_v41 }
 0x18f   : > { %v2478_v15 = vadd.f32 %v6328_v34, %v7866_v44  ;;  %v7962_v33 = vpop.f32.mrf.mxu0  ;;  %v3988_v44 = vld [vmem:[#allocation2 + $0x112] sm:$0xff] }
 0x190   : > { %v2375_v43 = vpop.f32.mrf.mxu1 }
 0x191   : > { %v7965_v6 = vadd.f32 %v2375_v43, %v7870_v21  ;;  %v6357_v2 = vpop.f32.mrf.mxu0  ;;  %v4010_v43 = vpack.c.bf16 %v3988_v44, %v3987_v1  ;;  %v3991_v1 = vld [vmem:[#allocation2 + $0x13a] sm:$0xff] }
 0x192   : > { %v6331_v9 = vpop.f32.mrf.mxu1  ;;  %v7967_v28 = vadd.f32 %v6357_v2, %v2473_v3  ;;  %6534 = vmatmul.mubr.msk.bf16.gmra.mxu1 %vm413_vm1, %v4008_v31  ;;  %v4011_v2 = vpack.c.bf16 %v3990_v35, %v3989_v36  ;;  %v3993_v36 = vld [vmem:[#allocation2 + $0x152] sm:$0xff]  ;;  %v3994_v35 = vld [vmem:[#allocation2 + $0x15a] sm:$0xff] }
 0x193   : > { %v2481_v29 = vadd.f32 %v6331_v9, %v7873_v59  ;;  %v2650_v41 = vpop.f32.mrf.mxu0  ;;  %6537 = vmatprep.mubr.msk.bf16.mxu1 %vm413_vm1, %v4009_v57 }
 0x194   : > { %v2388_v55 = vpop.f32.mrf.mxu1  ;;  %v7972_v13 = vadd.f32 %v2650_v41, %v2471_v61 }
 0x195   : > { %v2479_v21 = vadd.f32 %v2388_v55, %v7878_v0  ;;  %v6358_v46 = vpop.f32.mrf.mxu0 }
 0x196   : > { %v6332_v34 = vpop.f32.mrf.mxu1  ;;  %v7975_v3 = vadd.f32 %v6358_v46, %v2474_v38 }
 0x197   : > { %v2482_v31 = vadd.f32 %v6332_v34, %v7880_v37  ;;  %v7978_v59 = vpop.f32.mrf.mxu0  ;;  %v3992_v37 = vld [vmem:[#allocation2 + $0x142] sm:$0xff] }
 0x198   : > { %v2391_v57 = vpop.f32.mrf.mxu1 }
 0x199   : > { %v7981_v9 = vadd.f32 %v2391_v57, %v7884_v60  ;;  %v6361_v61 = vpop.f32.mrf.mxu0  ;;  %v4012_v57 = vpack.c.bf16 %v3992_v37, %v3991_v1  ;;  %v3996_v1 = vld [vmem:[#allocation2 + $0x172] sm:$0xff] }
 0x19a   : > { %v6335_v41 = vpop.f32.mrf.mxu1  ;;  %v7983_v4 = vadd.f32 %v6361_v61, %v2477_v14  ;;  %6538 = vmatmul.mubr.msk.bf16.gmra.mxu1 %vm413_vm1, %v4010_v43  ;;  %v4013_v61 = vpack.c.bf16 %v3994_v35, %v3993_v36 }
 0x19b   : > { %v2485_v0 = vadd.f32 %v6335_v41, %v7887_v22  ;;  %v2666_v38 = vpop.f32.mrf.mxu0  ;;  %6541 = vmatprep.mubr.msk.bf16.mxu1 %vm413_vm1, %v4011_v2 }
 0x19c   : > { %v2404_v44 = vpop.f32.mrf.mxu1  ;;  %v7988_v55 = vadd.f32 %v2666_v38, %v2475_v47 }
 0x19d   : > { %v2483_v60 = vadd.f32 %v2404_v44, %v7893_v62  ;;  %v6362_v46 = vpop.f32.mrf.mxu0 }
 0x19e   : > { %v6336_v34 = vpop.f32.mrf.mxu1  ;;  %v7991_v14 = vadd.f32 %v6362_v46, %v2478_v15  ;;  %v3995_v15 = vld [vmem:[#allocation2 + $0x16a] sm:$0xff] }
 0x19f   : > { %v2486_v43 = vadd.f32 %v6336_v34, %v7895_v32  ;;  %v7994_v22 = vpop.f32.mrf.mxu0 }
 0x1a0   : > { %v7996_v2 = vpop.f32.mrf.mxu1 }
 0x1a1   : > { %v6365_v41 = vpop.f32.mrf.mxu0 }
 0x1a2   : > { %v6339_v18 = vpop.f32.mrf.mxu1  ;;  %v7998_v47 = vadd.f32 %v6365_v41, %v2481_v29  ;;  %6542 = vmatmul.mubr.msk.bf16.gmra.mxu1 %vm413_vm1, %v4012_v57  ;;  %v4014_v29 = vpack.c.bf16 %v3996_v1, %v3995_v15 }
 0x1a3   : > { %v2489_v62 = vadd.f32 %v6339_v18, %v7902_v24  ;;  %v2682_v38 = vpop.f32.mrf.mxu0  ;;  %6545 = vmatprep.mubr.msk.bf16.mxu1 %vm413_vm1, %v4013_v61 }
 0x1a4   : > { %v2420_v37 = vpop.f32.mrf.mxu1  ;;  %v8003_v32 = vadd.f32 %v2682_v38, %v2479_v21  ;;  %v4000_v38 = vld [vmem:[#allocation2 + $0x1a2] sm:$0xff] }
 0x1a5   : > { %v2487_v44 = vadd.f32 %v2420_v37, %v7907_v48  ;;  %v6366_v36 = vpop.f32.mrf.mxu0 }
 0x1a6   : > { %v6340_v35 = vpop.f32.mrf.mxu1  ;;  %v8006_v46 = vadd.f32 %v6366_v36, %v2482_v31  ;;  %v3999_v31 = vld [vmem:[#allocation2 + $0x19a] sm:$0xff] }
 0x1a7   : > { %v2490_v34 = vadd.f32 %v6340_v35, %v7909_v63  ;;  %v8009_v57 = vpop.f32.mrf.mxu0 }
 0x1a8   : > { %v8011_v18 = vpop.f32.mrf.mxu1 }
 0x1a9   : > { %v6369_v24 = vpop.f32.mrf.mxu0 }
 0x1aa   : > { %v6343_v61 = vpop.f32.mrf.mxu1  ;;  %v8013_v41 = vadd.f32 %v6369_v24, %v2485_v0  ;;  %6546 = vmatmul.mubr.msk.bf16.gmra.mxu1 %vm413_vm1, %v4014_v29  ;;  %v4016_v0 = vpack.c.bf16 %v4000_v38, %v3999_v31 }
 0x1ab   : > { %v2493_v21 = vadd.f32 %v6343_v61, %v7916_v25  ;;  %v2698_v48 = vpop.f32.mrf.mxu0  ;;  %6549 = vmatprep.mubr.msk.bf16.mxu1 %vm413_vm1, %v7814_v8 }
 0x1ac   : > { %v2436_v15 = vpop.f32.mrf.mxu1  ;;  %v8019_v63 = vadd.f32 %v2698_v48, %v2483_v60 }
 0x1ad   : > { %v2491_v1 = vadd.f32 %v2436_v15, %v7923_v16  ;;  %v6370_v37 = vpop.f32.mrf.mxu0 }
 0x1ae   : > { %v6344_v36 = vpop.f32.mrf.mxu1  ;;  %v8022_v35 = vadd.f32 %v6370_v37, %v2486_v43 }
 0x1af   : > { %v2494_v29 = vadd.f32 %v6344_v36, %v7926_v20  ;;  %v8025_v24 = vpop.f32.mrf.mxu0 }
 0x1b0   : > { %v8027_v25 = vpop.f32.mrf.mxu1 }
 0x1b1   : > { %v6373_v61 = vpop.f32.mrf.mxu0 }
 0x1b2   : > { %v6347_v8 = vpop.f32.mrf.mxu1  ;;  %v8029_v10 = vadd.f32 %v6373_v61, %v2489_v62  ;;  %6550 = vmatmul.mubr.msk.bf16.gmra.mxu1 %vm413_vm1, %v4016_v0 }
 0x1b3   : > { %v2497_v60 = vadd.f32 %v6347_v8, %v7935_v50  ;;  %v2714_v16 = vpop.f32.mrf.mxu0  ;;  %v6703_v50 = vld [vmem:[%s8878_s6 + $0x8] sm:$0xff]   ;;  %v8903_v8 = vmov 0.0  }
 0x1b4   : > { %v2452_v48 = vpop.f32.mrf.mxu1  ;;  %v8033_v15 = vadd.f32 %v2714_v16, %v2487_v44  ;;  %6553 = vmatprep.subr.bf16.mxu0 %v6703_v50  ;;  %460 = vst.msk [vmem:[#allocation3] sm:$0xff] %vm459_vm4, %v8903_v8  ;;  %461 = vst.msk [vmem:[#allocation3 + $0x8] sm:$0xff] %vm459_vm4, %v8903_v8 }
 0x1b5   : > { %v2495_v43 = vadd.f32 %v2452_v48, %v7940_v49  ;;  %v6374_v31 = vpop.f32.mrf.mxu0  ;;  %6554 = vmatpush3.bf16.msra.mxu0 %v6703_v50  ;;  %469 = vst.msk [vmem:[#allocation3] sm:$0x1] %vm468_vm5, %v8903_v8  ;;  %471 = vst.msk [vmem:[#allocation3 + $0x30] sm:$0x1] %vm468_vm5, %v8903_v8 }
 0x1b6   : > { %v6348_v20 = vpop.f32.mrf.mxu1  ;;  %v8036_v38 = vadd.f32 %v6374_v31, %v2490_v34  ;;  %470 = vst.msk [vmem:[#allocation3 + $0x18] sm:$0x1] %vm468_vm5, %v8903_v8  ;;  %472 = vst.msk [vmem:[#allocation3 + $0x48] sm:$0x1] %vm468_vm5, %v8903_v8 }
 0x1b7   : > { %v2498_v37 = vadd.f32 %v6348_v20, %v7943_v58  ;;  %v8039_v36 = vpop.f32.mrf.mxu0  ;;  %473 = vst.msk [vmem:[#allocation3 + $0x60] sm:$0x1] %vm468_vm5, %v8903_v8  ;;  %474 = vst.msk [vmem:[#allocation3 + $0x78] sm:$0x1] %vm468_vm5, %v8903_v8 }
 0x1b8   : > { %v8041_v62 = vpop.f32.mrf.mxu1  ;;  %475 = vst.msk [vmem:[#allocation3 + $0x90] sm:$0x1] %vm468_vm5, %v8903_v8  ;;  %476 = vst.msk [vmem:[#allocation3 + $0xa8] sm:$0x1] %vm468_vm5, %v8903_v8 }
 0x1b9   : > { %v6377_v61 = vpop.f32.mrf.mxu0  ;;  %477 = vst.msk [vmem:[#allocation3 + $0xc0] sm:$0x1] %vm468_vm5, %v8903_v8  ;;  %478 = vst.msk [vmem:[#allocation3 + $0xd8] sm:$0x1] %vm468_vm5, %v8903_v8 }
 0x1ba   : > { %v8046_v0 = vadd.f32 %v6377_v61, %v2493_v21  ;;  %v6387_v44 = vpop.f32.mrf.mxu1  ;;  %479 = vst.msk [vmem:[#allocation3 + $0xf0] sm:$0x1] %vm468_vm5, %v8903_v8  ;;  %480 = vst.msk [vmem:[#allocation3 + $0x108] sm:$0x1] %vm468_vm5, %v8903_v8 }
 0x1bb   : > { %v8049_v49 = vadd.f32 %v6387_v44, %v7951_v39  ;;  %v2730_v34 = vpop.f32.mrf.mxu0  ;;  %481 = vst.msk [vmem:[#allocation3 + $0x120] sm:$0x1] %vm468_vm5, %v8903_v8  ;;  %482 = vst.msk [vmem:[#allocation3 + $0x138] sm:$0x1] %vm468_vm5, %v8903_v8 }
 0x1bc   : > { %v8055_v58 = vadd.f32 %v2730_v34, %v2491_v1  ;;  %v2928_v16 = vpop.f32.mrf.mxu1  ;;  %483 = vst.msk [vmem:[#allocation3 + $0x150] sm:$0x1] %vm468_vm5, %v8903_v8  ;;  %484 = vst.msk [vmem:[#allocation3 + $0x168] sm:$0x1] %vm468_vm5, %v8903_v8 }
 0x1bd   : > { %v8058_v21 = vadd.f32 %v2928_v16, %v7956_v17  ;;  %v6378_v48 = vpop.f32.mrf.mxu0  ;;  %485 = vst.msk [vmem:[#allocation3 + $0x180] sm:$0x1] %vm468_vm5, %v8903_v8 }
 0x1be   : > { %v8060_v31 = vadd.f32 %v6378_v48, %v2494_v29  ;;  %v6388_v39 = vpop.f32.mrf.mxu1  ;;  %463 = vst.msk [vmem:[#allocation3 + $0x10] sm:$0x3] %vm462_vm6, %v8903_v8 }
 0x1bf   : > { %v8063_v20 = vadd.f32 %v6388_v39, %v7959_v26  ;;  %v8065_v61 = vpop.f32.mrf.mxu0 }
 0x1c0   : > { %v8067_v44 = vpop.f32.mrf.mxu1 }
 0x1c1   : > { %v6381_v45 = vpop.f32.mrf.mxu0 }
 0x1c2   : > { %v8069_v54 = vadd.f32 %v6381_v45, %v2497_v60  ;;  %v6391_v1 = vpop.f32.mrf.mxu1 }
 0x1c3   : > { %v8072_v50 = vadd.f32 %v6391_v1, %v7967_v28  ;;  %v2746_v17 = vpop.f32.mrf.mxu0 }
 0x1c4   : > { %v8074_v34 = vadd.f32 %v2746_v17, %v2495_v43  ;;  %v2944_v29 = vpop.f32.mrf.mxu1 }
 0x1c5   : > { %v8077_v16 = vadd.f32 %v2944_v29, %v7972_v13  ;;  %v6382_v26 = vpop.f32.mrf.mxu0 }
 0x1c6   : > { %v8079_v48 = vadd.f32 %v6382_v26, %v2498_v37  ;;  %v6392_v39 = vpop.f32.mrf.mxu1  ;;  %v2770_v26 = vadd.f32 %v7994_v22, %v7965_v6  ;;  %v2774_v22 = vadd.f32 %v8009_v57, %v7981_v9 }
 0x1c7   : > { %v8082_v7 = vadd.f32 %v6392_v39, %v7975_v3  ;;  %v8084_v45 = vpop.f32.mrf.mxu0 }
 0x1c8   : > { %v8086_v28 = vpop.f32.mrf.mxu1 }
 0x1c9   : > { %v8124_v13 = vpop.f32.mrf.mxu0 }
 0x1ca   : > { %v6395_v3 = vpop.f32.mrf.mxu1 }
 0x1cb   : > { %v8127_v60 = vadd.f32 %v6395_v3, %v7983_v4  ;;  %v8129_v43 = vpop.f32.mrf.mxu0 }
 0x1cc   : > { %v2960_v37 = vpop.f32.mrf.mxu1 }
 0x1cd   : > { %v8132_v1 = vadd.f32 %v2960_v37, %v7988_v55  ;;  %v8134_v17 = vpop.f32.mrf.mxu0 }
 0x1ce   : > { %v6396_v29 = vpop.f32.mrf.mxu1 }
 0x1cf   : > { %8904 = vst [vmem:[#allocation15_spill] sm:$0xff] %v8132_v1  ;;  %v8139_v8 = vadd.f32 %v6396_v29, %v7991_v14  ;;  %v8141_v39 = vpop.f32.mrf.mxu0 }
 0x1d0   : > { %v2963_v56 = vpop.f32.mrf.mxu1 }
 0x1d1   : > { %v8143_v4 = vadd.f32 %v2963_v56, %v2770_v26  ;;  %v8145_v3 = vpop.f32.mrf.mxu0 }
 0x1d2   : > { %v6399_v11 = vpop.f32.mrf.mxu1 }
 0x1d3   : > { %v8148_v55 = vadd.f32 %v6399_v11, %v7998_v47  ;;  %v8150_v37 = vpop.f32.mrf.mxu0 }
 0x1d4   : > { %v2976_v53 = vpop.f32.mrf.mxu1 }
 0x1d5   : > { %8905 = vst [vmem:[#allocation16_spill] sm:$0xff] %v8148_v55  ;;  %v8153_v1 = vadd.f32 %v2976_v53, %v8003_v32  ;;  %v8155_v6 = vpop.f32.mrf.mxu0  ;;  %v2146_v53 = vadd.f32 %v7897_v42, %v7868_v52 }
 0x1d6   : > { %v6400_v14 = vpop.f32.mrf.mxu1 }
 0x1d7   : > { %8906 = vst [vmem:[#allocation17_spill] sm:$0xff] %v8153_v1  ;;  %v8160_v56 = vadd.f32 %v6400_v14, %v8006_v46  ;;  %v8162_v29 = vpop.f32.mrf.mxu0  ;;  %v2484_v46 = vadd.f32 %v7996_v2, %v2146_v53  ;;  %v2162_v2 = vadd.f32 %v7911_v30, %v7882_v19 }
 0x1d8   : > { %v2979_v26 = vpop.f32.mrf.mxu1 }
 0x1d9   : > { %8907 = vst [vmem:[#allocation18_spill] sm:$0xff] %v8160_v56  ;;  %v8164_v11 = vadd.f32 %v2979_v26, %v2774_v22  ;;  %v8166_v47 = vpop.f32.mrf.mxu0  ;;  %v2778_v26 = vadd.f32 %v8025_v24, %v2484_v46 }
 0x1da   : > { %v6403_v55 = vpop.f32.mrf.mxu1 }
 0x1db   : > { %8908 = vst [vmem:[#allocation19_spill] sm:$0xff] %v8164_v11  ;;  %v8171_v32 = vadd.f32 %v6403_v55, %v8013_v41  ;;  %v8173_v1 = vpop.f32.mrf.mxu0 }
 0x1dc   : > { %v2992_v9 = vpop.f32.mrf.mxu1 }
 0x1dd   : > { %8909 = vst [vmem:[#allocation20_spill] sm:$0xff] %v8171_v32  ;;  %v8177_v57 = vadd.f32 %v2992_v9, %v8019_v63  ;;  %v8179_v14 = vpop.f32.mrf.mxu0 }
 0x1de   : > { %v6404_v22 = vpop.f32.mrf.mxu1 }
 0x1df   : > { %8910 = vst [vmem:[#allocation21_spill] sm:$0xff] %v8177_v57  ;;  %v8183_v11 = vadd.f32 %v6404_v22, %v8022_v35  ;;  %v8185_v52 = vpop.f32.mrf.mxu0  ;;  %v2488_v35 = vadd.f32 %v8011_v18, %v2162_v2  ;;  %v2178_v2 = vadd.f32 %v7929_v51, %v7899_v12 }
 0x1e0   : > { %v2995_v42 = vpop.f32.mrf.mxu1 }
 0x1e1   : > { %8911 = vst [vmem:[#allocation22_spill] sm:$0xff] %v8183_v11  ;;  %v8187_v41 = vadd.f32 %v2995_v42, %v2778_v26  ;;  %v8189_v55 = vpop.f32.mrf.mxu0  ;;  %v6704_v26 = vld [vmem:[%s8878_s6 + $0x20] sm:$0xff]   ;;  %v2782_v19 = vadd.f32 %v8039_v36, %v2488_v35  ;;  %v2492_v35 = vadd.f32 %v8027_v25, %v2178_v2  ;;  %v2194_v25 = vadd.f32 %v7946_v27, %v7913_v5 }
 0x1e2   : > { %v6407_v32 = vpop.f32.mrf.mxu1  ;;  %6593 = vmatprep.subr.bf16.mxu1 %v6704_v26 }
 0x1e3   : > { %8912 = vst [vmem:[#allocation23_spill] sm:$0xff] %v8187_v41  ;;  %v8194_v63 = vadd.f32 %v6407_v32, %v8029_v10  ;;  %v8196_v53 = vpop.f32.mrf.mxu0  ;;  %6594 = vmatpush3.bf16.msra.mxu1 %v6704_v26  ;;  %v2786_v26 = vadd.f32 %v8065_v61, %v2492_v35 }
 0x1e4   : > { %v3008_v24 = vpop.f32.mrf.mxu1 }
 0x1e5   : > { %8913 = vst [vmem:[#allocation24_spill] sm:$0xff] %v8194_v63  ;;  %v8200_v9 = vadd.f32 %v3008_v24, %v8033_v15  ;;  %v8202_v46 = vpop.f32.mrf.mxu0 }
 0x1e6   : > { %8915 = vst [vmem:[#allocation26_spill] sm:$0xff] %v8202_v46  ;;  %v6408_v22 = vpop.f32.mrf.mxu1 }
 0x1e7   : > { %8914 = vst [vmem:[#allocation25_spill] sm:$0xff] %v8200_v9  ;;  %v8209_v10 = vadd.f32 %v6408_v22, %v8036_v38  ;;  %v8211_v30 = vpop.f32.mrf.mxu0 }
 0x1e8   : > { %8917 = vst [vmem:[#allocation28_spill] sm:$0xff] %v8211_v30  ;;  %v3011_v32 = vpop.f32.mrf.mxu1 }
 0x1e9   : > { %8916 = vst [vmem:[#allocation27_spill] sm:$0xff] %v8209_v10  ;;  %v8213_v18 = vadd.f32 %v3011_v32, %v2782_v19  ;;  %v8215_v15 = vpop.f32.mrf.mxu0 }
 0x1ea   : > { %8919 = vst [vmem:[#allocation30_spill] sm:$0xff] %v8215_v15  ;;  %v6411_v42 = vpop.f32.mrf.mxu1 }
 0x1eb   : > { %8918 = vst [vmem:[#allocation29_spill] sm:$0xff] %v8213_v18  ;;  %v8220_v24 = vadd.f32 %v6411_v42, %v8046_v0  ;;  %v8222_v36 = vpop.f32.mrf.mxu0 }
 0x1ec   : > { %8921 = vst [vmem:[#allocation32_spill] sm:$0xff] %v8222_v36  ;;  %v3024_v38 = vpop.f32.mrf.mxu1 }
 0x1ed   : > { %8920 = vst [vmem:[#allocation31_spill] sm:$0xff] %v8220_v24  ;;  %v8226_v22 = vadd.f32 %v3024_v38, %v8055_v58  ;;  %v8228_v19 = vpop.f32.mrf.mxu0 }
 0x1ee   : > { %8923 = vst [vmem:[#allocation34_spill] sm:$0xff] %v8228_v19  ;;  %v6412_v32 = vpop.f32.mrf.mxu1 }
 0x1ef   : > { %8922 = vst [vmem:[#allocation33_spill] sm:$0xff] %v8226_v22  ;;  %v8232_v18 = vadd.f32 %v6412_v32, %v8060_v31  ;;  %v8234_v12 = vpop.f32.mrf.mxu0  ;;  %v2496_v31 = vadd.f32 %v8041_v62, %v2194_v25 }
 0x1f0   : > { %8925 = vst [vmem:[#allocation36_spill] sm:$0xff] %v8234_v12  ;;  %v3027_v51 = vpop.f32.mrf.mxu1 }
 0x1f1   : > { %8924 = vst [vmem:[#allocation35_spill] sm:$0xff] %v8232_v18  ;;  %v8236_v0 = vadd.f32 %v3027_v51, %v2786_v26  ;;  %v8238_v42 = vpop.f32.mrf.mxu0  ;;  %v2790_v26 = vadd.f32 %v8084_v45, %v2496_v31 }
 0x1f2   : > { %8927 = vst [vmem:[#allocation38_spill] sm:$0xff] %v8238_v42  ;;  %v6415_v24 = vpop.f32.mrf.mxu1 }
 0x1f3   : > { %8926 = vst [vmem:[#allocation37_spill] sm:$0xff] %v8236_v0  ;;  %v8243_v58 = vadd.f32 %v6415_v24, %v8069_v54  ;;  %v8245_v2 = vpop.f32.mrf.mxu0 }
 0x1f4   : > { %8929 = vst [vmem:[#allocation40_spill] sm:$0xff] %v8245_v2  ;;  %v3040_v61 = vpop.f32.mrf.mxu1 }
 0x1f5   : > { %8928 = vst [vmem:[#allocation39_spill] sm:$0xff] %v8243_v58  ;;  %v8249_v38 = vadd.f32 %v3040_v61, %v8074_v34  ;;  %v8251_v35 = vpop.f32.mrf.mxu0 }
 0x1f6   : > { %8931 = vst [vmem:[#allocation42_spill] sm:$0xff] %v8251_v35  ;;  %v6416_v32 = vpop.f32.mrf.mxu1 }
 0x1f7   : > { %8930 = vst [vmem:[#allocation41_spill] sm:$0xff] %v8249_v38  ;;  %v8255_v51 = vadd.f32 %v6416_v32, %v8079_v48  ;;  %v8257_v5 = vpop.f32.mrf.mxu0  ;;  %v8280_v32 = vld [vmem:[%s8878_s6] sm:$0xff]  }
 0x1f8   : > { %8933 = vst [vmem:[#allocation44_spill] sm:$0xff] %v8257_v5  ;;  %v3043_v54 = vpop.f32.mrf.mxu1  ;;  %8940 = vst [vmem:[#allocation51_spill] sm:$0xff] %v8280_v32  ;;  %6563 = vmatprep.subr.bf16.mxu0 %v8280_v32 }
 0x1f9   : > { %8932 = vst [vmem:[#allocation43_spill] sm:$0xff] %v8255_v51  ;;  %v8259_v27 = vadd.f32 %v3043_v54, %v2790_v26  ;;  %v8261_v24 = vpop.f32.mrf.mxu0 }
 0x1fa   : > { %8935 = vst [vmem:[#allocation46_spill] sm:$0xff] %v8261_v24  ;;  %v6455_v58 = vpop.f32.mrf.mxu1 }
 0x1fb   : > { %8934 = vst [vmem:[#allocation45_spill] sm:$0xff] %v8259_v27  ;;  %v8263_v62 = vpop.f32.mrf.mxu0 }
 0x1fc   : > { %8936 = vst [vmem:[#allocation47_spill] sm:$0xff] %v8263_v62  ;;  %v8265_v34 = vpop.f32.mrf.mxu1 }
 0x1fd   : > { %v8267_v25 = vpop.f32.mrf.mxu0 }
 0x1fe   : > { %8937 = vst [vmem:[#allocation48_spill] sm:$0xff] %v8267_v25  ;;  %v8269_v61 = vpop.f32.mrf.mxu1 }
 0x1ff   : > { %v8271_v45 = vpop.f32.mrf.mxu0 }
 0x200   : > { %8938 = vst [vmem:[#allocation49_spill] sm:$0xff] %v8271_v45  ;;  %v8273_v48 = vpop.f32.mrf.mxu1 }
 0x201   : > { %v8275_v31 = vpop.f32.mrf.mxu0 }
 0x202   : > { %8939 = vst [vmem:[#allocation50_spill] sm:$0xff] %v8275_v31  ;;  %v8282_v26 = vpop.f32.mrf.mxu1 }
 0x203   : > { %v8284_v54 = vpop.f32.mrf.mxu0 }
 0x204   : > { %8941 = vst [vmem:[#allocation52_spill] sm:$0xff] %v8284_v54  ;;  %v8287_v27 = vpop.f32.mrf.mxu1  ;;  %v8304_v54 = vld [vmem:[%s8878_s6 + $0x30] sm:$0xff]  }
 0x205   : > { %v8289_v51 = vpop.f32.mrf.mxu0  ;;  %8944 = vst [vmem:[#allocation55_spill] sm:$0xff] %v8304_v54  ;;  %6613 = vmatprep.subr.bf16.mxu1 %v8304_v54 }
 0x206   : > { %8942 = vst [vmem:[#allocation53_spill] sm:$0xff] %v8289_v51  ;;  %v8291_v38 = vpop.f32.mrf.mxu1 }
 0x207   : > { %v8293_v45 = vpop.f32.mrf.mxu0 }
 0x208   : > { %8943 = vst [vmem:[#allocation54_spill] sm:$0xff] %v8293_v45  ;;  %v8295_v31 = vpop.f32.mrf.mxu1 }
 0x209   : > { %v6489_v0 = vpop.f32.mrf.mxu0 }
 0x20a   : > { %v8297_v25 = vpop.f32.mrf.mxu1 }
 0x20b   : > { %v3810_v18 = vpop.f32.mrf.mxu0 }
 0x20c   : > { %v8299_v62 = vpop.f32.mrf.mxu1 }
 0x20d   : > { %v6490_v22 = vpop.f32.mrf.mxu0 }
 0x20e   : > { %v8306_v24 = vpop.f32.mrf.mxu1 }
 0x20f   : > { %v3813_v51 = vpop.f32.mrf.mxu0 }
 0x210   : > { %v8309_v45 = vpop.f32.mrf.mxu1 }
 0x211   : > { %v8311_v32 = vpop.f32.mrf.mxu0 }
 0x212   : > { %v8313_v5 = vpop.f32.mrf.mxu1 }
 0x213   : > { %v8315_v35 = vpop.f32.mrf.mxu0 }
 0x214   : > { %v8317_v10 = vpop.f32.mrf.mxu1 }
 0x215   : > { %8945 = vst [vmem:[#allocation56_spill] sm:$0xff] %v8317_v10  ;;  %v8319_v2 = vpop.f32.mrf.mxu0 }
 0x216   : > { %v8321_v9 = vpop.f32.mrf.mxu1 }
 0x217   : > { %8946 = vst [vmem:[#allocation57_spill] sm:$0xff] %v8321_v9  ;;  %v8323_v42 = vpop.f32.mrf.mxu0 }
 0x218   : > { %v8325_v63 = vpop.f32.mrf.mxu1 }
 0x219   : > { %8947 = vst [vmem:[#allocation58_spill] sm:$0xff] %v8325_v63  ;;  %v8327_v54 = vpop.f32.mrf.mxu0 }
 0x21a   : > { %v8329_v12 = vpop.f32.mrf.mxu1 }
 0x21b   : > { %8948 = vst [vmem:[#allocation59_spill] sm:$0xff] %v8329_v12  ;;  %v8331_v41 = vpop.f32.mrf.mxu0 }
 0x21c   : > { %v8333_v19 = vpop.f32.mrf.mxu1 }
 0x21d   : > { %8949 = vst [vmem:[#allocation60_spill] sm:$0xff] %v8333_v19  ;;  %v8337_v36 = vpop.f32.mrf.mxu0 }
 0x21e   : > { %v8335_v11 = vpop.f32.mrf.mxu1 }
 0x21f   : > { %8950 = vst [vmem:[#allocation61_spill] sm:$0xff] %v8335_v11  ;;  %v8343_v9 = vpop.f32.mrf.mxu0 }
 0x220   : > { %v8339_v57 = vpop.f32.mrf.mxu1  ;;  %8953 = vst [vmem:[#allocation64_spill] sm:$0xff] %v8343_v9 }
 0x221   : > { %8951 = vst [vmem:[#allocation62_spill] sm:$0xff] %v8339_v57  ;;  %v8349_v10 = vpop.f32.mrf.mxu0 }
 0x222   : > { %v8341_v15 = vpop.f32.mrf.mxu1 }
 0x223   : > { %8952 = vst [vmem:[#allocation63_spill] sm:$0xff] %v8341_v15  ;;  %v8355_v19 = vpop.f32.mrf.mxu0 }
 0x224   : > { %v8345_v30 = vpop.f32.mrf.mxu1  ;;  %8958 = vst [vmem:[#allocation69_spill] sm:$0xff] %v8355_v19 }
 0x225   : > { %8954 = vst [vmem:[#allocation65_spill] sm:$0xff] %v8345_v30  ;;  %v8361_v57 = vpop.f32.mrf.mxu0 }
 0x226   : > { %v8347_v63 = vpop.f32.mrf.mxu1  ;;  %8961 = vst [vmem:[#allocation72_spill] sm:$0xff] %v8361_v57 }
 0x227   : > { %8955 = vst [vmem:[#allocation66_spill] sm:$0xff] %v8347_v63  ;;  %v8367_v30 = vpop.f32.mrf.mxu0 }
 0x228   : > { %v8351_v12 = vpop.f32.mrf.mxu1 }
 0x229   : > { %8956 = vst [vmem:[#allocation67_spill] sm:$0xff] %v8351_v12  ;;  %v3351_v12 = vadd.f32 %v8124_v13, %v8049_v49  ;;  %v8379_v19 = vpop.f32.mrf.mxu0 }
 0x22a   : > { %v8353_v46 = vpop.f32.mrf.mxu1 }
 0x22b   : > { %8957 = vst [vmem:[#allocation68_spill] sm:$0xff] %v8353_v46  ;;  %v3645_v57 = vadd.f32 %v6455_v58, %v3351_v12  ;;  %v8394_v12 = vpop.f32.mrf.mxu0 }
 0x22c   : > { %v8357_v11 = vpop.f32.mrf.mxu1 }
 0x22d   : > { %8959 = vst [vmem:[#allocation70_spill] sm:$0xff] %v8357_v11  ;;  %v2762_v11 = vadd.f32 %v7962_v33, %v7932_v40  ;;  %v3939_v13 = vadd.f32 %v6489_v0, %v3645_v57  ;;  %v8390_v40 = vld [vmem:[%s8876_s4] ss:$0 sm:$0xff]  ;;  %v8410_v0 = vpop.f32.mrf.mxu0 }
 0x22e   : > { %v8359_v56 = vpop.f32.mrf.mxu1 }
 0x22f   : > { %8960 = vst [vmem:[#allocation71_spill] sm:$0xff] %v8359_v56  ;;  %v3349_v56 = vadd.f32 %v8129_v43, %v8058_v21 }
 0x230   : > { %v8363_v15 = vpop.f32.mrf.mxu1 }
 0x231   : > { %8962 = vst [vmem:[#allocation73_spill] sm:$0xff] %v8363_v15  ;;  %v3643_v49 = vadd.f32 %v8265_v34, %v3349_v56 }
 0x232   : > { %v8365_v9 = vpop.f32.mrf.mxu1 }
 0x233   : > { %8963 = vst [vmem:[#allocation74_spill] sm:$0xff] %v8365_v9  ;;  %v3056_v9 = vadd.f32 %v8067_v44, %v2762_v11  ;;  %v3937_v43 = vadd.f32 %v3810_v18, %v3643_v49 }
 0x234   : > { %v8369_v63 = vpop.f32.mrf.mxu1 }
 0x235   : > { %8964 = vst [vmem:[#allocation75_spill] sm:$0xff] %v8369_v63  ;;  %v3352_v63 = vadd.f32 %v8134_v17, %v8063_v20  ;;  %v3350_v33 = vadd.f32 %v8141_v39, %v3056_v9  ;;  %v3355_v20 = vadd.f32 %v8145_v3, %v8072_v50  ;;  %v8401_v17 = vld [vmem:[%s8877_s5] ss:$0 sm:$0xff] }
 0x236   : > { %v8373_v46 = vpop.f32.mrf.mxu1 }
 0x237   : > { %8965 = vst [vmem:[#allocation76_spill] sm:$0xff] %v8373_v46  ;;  %v3646_v21 = vadd.f32 %v8269_v61, %v3352_v63  ;;  %v3644_v11 = vadd.f32 %v8273_v48, %v3350_v33  ;;  %v2766_v63 = vadd.f32 %v7978_v59, %v7949_v23  ;;  %v3649_v50 = vadd.f32 %v8282_v26, %v3355_v20 }
 0x238   : > { %v8381_v15 = vpop.f32.mrf.mxu1  ;;  %v3356_v48 = vadd.f32 %v8155_v6, %v8082_v7 }
 0x239   : > { %v3940_v57 = vadd.f32 %v6490_v22, %v3646_v21  ;;  %v3938_v18 = vadd.f32 %v3813_v51, %v3644_v11  ;;  %v3060_v61 = vadd.f32 %v8086_v28, %v2766_v63  ;;  %v3943_v59 = vadd.f32 %v8311_v32, %v3649_v50 }
 0x23a   : > { %v6523_v46 = vpop.f32.mrf.mxu1  ;;  %v3650_v33 = vadd.f32 %v8291_v38, %v3356_v48  ;;  %v3358_v48 = vadd.f32 %v8185_v52, %v8143_v4 }
 0x23b   : > { %v4233_v44 = vadd.f32 %v6523_v46, %v3939_v13  ;;  %v3353_v46 = vadd.f32 %v8150_v37, %v8077_v16  ;;  %v3354_v13 = vadd.f32 %v8162_v29, %v3060_v61 }
 0x23c   : > { %v4104_v56 = vpop.f32.mrf.mxu1  ;;  %v3944_v38 = vadd.f32 %v8319_v2, %v3650_v33  ;;  %v3652_v4 = vadd.f32 %v8309_v45, %v3358_v48 }
 0x23d   : > { %v4272_v39 = vmul.f32 %v8390_v40, %v4233_v44  ;;  %v4231_v9 = vadd.f32 %v4104_v56, %v3937_v43  ;;  %v3647_v23 = vadd.f32 %v8287_v27, %v3353_v46  ;;  %v8424_v43 = vpop.f32.mrf.mxu0  ;;  %v3359_v44 = vadd.f32 %v8166_v47, %v8127_v60 }
 0x23e   : > { %v6524_v3 = vpop.f32.mrf.mxu1  ;;  %v3648_v29 = vadd.f32 %v8295_v31, %v3354_v13 }
 0x23f   : > { %v4311_v58 = vadd.f32 %v8401_v17, %v4272_v39  ;;  %v4270_v34 = vmul.f32 %v8390_v40, %v4231_v9  ;;  %v4234_v22 = vadd.f32 %v6524_v3, %v3940_v57  ;;  %v3941_v28 = vadd.f32 %v8315_v35, %v3647_v23  ;;  %v8966_v39 = vld [vmem:[#allocation15_spill] sm:$0xff]  ;;  %v8440_v31 = vpop.f32.mrf.mxu0 }
 0x240   : > { %v4107_v16 = vpop.f32.mrf.mxu1  ;;  %v3357_v9 = vadd.f32 %v8173_v1, %v8966_v39  ;;  %v3653_v63 = vadd.f32 %v8297_v25, %v3359_v44  ;;  %v3942_v60 = vadd.f32 %v8323_v42, %v3648_v29 }
 0x241   : > { %v4343_v37 = vmax.f32 %v4311_v58, 0.0  ;;  %v4309_v51 = vadd.f32 %v8401_v17, %v4270_v34  ;;  %v4273_v26 = vmul.f32 %v8390_v40, %v4234_v22  ;;  %v4232_v49 = vadd.f32 %v4107_v16, %v3938_v18 }
 0x242   : > { %v6527_v21 = vpop.f32.mrf.mxu1  ;;  %v3360_v18 = vadd.f32 %v8179_v14, %v8139_v8  ;;  %v3651_v1 = vadd.f32 %v8299_v62, %v3357_v9  ;;  %v3947_v25 = vadd.f32 %v8327_v54, %v3653_v63  ;;  %v8456_v62 = vpop.f32.mrf.mxu0 }
 0x243   : > { %4376 = vst.msk [vmem:[#allocation3 + $0x31] sm:$0xff] %vm459_vm4, %v4343_v37  ;;  %v4341_v7 = vmax.f32 %v4309_v51, 0.0  ;;  %v4312_v6 = vadd.f32 %v8401_v17, %v4273_v26  ;;  %v4271_v27 = vmul.f32 %v8390_v40, %v4232_v49  ;;  %v4237_v32 = vadd.f32 %v6527_v21, %v3943_v59  ;;  %v8967_v51 = vld [vmem:[#allocation16_spill] sm:$0xff]  ;;  %v8968_v21 = vld [vmem:[#allocation17_spill] sm:$0xff] }
 0x244   : > { %v4120_v20 = vpop.f32.mrf.mxu1  ;;  %v3654_v23 = vadd.f32 %v8306_v24, %v3360_v18  ;;  %v3945_v8 = vadd.f32 %v8331_v41, %v3651_v1  ;;  %v3363_v26 = vadd.f32 %v8189_v55, %v8967_v51  ;;  %v8969_v55 = vld [vmem:[#allocation64_spill] sm:$0xff]  ;;  %v8975_v18 = vld [vmem:[#allocation57_spill] sm:$0xff] }
 0x245   : > { %4374 = vst.msk [vmem:[#allocation3 + $0x19] sm:$0xff] %vm459_vm4, %v4341_v7  ;;  %v4344_v35 = vmax.f32 %v4312_v6, 0.0  ;;  %v4310_v56 = vadd.f32 %v8401_v17, %v4271_v27  ;;  %v4276_v11 = vmul.f32 %v8390_v40, %v4237_v32  ;;  %v4235_v57 = vadd.f32 %v4120_v20, %v3941_v28  ;;  %v4428_v28 = vld [vmem:[#allocation3 + $0x1] ss:$2 sm:$0xff] }
 0x246   : > { %v6528_v47 = vpop.f32.mrf.mxu1  ;;  %v3948_v52 = vadd.f32 %v8337_v36, %v3654_v23  ;;  %v3361_v7 = vadd.f32 %v8196_v53, %v8968_v21  ;;  %v3657_v6 = vadd.f32 %v8313_v5, %v3363_v26  ;;  %v3946_v27 = vadd.f32 %v8969_v55, %v3652_v4  ;;  %v8472_v36 = vpop.f32.mrf.mxu0  ;;  %v8972_v53 = vld [vmem:[#allocation56_spill] sm:$0xff] }
 0x247   : > { %4377 = vst.msk [vmem:[#allocation3 + $0x39] sm:$0xff] %vm459_vm4, %v4344_v35  ;;  %v4342_v2 = vmax.f32 %v4310_v56, 0.0  ;;  %v4315_v46 = vadd.f32 %v8401_v17, %v4276_v11  ;;  %v4274_v50 = vmul.f32 %v8390_v40, %v4235_v57  ;;  %v4238_v3 = vadd.f32 %v6528_v47, %v3944_v38  ;;  %v8970_v35 = vld [vmem:[#allocation18_spill] sm:$0xff]  ;;  %v8977_v23 = vld [vmem:[#allocation20_spill] sm:$0xff] }
 0x248   : > { %v4123_v58 = vpop.f32.mrf.mxu1  ;;  %v8971_v56 = vld [vmem:[#allocation26_spill] sm:$0xff]  ;;  %v3655_v57 = vadd.f32 %v8972_v53, %v3361_v7  ;;  %v3951_v5 = vadd.f32 %v8349_v10, %v3657_v6 }
 0x249   : > { %4375 = vst.msk [vmem:[#allocation3 + $0x21] sm:$0xff] %vm459_vm4, %v4342_v2  ;;  %v4347_v42 = vmax.f32 %v4315_v46, 0.0  ;;  %v4313_v34 = vadd.f32 %v8401_v17, %v4274_v50  ;;  %v4277_v22 = vmul.f32 %v8390_v40, %v4238_v3  ;;  %v4236_v61 = vadd.f32 %v4123_v58, %v3942_v60  ;;  %v8973_v46 = vld [vmem:[#allocation19_spill] sm:$0xff]  ;;  %v8974_v50 = vld [vmem:[#allocation28_spill] sm:$0xff] }
 0x24a   : > { %v6531_v14 = vpop.f32.mrf.mxu1  ;;  %v3364_v11 = vadd.f32 %v8971_v56, %v8970_v35  ;;  %v3362_v3 = vadd.f32 %v8974_v50, %v8973_v46 }
 0x24b   : > { %4380 = vst.msk [vmem:[#allocation3 + $0x61] sm:$0xff] %vm459_vm4, %v4347_v42  ;;  %v4345_v54 = vmax.f32 %v4313_v34, 0.0  ;;  %v4316_v59 = vadd.f32 %v8401_v17, %v4277_v22  ;;  %v4275_v16 = vmul.f32 %v8390_v40, %v4236_v61  ;;  %v4241_v37 = vadd.f32 %v6531_v14, %v3947_v25  ;;  %v8976_v25 = vld [vmem:[#allocation69_spill] sm:$0xff]  ;;  %v8489_v42 = vpop.f32.mrf.mxu0 }
 0x24c   : > { %v4136_v24 = vpop.f32.mrf.mxu1  ;;  %v3658_v1 = vadd.f32 %v8975_v18, %v3364_v11  ;;  %v3949_v58 = vadd.f32 %v8976_v25, %v3655_v57 }
 0x24d   : > { %4378 = vst.msk [vmem:[#allocation3 + $0x49] sm:$0xff] %vm459_vm4, %v4345_v54  ;;  %v4348_v41 = vmax.f32 %v4316_v59, 0.0  ;;  %v4314_v49 = vadd.f32 %v8401_v17, %v4275_v16  ;;  %v4280_v13 = vmul.f32 %v8390_v40, %v4241_v37  ;;  %v4239_v33 = vadd.f32 %v4136_v24, %v3945_v8  ;;  %v8978_v8 = vld [vmem:[#allocation30_spill] sm:$0xff]  ;;  %v8980_v16 = vld [vmem:[#allocation72_spill] sm:$0xff]  ;;  %v8505_v6 = vpop.f32.mrf.mxu0 }
 0x24e   : > { %v6532_v45 = vpop.f32.mrf.mxu1  ;;  %v4430_v32 = vld [vmem:[#allocation3 + $0x31] ss:$2 sm:$0xff]  ;;  %v3367_v14 = vadd.f32 %v8978_v8, %v8977_v23  ;;  %v8979_v54 = vld [vmem:[#allocation58_spill] sm:$0xff]  ;;  %v3952_v37 = vadd.f32 %v8980_v16, %v3658_v1 }
 0x24f   : > { %4381 = vst.msk [vmem:[#allocation3 + $0x69] sm:$0xff] %vm459_vm4, %v4348_v41  ;;  %v4346_v44 = vmax.f32 %v4314_v49, 0.0  ;;  %v4319_v29 = vadd.f32 %v8401_v17, %v4280_v13  ;;  %v4278_v38 = vmul.f32 %v8390_v40, %v4239_v33  ;;  %v4242_v20 = vadd.f32 %v6532_v45, %v3948_v52  ;;  %v8981_v41 = vld [vmem:[#allocation21_spill] sm:$0xff]  ;;  %v8982_v49 = vld [vmem:[#allocation32_spill] sm:$0xff]  ;;  %v8983_v33 = vld [vmem:[#allocation59_spill] sm:$0xff]  ;;  %v8521_v18 = vpop.f32.mrf.mxu0 }
 0x250   : > { %v4139_v39 = vpop.f32.mrf.mxu1  ;;  %v4443_v9 = vpack.c.bf16 %v4430_v32, %v4428_v28  ;;  %v3656_v59 = vadd.f32 %v8979_v54, %v3362_v3  ;;  %v3365_v13 = vadd.f32 %v8982_v49, %v8981_v41  ;;  %v3661_v28 = vadd.f32 %v8983_v33, %v3367_v14 }
 0x251   : > { %4379 = vst.msk [vmem:[#allocation3 + $0x51] sm:$0xff] %vm459_vm4, %v4346_v44  ;;  %v4351_v63 = vmax.f32 %v4319_v29, 0.0  ;;  %v4317_v60 = vadd.f32 %v8401_v17, %v4278_v38  ;;  %v4281_v47 = vmul.f32 %v8390_v40, %v4242_v20  ;;  %v4240_v2 = vadd.f32 %v4139_v39, %v3946_v27  ;;  %v8984_v44 = vld [vmem:[#allocation22_spill] sm:$0xff]  ;;  %v8986_v20 = vld [vmem:[#allocation60_spill] sm:$0xff]  ;;  %v8538_v49 = vpop.f32.mrf.mxu0 }
 0x252   : > { %6555 = vmatprep.mubr.msk.bf16.mxu0 %vm459_vm4, %v4443_v9  ;;  %v6535_v10 = vpop.f32.mrf.mxu1  ;;  %v3950_v21 = vadd.f32 %v8367_v30, %v3656_v59  ;;  %v8985_v29 = vld [vmem:[#allocation34_spill] sm:$0xff]  ;;  %v3659_v35 = vadd.f32 %v8986_v20, %v3365_v13  ;;  %v3955_v56 = vadd.f32 %v8379_v19, %v3661_v28  ;;  %v4844_v9 = vld [vmem:[#allocation3 + $0x19] ss:$2 sm:$0xff] }
 0x253   : > { %4384 = vst.msk [vmem:[#allocation3 + $0x91] sm:$0xff] %vm459_vm4, %v4351_v63  ;;  %v4349_v34 = vmax.f32 %v4317_v60, 0.0  ;;  %v4320_v22 = vadd.f32 %v8401_v17, %v4281_v47  ;;  %v4279_v61 = vmul.f32 %v8390_v40, %v4240_v2  ;;  %v4245_v48 = vadd.f32 %v6535_v10, %v3951_v5  ;;  %v8987_v63 = vld [vmem:[#allocation23_spill] sm:$0xff]  ;;  %v8988_v60 = vld [vmem:[#allocation36_spill] sm:$0xff]  ;;  %v8989_v2 = vld [vmem:[#allocation61_spill] sm:$0xff] }
 0x254   : > { %v4152_v51 = vpop.f32.mrf.mxu1  ;;  %v3368_v38 = vadd.f32 %v8985_v29, %v8984_v44  ;;  %v3366_v47 = vadd.f32 %v8988_v60, %v8987_v63  ;;  %v3953_v50 = vadd.f32 %v8394_v12, %v3659_v35  ;;  %v8550_v20 = vld [vmem:[%s8878_s6 + $0x10] sm:$0xff]   ;;  %v8560_v60 = vpop.f32.mrf.mxu0 }
 0x255   : > { %4382 = vst.msk [vmem:[#allocation3 + $0x79] sm:$0xff] %vm459_vm4, %v4349_v34  ;;  %v4352_v26 = vmax.f32 %v4320_v22, 0.0  ;;  %v4318_v4 = vadd.f32 %v8401_v17, %v4279_v61  ;;  %v4284_v52 = vmul.f32 %v8390_v40, %v4245_v48  ;;  %v4243_v24 = vadd.f32 %v4152_v51, %v3949_v58  ;;  %v8990_v34 = vld [vmem:[#allocation24_spill] sm:$0xff]  ;;  %v8991_v22 = vld [vmem:[#allocation38_spill] sm:$0xff] }
 0x256   : > { %v6536_v7 = vpop.f32.mrf.mxu1  ;;  %v3662_v46 = vadd.f32 %v8989_v2, %v3368_v38  ;;  %v3371_v61 = vadd.f32 %v8991_v22, %v8990_v34  ;;  %v8992_v48 = vld [vmem:[#allocation62_spill] sm:$0xff]  ;;  %v8994_v51 = vld [vmem:[#allocation40_spill] sm:$0xff] }
 0x257   : > { %4385 = vst.msk [vmem:[#allocation3 + $0x99] sm:$0xff] %vm459_vm4, %v4352_v26  ;;  %v4350_v55 = vmax.f32 %v4318_v4, 0.0  ;;  %v4323_v27 = vadd.f32 %v8401_v17, %v4284_v52  ;;  %v4282_v45 = vmul.f32 %v8390_v40, %v4243_v24  ;;  %v4246_v32 = vadd.f32 %v6536_v7, %v3952_v37  ;;  %v8993_v37 = vld [vmem:[#allocation25_spill] sm:$0xff]  ;;  %v8995_v4 = vld [vmem:[#allocation63_spill] sm:$0xff] }
 0x258   : > { %v4155_v11 = vpop.f32.mrf.mxu1  ;;  %v4846_v30 = vld [vmem:[#allocation3 + $0x49] ss:$2 sm:$0xff]  ;;  %v3660_v23 = vadd.f32 %v8992_v48, %v3366_v47  ;;  %v3956_v8 = vadd.f32 %v8410_v0, %v3662_v46  ;;  %v3369_v26 = vadd.f32 %v8994_v51, %v8993_v37  ;;  %v3665_v52 = vadd.f32 %v8995_v4, %v3371_v61 }
 0x259   : > { %4383 = vst.msk [vmem:[#allocation3 + $0x81] sm:$0xff] %vm459_vm4, %v4350_v55  ;;  %v4355_v53 = vmax.f32 %v4323_v27, 0.0  ;;  %v4321_v57 = vadd.f32 %v8401_v17, %v4282_v45  ;;  %v4285_v5 = vmul.f32 %v8390_v40, %v4246_v32  ;;  %v4244_v39 = vadd.f32 %v4155_v11, %v3950_v21  ;;  %v4432_v7 = vld [vmem:[#allocation3 + $0x61] ss:$2 sm:$0xff]  ;;  %v8996_v55 = vld [vmem:[#allocation27_spill] sm:$0xff] }
 0x25a   : > { %v6539_v3 = vpop.f32.mrf.mxu1  ;;  %v4859_v19 = vpack.c.bf16 %v4846_v30, %v4844_v9  ;;  %v3954_v24 = vadd.f32 %v8424_v43, %v3660_v23  ;;  %v8997_v27 = vld [vmem:[#allocation42_spill] sm:$0xff]  ;;  %v8998_v32 = vld [vmem:[#allocation65_spill] sm:$0xff]  ;;  %v3959_v43 = vadd.f32 %v8440_v31, %v3665_v52 }
 0x25b   : > { %4388 = vst.msk [vmem:[#allocation3 + $0xc1] sm:$0xff] %vm459_vm4, %v4355_v53  ;;  %v4353_v1 = vmax.f32 %v4321_v57, 0.0  ;;  %v4324_v25 = vadd.f32 %v8401_v17, %v4285_v5  ;;  %v4283_v58 = vmul.f32 %v8390_v40, %v4244_v39  ;;  %v4249_v10 = vadd.f32 %v6539_v3, %v3955_v56  ;;  %v8999_v53 = vld [vmem:[#allocation29_spill] sm:$0xff]  ;;  %v9000_v57 = vld [vmem:[#allocation44_spill] sm:$0xff]  ;;  %v9001_v39 = vld [vmem:[#allocation66_spill] sm:$0xff] }
 0x25c   : > { %6595 = vmatprep.mubr.msk.bf16.mxu1 %vm459_vm4, %v4859_v19  ;;  %v4168_v12 = vpop.f32.mrf.mxu1  ;;  %v3372_v45 = vadd.f32 %v8997_v27, %v8996_v55  ;;  %v3663_v44 = vadd.f32 %v8998_v32, %v3369_v26  ;;  %v3370_v5 = vadd.f32 %v9000_v57, %v8999_v53  ;;  %v9002_v3 = vld [vmem:[#allocation51_spill] sm:$0xff] }
 0x25d   : > { %4386 = vst.msk [vmem:[#allocation3 + $0xa9] sm:$0xff] %vm459_vm4, %v4353_v1  ;;  %v4356_v14 = vmax.f32 %v4324_v25, 0.0  ;;  %v4322_v54 = vadd.f32 %v8401_v17, %v4283_v58  ;;  %v4288_v59 = vmul.f32 %v8390_v40, %v4249_v10  ;;  %v4247_v16 = vadd.f32 %v4168_v12, %v3953_v50  ;;  %v9003_v19 = vld [vmem:[#allocation31_spill] sm:$0xff]  ;;  %v9004_v1 = vld [vmem:[#allocation46_spill] sm:$0xff] }
 0x25e   : > { %v6540_v41 = vpop.f32.mrf.mxu1  ;;  %v4434_v0 = vld [vmem:[#allocation3 + $0x91] ss:$2 sm:$0xff]  ;;  %v3666_v31 = vadd.f32 %v9001_v39, %v3372_v45  ;;  %v3957_v9 = vadd.f32 %v8456_v62, %v3663_v44  ;;  %v3375_v25 = vadd.f32 %v9004_v1, %v9003_v19  ;;  %v9012_v44 = vld [vmem:[#allocation37_spill] sm:$0xff] }
 0x25f   : > { %4389 = vst.msk [vmem:[#allocation3 + $0xc9] sm:$0xff] %vm459_vm4, %v4356_v14  ;;  %v4354_v13 = vmax.f32 %v4322_v54, 0.0  ;;  %v4327_v33 = vadd.f32 %v8401_v17, %v4288_v59  ;;  %v4286_v28 = vmul.f32 %v8390_v40, %v4247_v16  ;;  %v4250_v21 = vadd.f32 %v6540_v41, %v3956_v8  ;;  %v9005_v58 = vld [vmem:[#allocation67_spill] sm:$0xff]  ;;  %v9006_v8 = vld [vmem:[#allocation33_spill] sm:$0xff]  ;;  %v9008_v54 = vld [vmem:[#allocation68_spill] sm:$0xff] }
 0x260   : > { %v4171_v29 = vpop.f32.mrf.mxu1  ;;  %v4444_v38 = vpack.c.bf16 %v4434_v0, %v4432_v7  ;;  %v3664_v62 = vadd.f32 %v9005_v58, %v3370_v5  ;;  %v3960_v10 = vadd.f32 %v8472_v36, %v3666_v31  ;;  %v9007_v12 = vld [vmem:[#allocation47_spill] sm:$0xff]  ;;  %v3669_v59 = vadd.f32 %v9008_v54, %v3375_v25  ;;  %v6517_v36 = vpop.f32.mrf.mxu0  ;;  %v9010_v41 = vld [vmem:[#allocation48_spill] sm:$0xff] }
 0x261   : > { %4387 = vst.msk [vmem:[#allocation3 + $0xb1] sm:$0xff] %vm459_vm4, %v4354_v13  ;;  %v4359_v35 = vmax.f32 %v4327_v33, 0.0  ;;  %v4325_v56 = vadd.f32 %v8401_v17, %v4286_v28  ;;  %v4289_v11 = vmul.f32 %v8390_v40, %v4250_v21  ;;  %v4248_v30 = vadd.f32 %v4171_v29, %v3954_v24  ;;  %v9009_v24 = vld [vmem:[#allocation35_spill] sm:$0xff]  ;;  %v9011_v13 = vld [vmem:[#allocation70_spill] sm:$0xff]  ;;  %v4848_v32 = vld [vmem:[#allocation3 + $0x79] ss:$2 sm:$0xff] }
 0x262   : > { %6556 = vmatmul.mubr.msk.bf16.vlgmr.msra.gmra.mxu0 %vm459_vm4, %v4444_v38  ;;  %v6543_v63 = vpop.f32.mrf.mxu1  ;;  %v3373_v14 = vadd.f32 %v9007_v12, %v9006_v8  ;;  %v3958_v16 = vadd.f32 %v8489_v42, %v3664_v62  ;;  %v3376_v0 = vadd.f32 %v9010_v41, %v9009_v24  ;;  %v3963_v28 = vadd.f32 %v8505_v6, %v3669_v59  ;;  %v9014_v38 = vld [vmem:[#allocation71_spill] sm:$0xff]  ;;  %v3922_v53 = vpop.f32.mrf.mxu0  ;;  %v9019_v62 = vld [vmem:[#allocation41_spill] sm:$0xff] }
 0x263   : > { %4392 = vst.msk [vmem:[#allocation3 + $0xf1] sm:$0xff] %vm459_vm4, %v4359_v35  ;;  %v4357_v47 = vmax.f32 %v4325_v56, 0.0  ;;  %v4328_v2 = vadd.f32 %v8401_v17, %v4289_v11  ;;  %v4287_v46 = vmul.f32 %v8390_v40, %v4248_v30  ;;  %v4253_v50 = vadd.f32 %v6543_v63, %v3959_v43  ;;  %6564 = vmatpush3.bf16.msra.mxu0 %v9002_v3  ;;  %v9013_v43 = vld [vmem:[#allocation49_spill] sm:$0xff]  ;;  %v8595_v30 = vld [vmem:[%s8878_s6 + $0x40] sm:$0xff]   ;;  %v9016_v63 = vld [vmem:[#allocation50_spill] sm:$0xff] }
 0x264   : > { %v4184_v34 = vpop.f32.mrf.mxu1  ;;  %6573 = vmatprep.subr.bf16.mxu0 %v8550_v20  ;;  %v3667_v33 = vadd.f32 %v9011_v13, %v3373_v14  ;;  %v3374_v29 = vadd.f32 %v9013_v43, %v9012_v44  ;;  %v3670_v35 = vadd.f32 %v9014_v38, %v3376_v0  ;;  %v9018_v58 = vld [vmem:[#allocation55_spill] sm:$0xff]  ;;  %v6518_v8 = vpop.f32.mrf.mxu0 }
 0x265   : > { %4390 = vst.msk [vmem:[#allocation3 + $0xd9] sm:$0xff] %vm459_vm4, %v4357_v47  ;;  %v4360_v22 = vmax.f32 %v4328_v2, 0.0  ;;  %v4326_v61 = vadd.f32 %v8401_v17, %v4287_v46  ;;  %v4292_v48 = vmul.f32 %v8390_v40, %v4253_v50  ;;  %v4251_v23 = vadd.f32 %v4184_v34, %v3957_v9  ;;  %v9015_v9 = vld [vmem:[#allocation39_spill] sm:$0xff] }
 0x266   : > { %v6544_v37 = vpop.f32.mrf.mxu1  ;;  %v3961_v56 = vadd.f32 %v8521_v18, %v3667_v33  ;;  %v3379_v47 = vadd.f32 %v9016_v63, %v9015_v9  ;;  %v9017_v18 = vld [vmem:[#allocation73_spill] sm:$0xff]  ;;  %v3964_v46 = vadd.f32 %v8538_v49, %v3670_v35 }
 0x267   : > { %4393 = vst.msk [vmem:[#allocation3 + $0xf9] sm:$0xff] %vm459_vm4, %v4360_v22  ;;  %v4358_v51 = vmax.f32 %v4326_v61, 0.0  ;;  %v4331_v26 = vadd.f32 %v8401_v17, %v4292_v48  ;;  %v4290_v4 = vmul.f32 %v8390_v40, %v4251_v23  ;;  %v4254_v52 = vadd.f32 %v6544_v37, %v3960_v10  ;;  %v9020_v10 = vld [vmem:[#allocation52_spill] sm:$0xff]  ;;  %v9021_v22 = vld [vmem:[#allocation74_spill] sm:$0xff]  ;;  %v9022_v37 = vld [vmem:[#allocation43_spill] sm:$0xff] }
 0x268   : > { %v4187_v21 = vpop.f32.mrf.mxu1  ;;  %v4850_v7 = vld [vmem:[#allocation3 + $0xa9] ss:$2 sm:$0xff]  ;;  %v3668_v2 = vadd.f32 %v9017_v18, %v3374_v29  ;;  %v3377_v34 = vadd.f32 %v9020_v10, %v9019_v62  ;;  %v3673_v61 = vadd.f32 %v9021_v22, %v3379_v47 }
 0x269   : > { %4391 = vst.msk [vmem:[#allocation3 + $0xe1] sm:$0xff] %vm459_vm4, %v4358_v51  ;;  %v4363_v42 = vmax.f32 %v4331_v26, 0.0  ;;  %v4329_v55 = vadd.f32 %v8401_v17, %v4290_v4  ;;  %v4293_v27 = vmul.f32 %v8390_v40, %v4254_v52  ;;  %v4252_v45 = vadd.f32 %v4187_v21, %v3958_v16  ;;  %v4436_v16 = vld [vmem:[#allocation3 + $0xc1] ss:$2 sm:$0xff]  ;;  %v9024_v4 = vld [vmem:[#allocation75_spill] sm:$0xff] }
 0x26a   : > { %v6547_v11 = vpop.f32.mrf.mxu1  ;;  %v4860_v6 = vpack.c.bf16 %v4850_v7, %v4848_v32  ;;  %v3962_v49 = vadd.f32 %v8560_v60, %v3668_v2  ;;  %v9023_v51 = vld [vmem:[#allocation53_spill] sm:$0xff]  ;;  %v3671_v52 = vadd.f32 %v9024_v4, %v3377_v34  ;;  %v3967_v60 = vadd.f32 %v6517_v36, %v3673_v61  ;;  %v9026_v7 = vld [vmem:[#allocation54_spill] sm:$0xff]  ;;  %v3925_v36 = vpop.f32.mrf.mxu0 }
 0x26b   : > { %4396 = vst.msk [vmem:[#allocation3 + $0x121] sm:$0xff] %vm459_vm4, %v4363_v42  ;;  %v4361_v57 = vmax.f32 %v4329_v55, 0.0  ;;  %v4332_v5 = vadd.f32 %v8401_v17, %v4293_v27  ;;  %v4291_v39 = vmul.f32 %v8390_v40, %v4252_v45  ;;  %v4257_v31 = vadd.f32 %v6547_v11, %v3963_v28  ;;  %v9025_v21 = vld [vmem:[#allocation45_spill] sm:$0xff]  ;;  %v9027_v55 = vld [vmem:[#allocation76_spill] sm:$0xff] }
 0x26c   : > { %6596 = vmatmul.mubr.msk.bf16.vlgmr.msra.gmra.mxu1 %vm459_vm4, %v4860_v6  ;;  %v4200_v50 = vpop.f32.mrf.mxu1  ;;  %v3380_v26 = vadd.f32 %v9023_v51, %v9022_v37  ;;  %v3378_v42 = vadd.f32 %v9026_v7, %v9025_v21  ;;  %v3965_v45 = vadd.f32 %v3922_v53, %v3671_v52  ;;  %v4406_v61 = vld [vmem:[#allocation3] ss:$2 sm:$0xff] }
 0x26d   : > { %4394 = vst.msk [vmem:[#allocation3 + $0x109] sm:$0xff] %vm459_vm4, %v4361_v57  ;;  %v4364_v3 = vmax.f32 %v4332_v5, 0.0  ;;  %v4330_v19 = vadd.f32 %v8401_v17, %v4291_v39  ;;  %v4296_v1 = vmul.f32 %v8390_v40, %v4257_v31  ;;  %v4255_v25 = vadd.f32 %v4200_v50, %v3961_v56  ;;  %6614 = vmatpush3.bf16.msra.mxu1 %v9018_v58  ;;  %v5074_v37 = vld [vmem:[#allocation3 + $0x60] ss:$2 sm:$0xff] }
 0x26e   : > { %v6548_v48 = vpop.f32.mrf.mxu1  ;;  %v4438_v23 = vld [vmem:[#allocation3 + $0xf1] ss:$2 sm:$0xff]  ;;  %6633 = vmatprep.subr.bf16.mxu1 %v8595_v30  ;;  %v3674_v27 = vadd.f32 %v9027_v55, %v3380_v26  ;;  %v3672_v35 = vadd.f32 %v8381_v15, %v3378_v42  ;;  %v6708_v51 = vld [vmem:[%s8878_s6 + $0x18] sm:$0xff]  }
 0x26f   : > { %4397 = vst.msk [vmem:[#allocation3 + $0x129] sm:$0xff] %vm459_vm4, %v4364_v3  ;;  %v4362_v12 = vmax.f32 %v4330_v19, 0.0  ;;  %v4335_v14 = vadd.f32 %v8401_v17, %v4296_v1  ;;  %v4294_v54 = vmul.f32 %v8390_v40, %v4255_v25  ;;  %v4258_v59 = vadd.f32 %v6548_v48, %v3964_v46  ;;  %v5078_v21 = vld [vmem:[#allocation3 + $0xc0] ss:$2 sm:$0xff] }
 0x270   : > { %v4203_v24 = vpop.f32.mrf.mxu1  ;;  %v4445_v41 = vpack.c.bf16 %v4438_v23, %v4436_v16  ;;  %v3968_v56 = vadd.f32 %v6518_v8, %v3674_v27  ;;  %v3966_v39 = vadd.f32 %v3925_v36, %v3672_v35  ;;  %v4852_v1 = vld [vmem:[#allocation3 + $0xd9] ss:$2 sm:$0xff]  ;;  %v5076_v27 = vld [vmem:[#allocation3 + $0x90] ss:$2 sm:$0xff] }
 0x271   : > { %4395 = vst.msk [vmem:[#allocation3 + $0x111] sm:$0xff] %vm459_vm4, %v4362_v12  ;;  %v4367_v0 = vmax.f32 %v4335_v14, 0.0  ;;  %v4333_v13 = vadd.f32 %v8401_v17, %v4294_v54  ;;  %v4297_v33 = vmul.f32 %v8390_v40, %v4258_v59  ;;  %v4256_v28 = vadd.f32 %v4203_v24, %v3962_v49  ;;  %v4408_v49 = vld [vmem:[#allocation3 + $0x30] ss:$2 sm:$0xff]  ;;  %v4410_v59 = vld [vmem:[#allocation3 + $0x60] ss:$2 sm:$0xff] }
 0x272   : > { %6559 = vmatprep.mubr.msk.bf16.mxu0 %vm459_vm4, %v4445_v41  ;;  %v6551_v32 = vpop.f32.mrf.mxu1  ;;  %v4421_v14 = vpack.c.bf16 %v4408_v49, %v4406_v61  ;;  %v4416_v54 = vld [vmem:[#allocation3 + $0xf0] ss:$2 sm:$0xff] }
 0x273   : > { %4400 = vst.msk [vmem:[#allocation3 + $0x151] sm:$0xff] %vm459_vm4, %v4367_v0  ;;  %v4365_v44 = vmax.f32 %v4333_v13, 0.0  ;;  %v4336_v43 = vadd.f32 %v8401_v17, %v4297_v33  ;;  %v4295_v29 = vmul.f32 %v8390_v40, %v4256_v28  ;;  %v4261_v38 = vadd.f32 %v6551_v32, %v3967_v60  ;;  %v5072_v24 = vld [vmem:[#allocation3 + $0x30] ss:$2 sm:$0xff] }
 0x274   : > { %v4216_v11 = vpop.f32.mrf.mxu1  ;;  %v5087_v41 = vpack.c.bf16 %v5074_v37, %v5072_v24  ;;  %v4617_v13 = vld [vmem:[#allocation3 + $0x2] ss:$2 sm:$0xff]  ;;  %v4619_v33 = vld [vmem:[#allocation3 + $0x32] ss:$2 sm:$0xff] }
 0x275   : > { %4398 = vst.msk [vmem:[#allocation3 + $0x139] sm:$0xff] %vm459_vm4, %v4365_v44  ;;  %v4368_v6 = vmax.f32 %v4336_v43, 0.0  ;;  %v4334_v53 = vadd.f32 %v8401_v17, %v4295_v29  ;;  %v4300_v57 = vmul.f32 %v8390_v40, %v4261_v38  ;;  %v4259_v5 = vadd.f32 %v4216_v11, %v3965_v45  ;;  %v5080_v45 = vld [vmem:[#allocation3 + $0xf0] ss:$2 sm:$0xff] }
 0x276   : > { %v6552_v31 = vpop.f32.mrf.mxu1  ;;  %v4440_v48 = vld [vmem:[#allocation3 + $0x121] ss:$2 sm:$0xff]  ;;  %v4418_v28 = vld [vmem:[#allocation3 + $0x120] ss:$2 sm:$0xff]  ;;  %v4632_v55 = vpack.c.bf16 %v4619_v33, %v4617_v13  ;;  %v6710_v11 = vld [vmem:[%s8878_s6 + $0x28] sm:$0xff]  }
 0x277   : > { %4401 = vst.msk [vmem:[#allocation3 + $0x159] sm:$0xff] %vm459_vm4, %v4368_v6  ;;  %v4366_v9 = vmax.f32 %v4334_v53, 0.0  ;;  %v4339_v63 = vadd.f32 %v8401_v17, %v4300_v57  ;;  %v4298_v47 = vmul.f32 %v8390_v40, %v4259_v5  ;;  %v4262_v15 = vadd.f32 %v6552_v31, %v3968_v56  ;;  %v5082_v42 = vld [vmem:[#allocation3 + $0x120] ss:$2 sm:$0xff]  ;;  %v5192_v13 = vld [vmem:[#allocation3 + $0xc1] ss:$2 sm:$0xff] }
 0x278   : > { %v4219_v18 = vpop.f32.mrf.mxu1  ;;  %v4854_v2 = vld [vmem:[#allocation3 + $0x109] ss:$2 sm:$0xff]  ;;  %v5089_v32 = vpack.c.bf16 %v5082_v42, %v5080_v45  ;;  %v4623_v36 = vld [vmem:[#allocation3 + $0x92] ss:$2 sm:$0xff]  ;;  %v4621_v43 = vld [vmem:[#allocation3 + $0x62] ss:$2 sm:$0xff] }
 0x279   : > { %4399 = vst.msk [vmem:[#allocation3 + $0x141] sm:$0xff] %vm459_vm4, %v4366_v9  ;;  %v4371_v46 = vmax.f32 %v4339_v63, 0.0  ;;  %v4337_v50 = vadd.f32 %v8401_v17, %v4298_v47  ;;  %v4301_v3 = vmul.f32 %v8390_v40, %v4262_v15  ;;  %v4260_v19 = vadd.f32 %v4219_v18, %v3966_v39  ;;  %v4627_v44 = vld [vmem:[#allocation3 + $0xf2] ss:$2 sm:$0xff]  ;;  %v4625_v35 = vld [vmem:[#allocation3 + $0xc2] ss:$2 sm:$0xff] }
 0x27a   : > { %v4861_v25 = vpack.c.bf16 %v4854_v2, %v4852_v1  ;;  %v4633_v38 = vpack.c.bf16 %v4623_v36, %v4621_v43  ;;  %v5302_v56 = vld [vmem:[#allocation3 + $0x62] ss:$2 sm:$0xff]  ;;  %v4634_v6 = vpack.c.bf16 %v4627_v44, %v4625_v35  ;;  %v5300_v5 = vld [vmem:[#allocation3 + $0x32] ss:$2 sm:$0xff]  ;;  %v5196_v33 = vld [vmem:[#allocation3 + $0x121] ss:$2 sm:$0xff] }
 0x27b   : > { %4404 = vst.msk [vmem:[#allocation3 + $0x181] sm:$0xff] %vm459_vm4, %v4371_v46  ;;  %v4369_v58 = vmax.f32 %v4337_v50, 0.0  ;;  %v4340_v62 = vadd.f32 %v8401_v17, %v4301_v3  ;;  %v4299_v10 = vmul.f32 %v8390_v40, %v4260_v19  ;;  %v4412_v40 = vld [vmem:[#allocation3 + $0x90] ss:$2 sm:$0xff] }
 0x27c   : > { %6599 = vmatprep.mubr.msk.bf16.mxu1 %vm459_vm4, %v4861_v25  ;;  %v4422_v16 = vpack.c.bf16 %v4412_v40, %v4410_v59  ;;  %v4732_v31 = vld [vmem:[#allocation3 + $0x48] ss:$2 sm:$0xff]  ;;  %v4730_v15 = vld [vmem:[#allocation3 + $0x18] ss:$2 sm:$0xff] }
 0x27d   : > { %4402 = vst.msk [vmem:[#allocation3 + $0x169] sm:$0xff] %vm459_vm4, %v4369_v58  ;;  %v4372_v34 = vmax.f32 %v4340_v62, 0.0  ;;  %v4338_v22 = vadd.f32 %v8401_v17, %v4299_v10  ;;  %v4414_v17 = vld [vmem:[#allocation3 + $0xc0] ss:$2 sm:$0xff]  ;;  %v4745_v2 = vpack.c.bf16 %v4732_v31, %v4730_v15 }
 0x27e   : > { %v4442_v23 = vld [vmem:[#allocation3 + $0x151] ss:$2 sm:$0xff]  ;;  %v4423_v26 = vpack.c.bf16 %v4416_v54, %v4414_v17  ;;  %v4420_v0 = vld [vmem:[#allocation3 + $0x150] ss:$2 sm:$0xff] }
 0x27f   : > { %4405 = vst.msk [vmem:[#allocation3 + $0x189] sm:$0xff] %vm459_vm4, %v4372_v34  ;;  %v4370_v8 = vmax.f32 %v4338_v22, 0.0  ;;  %v4446_v12 = vpack.c.bf16 %v4442_v23, %v4440_v48  ;;  %v4424_v7 = vpack.c.bf16 %v4420_v0, %v4418_v28  ;;  %v5084_v53 = vld [vmem:[#allocation3 + $0x150] ss:$2 sm:$0xff]  ;;  %v6711_v22 = vld [vmem:[%s8878_s6 + $0x38] sm:$0xff]  }
 0x280   : > { %v4856_v4 = vld [vmem:[#allocation3 + $0x139] ss:$2 sm:$0xff]  ;;  %v4631_v39 = vld [vmem:[#allocation3 + $0x152] ss:$2 sm:$0xff]  ;;  %v4629_v9 = vld [vmem:[#allocation3 + $0x122] ss:$2 sm:$0xff] }
 0x281   : > { %4403 = vst.msk [vmem:[#allocation3 + $0x171] sm:$0xff] %vm459_vm4, %v4370_v8  ;;  %6560 = vmatmul.mubr.msk.bf16.gmra.mxu0 %vm459_vm4, %v4446_v12  ;;  %v5306_v63 = vld [vmem:[#allocation3 + $0xc2] ss:$2 sm:$0xff]  ;;  %v4635_v47 = vpack.c.bf16 %v4631_v39, %v4629_v9  ;;  %v5304_v46 = vld [vmem:[#allocation3 + $0x92] ss:$2 sm:$0xff] }
 0x282   : > { %6565 = vmatprep.mubr.msk.bf16.mxu0 %vm459_vm4, %v4421_v14  ;;  %v5310_v18 = vld [vmem:[#allocation3 + $0x122] ss:$2 sm:$0xff]  ;;  %v5316_v50 = vpack.c.bf16 %v5306_v63, %v5304_v46  ;;  %v5308_v3 = vld [vmem:[#allocation3 + $0xf2] ss:$2 sm:$0xff]  ;;  %v5190_v28 = vld [vmem:[#allocation3 + $0x91] ss:$2 sm:$0xff] }
 0x283   : > { %v5317_v19 = vpack.c.bf16 %v5310_v18, %v5308_v3  ;;  %v4736_v1 = vld [vmem:[#allocation3 + $0xa8] ss:$2 sm:$0xff]  ;;  %v4734_v58 = vld [vmem:[#allocation3 + $0x78] ss:$2 sm:$0xff] }
 0x284   : > { %v4740_v25 = vld [vmem:[#allocation3 + $0x108] ss:$2 sm:$0xff]  ;;  %v4746_v10 = vpack.c.bf16 %v4736_v1, %v4734_v58  ;;  %v4738_v34 = vld [vmem:[#allocation3 + $0xd8] ss:$2 sm:$0xff] }
 0x285   : > { %v4747_v61 = vpack.c.bf16 %v4740_v25, %v4738_v34  ;;  %v5312_v49 = vld [vmem:[#allocation3 + $0x152] ss:$2 sm:$0xff] }
 0x286   : > { %v5086_v29 = vld [vmem:[#allocation3 + $0x180] ss:$2 sm:$0xff] }
 0x287   : > { %v5090_v57 = vpack.c.bf16 %v5086_v29, %v5084_v53  ;;  %v5314_v62 = vld [vmem:[#allocation3 + $0x182] ss:$2 sm:$0xff] }
 0x288   : > { %v4858_v52 = vld [vmem:[#allocation3 + $0x169] ss:$2 sm:$0xff]  ;;  %v5318_v48 = vpack.c.bf16 %v5314_v62, %v5312_v49  ;;  %v4744_v23 = vld [vmem:[#allocation3 + $0x168] ss:$2 sm:$0xff]  ;;  %v4742_v12 = vld [vmem:[#allocation3 + $0x138] ss:$2 sm:$0xff] }
 0x289   : > { %6566 = vmatmul.mubr.msk.bf16.vlgmr.msra.gmra.mxu0 %vm459_vm4, %v4422_v16  ;;  %v4862_v60 = vpack.c.bf16 %v4858_v52, %v4856_v4  ;;  %v4960_v8 = vld [vmem:[#allocation3 + $0x4a] ss:$2 sm:$0xff]  ;;  %v4748_v14 = vpack.c.bf16 %v4744_v23, %v4742_v12  ;;  %v4958_v40 = vld [vmem:[#allocation3 + $0x1a] ss:$2 sm:$0xff]  ;;  %v5188_v52 = vld [vmem:[#allocation3 + $0x61] ss:$2 sm:$0xff] }
 0x28a   : > { %6574 = vmatpush3.bf16.msra.mxu0 %v8550_v20  ;;  %6569 = vmatprep.mubr.msk.bf16.mxu0 %vm459_vm4, %v4423_v26  ;;  %v5088_v20 = vpack.c.bf16 %v5078_v21, %v5076_v27  ;;  %v4973_v54 = vpack.c.bf16 %v4960_v8, %v4958_v40  ;;  %v4964_v59 = vld [vmem:[#allocation3 + $0xaa] ss:$2 sm:$0xff]  ;;  %v4962_v17 = vld [vmem:[#allocation3 + $0x7a] ss:$2 sm:$0xff]  ;;  %v5202_v21 = vpack.c.bf16 %v5192_v13, %v5190_v28  ;;  %v5198_v27 = vld [vmem:[#allocation3 + $0x151] ss:$2 sm:$0xff] }
 0x28b   : > { %6600 = vmatmul.mubr.msk.bf16.gmra.mxu1 %vm459_vm4, %v4862_v60  ;;  %6583 = vmatprep.subr.bf16.mxu0 %v6708_v51  ;;  %v4968_v16 = vld [vmem:[#allocation3 + $0x10a] ss:$2 sm:$0xff]  ;;  %v4974_v37 = vpack.c.bf16 %v4964_v59, %v4962_v17  ;;  %v4970_v60 = vld [vmem:[#allocation3 + $0x13a] ss:$2 sm:$0xff] }
 0x28c   : > { %6615 = vmatprep.mubr.msk.bf16.mxu1 %vm459_vm4, %v5087_v41  ;;  %v4972_v4 = vld [vmem:[#allocation3 + $0x16a] ss:$2 sm:$0xff]  ;;  %v5186_v41 = vld [vmem:[#allocation3 + $0x31] ss:$2 sm:$0xff] }
 0x28d   : > { %v4976_v24 = vpack.c.bf16 %v4972_v4, %v4970_v60  ;;  %v5201_v0 = vpack.c.bf16 %v5188_v52, %v5186_v41 }
 0x291   : > { %6570 = vmatmul.mubr.msk.bf16.gmra.mxu0 %vm459_vm4, %v4424_v7  ;;  %v5194_v7 = vld [vmem:[#allocation3 + $0xf1] ss:$2 sm:$0xff] }
 0x292   : > { %6575 = vmatprep.mubr.msk.bf16.mxu0 %vm459_vm4, %v4632_v55  ;;  %v5203_v42 = vpack.c.bf16 %v5196_v33, %v5194_v7  ;;  %v5200_v55 = vld [vmem:[#allocation3 + $0x181] ss:$2 sm:$0xff] }
 0x293   : > { %6616 = vmatmul.mubr.msk.bf16.vlgmr.msra.gmra.mxu1 %vm459_vm4, %v5088_v20  ;;  %v5204_v20 = vpack.c.bf16 %v5200_v55, %v5198_v27 }
 0x294   : > { %6619 = vmatprep.mubr.msk.bf16.mxu1 %vm459_vm4, %v5089_v32  ;;  %6634 = vmatpush3.bf16.msra.mxu1 %v8595_v30  ;;  %v5315_v30 = vpack.c.bf16 %v5302_v56, %v5300_v5 }
 0x299   : > { %6576 = vmatmul.mubr.msk.bf16.vlgmr.msra.gmra.mxu0 %vm459_vm4, %v4633_v38 }
 0x29a   : > { %6584 = vmatpush3.bf16.msra.mxu0 %v6708_v51  ;;  %6579 = vmatprep.mubr.msk.bf16.mxu0 %vm459_vm4, %v4634_v6  ;;  %v4966_v51 = vld [vmem:[#allocation3 + $0xda] ss:$2 sm:$0xff] }
 0x29b   : > { %6620 = vmatmul.mubr.msk.bf16.gmra.mxu1 %vm459_vm4, %v5090_v57  ;;  %6603 = vmatprep.subr.bf16.mxu0 %v6710_v11  ;;  %v4975_v26 = vpack.c.bf16 %v4968_v16, %v4966_v51 }
 0x29c   : > { %6635 = vmatprep.mubr.msk.bf16.mxu1 %vm459_vm4, %v5315_v30 }
 0x2a1   : > { %6580 = vmatmul.mubr.msk.bf16.gmra.mxu0 %vm459_vm4, %v4635_v47 }
 0x2a2   : > { %6585 = vmatprep.mubr.msk.bf16.mxu0 %vm459_vm4, %v4745_v2 }
 0x2a3   : > { %6636 = vmatmul.mubr.msk.bf16.vlgmr.msra.gmra.mxu1 %vm459_vm4, %v5316_v50 }
 0x2a4   : > { %6639 = vmatprep.mubr.msk.bf16.mxu1 %vm459_vm4, %v5317_v19 }
 0x2a9   : > { %6586 = vmatmul.mubr.msk.bf16.vlgmr.msra.gmra.mxu0 %vm459_vm4, %v4746_v10 }
 0x2aa   : > { %6604 = vmatpush3.bf16.msra.mxu0 %v6710_v11  ;;  %6589 = vmatprep.mubr.msk.bf16.mxu0 %vm459_vm4, %v4747_v61 }
 0x2ab   : > { %6640 = vmatmul.mubr.msk.bf16.gmra.mxu1 %vm459_vm4, %v5318_v48  ;;  %6623 = vmatprep.subr.bf16.mxu0 %v6711_v22 }
 0x2b1   : > { %6590 = vmatmul.mubr.msk.bf16.gmra.mxu0 %vm459_vm4, %v4748_v14 }
 0x2b2   : > { %6605 = vmatprep.mubr.msk.bf16.mxu0 %vm459_vm4, %v4973_v54 }
 0x2b9   : > { %6606 = vmatmul.mubr.msk.bf16.vlgmr.msra.gmra.mxu0 %vm459_vm4, %v4974_v37 }
 0x2ba   : > { %6624 = vmatpush3.bf16.msra.mxu0 %v6711_v22  ;;  %6609 = vmatprep.mubr.msk.bf16.mxu0 %vm459_vm4, %v4975_v26 }
 0x2c1   : > { %6610 = vmatmul.mubr.msk.bf16.gmra.mxu0 %vm459_vm4, %v4976_v24 }
 0x2c2   : > { %6625 = vmatprep.mubr.msk.bf16.mxu0 %vm459_vm4, %v5201_v0 }
 0x2c9   : > { %6626 = vmatmul.mubr.msk.bf16.vlgmr.msra.gmra.mxu0 %vm459_vm4, %v5202_v21 }
 0x2ca   : > { %6629 = vmatprep.mubr.msk.bf16.mxu0 %vm459_vm4, %v5203_v42 }
 0x2d1   : > { %6630 = vmatmul.mubr.msk.bf16.gmra.mxu0 %vm459_vm4, %v5204_v20 }
 0x322   : > { %v6557_v45 = vpop.f32.mrf.mxu0 }
 0x324   : > { %v4502_v32 = vpop.f32.mrf.mxu0 }
 0x326   : > { %v6558_v36 = vpop.f32.mrf.mxu0 }
 0x328   : > { %v4505_v44 = vpop.f32.mrf.mxu0 }
 0x32c   : > { %v6597_v43 = vpop.f32.mrf.mxu1 }
 0x32e   : > { %v8689_v38 = vpop.f32.mrf.mxu1 }
 0x330   : > { %v8695_v11 = vpop.f32.mrf.mxu1 }
 0x332   : > { %v8699_v57 = vpop.f32.mrf.mxu1 }
 0x341   : > { %v6561_v29 = vpop.f32.mrf.mxu0 }
 0x343   : > { %v8691_v35 = vpop.f32.mrf.mxu0 }
 0x345   : > { %v8693_v56 = vpop.f32.mrf.mxu0 }
 0x347   : > { %v8697_v6 = vpop.f32.mrf.mxu0 }
 0x349   : > { %v6567_v53 = vpop.f32.mrf.mxu0 }
 0x34a   : > { %v4594_v4 = vadd.f32 %v6567_v53, %v6557_v45 }
 0x34b   : > { %v4585_v5 = vpop.f32.mrf.mxu0  ;;  %v8701_v30 = vpop.f32.mrf.mxu1 }
 0x34c   : > { %v4586_v60 = vadd.f32 %v4585_v5, %v4502_v32 }
 0x34d   : > { %v6568_v39 = vpop.f32.mrf.mxu0  ;;  %v8703_v9 = vpop.f32.mrf.mxu1 }
 0x34e   : > { %v4597_v13 = vadd.f32 %v6568_v39, %v6558_v36 }
 0x34f   : > { %v4588_v31 = vpop.f32.mrf.mxu0  ;;  %v8705_v15 = vpop.f32.mrf.mxu1 }
 0x350   : > { %v4589_v7 = vadd.f32 %v4588_v31, %v4505_v44 }
 0x351   : > { %v6571_v63 = vpop.f32.mrf.mxu0  ;;  %v8707_v46 = vpop.f32.mrf.mxu1 }
 0x352   : > { %9028 = vst [vmem:[#allocation15_spill] sm:$0xff] %v8707_v46 }
 0x353   : > { %v4601_v47 = vpop.f32.mrf.mxu0  ;;  %v6617_v19 = vpop.f32.mrf.mxu1 }
 0x354   : > { %v4602_v5 = vadd.f32 %v4601_v47, %v8691_v35 }
 0x355   : > { %v6572_v18 = vpop.f32.mrf.mxu0  ;;  %v8709_v58 = vpop.f32.mrf.mxu1 }
 0x356   : > { %v4613_v36 = vadd.f32 %v6572_v18, %v8693_v56 }
 0x357   : > { %v4604_v2 = vpop.f32.mrf.mxu0  ;;  %v8711_v34 = vpop.f32.mrf.mxu1 }
 0x359   : > { %v6577_v50 = vpop.f32.mrf.mxu0  ;;  %v8713_v49 = vpop.f32.mrf.mxu1 }
 0x35a   : > { %v4724_v24 = vadd.f32 %v6577_v50, %v4594_v4 }
 0x35b   : > { %v4691_v3 = vpop.f32.mrf.mxu0  ;;  %v8715_v8 = vpop.f32.mrf.mxu1 }
 0x35c   : > { %9029 = vst [vmem:[#allocation16_spill] sm:$0xff] %v8715_v8  ;;  %v4722_v33 = vadd.f32 %v4691_v3, %v4586_v60 }
 0x35d   : > { %v6578_v1 = vpop.f32.mrf.mxu0  ;;  %v8717_v40 = vpop.f32.mrf.mxu1 }
 0x35e   : > { %9030 = vst [vmem:[#allocation17_spill] sm:$0xff] %v8717_v40  ;;  %v4725_v42 = vadd.f32 %v6578_v1, %v4597_v13  ;;  %v4605_v1 = vadd.f32 %v4604_v2, %v8697_v6 }
 0x35f   : > { %v4694_v25 = vpop.f32.mrf.mxu0  ;;  %v8719_v16 = vpop.f32.mrf.mxu1 }
 0x360   : > { %9031 = vst [vmem:[#allocation64_spill] sm:$0xff] %v8719_v16  ;;  %v4723_v16 = vadd.f32 %v4694_v25, %v4589_v7 }
 0x361   : > { %v6581_v62 = vpop.f32.mrf.mxu0  ;;  %v8721_v51 = vpop.f32.mrf.mxu1 }
 0x362   : > { %9032 = vst [vmem:[#allocation18_spill] sm:$0xff] %v8721_v51  ;;  %v4610_v51 = vadd.f32 %v6571_v63, %v6561_v29 }
 0x363   : > { %v4707_v10 = vpop.f32.mrf.mxu0  ;;  %v6637_v41 = vpop.f32.mrf.mxu1 }
 0x364   : > { %v4728_v39 = vadd.f32 %v6581_v62, %v4610_v51  ;;  %v4726_v25 = vadd.f32 %v4707_v10, %v4602_v5  ;;  %v9033_v10 = vld [vmem:[#allocation7_spill] sm:$0xff] }
 0x365   : > { %v6582_v22 = vpop.f32.mrf.mxu0  ;;  %v5374_v27 = vpop.f32.mrf.mxu1 }
 0x367   : > { %v4710_v61 = vpop.f32.mrf.mxu0  ;;  %v6638_v50 = vpop.f32.mrf.mxu1 }
 0x368   : > { %v4727_v18 = vadd.f32 %v4710_v61, %v4605_v1  ;;  %v8746_v61 = vld [vmem:[%s8883_s11] ss:$0 sm:$0xff]  ;;  %v9039_v1 = vld [vmem:[#allocation17_spill] sm:$0xff] }
 0x369   : > { %v6587_v48 = vpop.f32.mrf.mxu0  ;;  %v5377_v62 = vpop.f32.mrf.mxu1 }
 0x36a   : > { %v4837_v28 = vadd.f32 %v6587_v48, %v4724_v24 }
 0x36b   : > { %v4804_v23 = vpop.f32.mrf.mxu0 }
 0x36c   : > { %v4835_v55 = vadd.f32 %v4804_v23, %v4722_v33  ;;  %v4951_v8 = vadd.f32 %v6597_v43, %v4837_v28  ;;  %v4729_v43 = vadd.f32 %v6582_v22, %v4613_v36 }
 0x36d   : > { %v6588_v12 = vpop.f32.mrf.mxu0 }
 0x36e   : > { %v4838_v40 = vadd.f32 %v6588_v12, %v4725_v42  ;;  %v4949_v32 = vadd.f32 %v8689_v38, %v4835_v55  ;;  %v8731_v38 = vld [vmem:[%s8882_s10] ss:$0 sm:$0xff] }
 0x36f   : > { %v4807_v14 = vpop.f32.mrf.mxu0  ;;  %v1551_v22 = vmul.f32 %v8731_v38, %v9033_v10 }
 0x370   : > { %v4836_v45 = vadd.f32 %v4807_v14, %v4723_v16  ;;  %v4952_v3 = vadd.f32 %v8695_v11, %v4838_v40 }
 0x371   : > { %v6591_v54 = vpop.f32.mrf.mxu0 }
 0x372   : > { %v4841_v29 = vadd.f32 %v6591_v54, %v4728_v39  ;;  %v4950_v56 = vadd.f32 %v8699_v57, %v4836_v45  ;;  %v8741_v57 = vld [vmem:[%s8879_s7] ss:$0 sm:$0xff] }
 0x373   : > { %v4820_v59 = vpop.f32.mrf.mxu0 }
 0x374   : > { %v4839_v48 = vadd.f32 %v4820_v59, %v4726_v25  ;;  %v4955_v14 = vadd.f32 %v8701_v30, %v4841_v29  ;;  %v9034_v59 = vld [vmem:[#allocation8_spill] sm:$0xff] }
 0x375   : > { %v6592_v17 = vpop.f32.mrf.mxu0  ;;  %v1549_v16 = vmul.f32 %v8731_v38, %v9034_v59  ;;  %v9040_v29 = vld [vmem:[#allocation64_spill] sm:$0xff] }
 0x376   : > { %v4842_v23 = vadd.f32 %v6592_v17, %v4729_v43  ;;  %v6641_v17 = vpop.f32.mrf.mxu1 }
 0x377   : > { %v4823_v37 = vpop.f32.mrf.mxu0  ;;  %v1564_v55 = vadd.f32 %v8746_v61, %v1549_v16 }
 0x378   : > { %v4840_v12 = vadd.f32 %v4823_v37, %v4727_v18  ;;  %v4953_v37 = vadd.f32 %v8703_v9, %v4839_v48  ;;  %v4956_v51 = vadd.f32 %v8705_v15, %v4842_v23  ;;  %v9035_v9 = vld [vmem:[#allocation15_spill] sm:$0xff] }
 0x379   : > { %v6607_v26 = vpop.f32.mrf.mxu0 }
 0x37a   : > { %v5065_v53 = vadd.f32 %v6607_v26, %v4951_v8  ;;  %v8757_v26 = vld [vmem:[%s8880_s8] ss:$0 sm:$0xff]  ;;  %v4954_v33 = vadd.f32 %v9035_v9, %v4840_v12 }
 0x37b   : > { %v5032_v52 = vpop.f32.mrf.mxu0 }
 0x37c   : > { %v5063_v31 = vadd.f32 %v5032_v52, %v4949_v32  ;;  %v5179_v47 = vadd.f32 %v6617_v19, %v5065_v53 }
 0x37d   : > { %v6608_v0 = vpop.f32.mrf.mxu0 }
 0x37e   : > { %v5066_v35 = vadd.f32 %v6608_v0, %v4952_v3  ;;  %v5177_v2 = vadd.f32 %v8709_v58, %v5063_v31  ;;  %v9038_v31 = vld [vmem:[#allocation10_spill] sm:$0xff] }
 0x37f   : > { %v5035_v21 = vpop.f32.mrf.mxu0 }
 0x380   : > { %v5064_v8 = vadd.f32 %v5035_v21, %v4950_v56  ;;  %v5180_v58 = vadd.f32 %v8711_v34, %v5066_v35 }
 0x381   : > { %v6611_v20 = vpop.f32.mrf.mxu0 }
 0x382   : > { %v5069_v30 = vadd.f32 %v6611_v20, %v4955_v14  ;;  %v5178_v24 = vadd.f32 %v8713_v49, %v5064_v8  ;;  %v5390_v20 = vpop.f32.mrf.mxu1 }
 0x383   : > { %v5048_v46 = vpop.f32.mrf.mxu0 }
 0x384   : > { %v5067_v0 = vadd.f32 %v5048_v46, %v4953_v37  ;;  %v9037_v46 = vld [vmem:[#allocation16_spill] sm:$0xff]  ;;  %v6642_v23 = vpop.f32.mrf.mxu1 }
 0x385   : > { %v6612_v44 = vpop.f32.mrf.mxu0  ;;  %v5183_v53 = vadd.f32 %v9037_v46, %v5069_v30 }
 0x386   : > { %v5070_v13 = vadd.f32 %v6612_v44, %v4956_v51  ;;  %v5181_v25 = vadd.f32 %v9039_v1, %v5067_v0 }
 0x387   : > { %v5051_v63 = vpop.f32.mrf.mxu0 }
 0x388   : > { %v5068_v45 = vadd.f32 %v5051_v63, %v4954_v33  ;;  %v5184_v35 = vadd.f32 %v9040_v29, %v5070_v13 }
 0x389   : > { %v6627_v11 = vpop.f32.mrf.mxu0 }
 0x38a   : > { %v5293_v6 = vadd.f32 %v6627_v11, %v5179_v47 }
 0x38b   : > { %v5260_v19 = vpop.f32.mrf.mxu0 }
 0x38c   : > { %v5407_v40 = vadd.f32 %v6637_v41, %v5293_v6  ;;  %v5291_v54 = vadd.f32 %v5260_v19, %v5177_v2  ;;  %v1566_v41 = vadd.f32 %v8746_v61, %v1551_v22  ;;  %v9041_v6 = vld [vmem:[#allocation18_spill] sm:$0xff] }
 0x38d   : > { %v6628_v4 = vpop.f32.mrf.mxu0  ;;  %v5182_v2 = vadd.f32 %v9041_v6, %v5068_v45 }
 0x38e   : > { %v5422_v52 = vmul.f32 %v8741_v57, %v5407_v40  ;;  %v5405_v34 = vadd.f32 %v5374_v27, %v5291_v54  ;;  %v5294_v60 = vadd.f32 %v6628_v4, %v5180_v58  ;;  %v9036_v27 = vld [vmem:[#allocation9_spill] sm:$0xff]  ;;  %v9042_v40 = vld [vmem:[#allocation11_spill] sm:$0xff]  ;;  %v9043_v4 = vld [vmem:[#allocation12_spill] sm:$0xff] }
 0x38f   : > { %v5263_v15 = vpop.f32.mrf.mxu0  ;;  %v1552_v49 = vmul.f32 %v8731_v38, %v9036_v27  ;;  %v1555_v54 = vmul.f32 %v8731_v38, %v9042_v40 }
 0x390   : > { %v5437_v28 = vadd.f32 %v8757_v26, %v5422_v52  ;;  %v5420_v21 = vmul.f32 %v8741_v57, %v5405_v34  ;;  %v5408_v7 = vadd.f32 %v6638_v50, %v5294_v60  ;;  %v5292_v42 = vadd.f32 %v5263_v15, %v5178_v24  ;;  %v5393_v34 = vpop.f32.mrf.mxu1 }
 0x391   : > { %v6631_v32 = vpop.f32.mrf.mxu0  ;;  %v1550_v50 = vmul.f32 %v8731_v38, %v9038_v31  ;;  %v1567_v48 = vadd.f32 %v8746_v61, %v1552_v49  ;;  %v1553_v52 = vmul.f32 %v8731_v38, %v9043_v4  ;;  %v1570_v15 = vadd.f32 %v8746_v61, %v1555_v54 }
 0x392   : > { %v5445_v5 = vmax.f32 %v5437_v28, 0.0  ;;  %v5435_v36 = vadd.f32 %v8757_v26, %v5420_v21  ;;  %v5423_v39 = vmul.f32 %v8741_v57, %v5408_v7  ;;  %v5406_v44 = vadd.f32 %v5377_v62, %v5292_v42  ;;  %v9045_v7 = vld [vmem:[#allocation14_spill] sm:$0xff] }
 0x393   : > { %v5297_v3 = vadd.f32 %v6631_v32, %v5183_v53  ;;  %v5276_v43 = vpop.f32.mrf.mxu0  ;;  %v1565_v19 = vadd.f32 %v8746_v61, %v1550_v50  ;;  %v1554_v42 = vmul.f32 %v8731_v38, %v9045_v7  ;;  %v1568_v49 = vadd.f32 %v8746_v61, %v1553_v52 }
 0x394   : > { %v5453_v56 = vadd.f32 %v5445_v5, %v1566_v41  ;;  %v5443_v63 = vmax.f32 %v5435_v36, 0.0  ;;  %v5438_v47 = vadd.f32 %v8757_v26, %v5423_v39  ;;  %v5421_v18 = vmul.f32 %v8741_v57, %v5406_v44  ;;  %v9044_v41 = vld [vmem:[#allocation13_spill] sm:$0xff] }
 0x395   : > { %v5411_v11 = vadd.f32 %v6641_v17, %v5297_v3  ;;  %v5295_v62 = vadd.f32 %v5276_v43, %v5181_v25  ;;  %v6632_v8 = vpop.f32.mrf.mxu0  ;;  %v1556_v0 = vmul.f32 %v8731_v38, %v9044_v41 }
 0x396   : > { %5461 = vst.msk [vmem:[%s8781_s26 + $0x10] sm:$0xff] %vm459_vm4, %v5453_v56  ;;  %v5451_v10 = vadd.f32 %v5443_v63, %v1564_v55  ;;  %v5446_v22 = vmax.f32 %v5438_v47, 0.0  ;;  %v5436_v12 = vadd.f32 %v8757_v26, %v5421_v18  ;;  %v5298_v14 = vadd.f32 %v6632_v8, %v5184_v35 }
 0x397   : > { %v5426_v58 = vmul.f32 %v8741_v57, %v5411_v11  ;;  %v5409_v59 = vadd.f32 %v5390_v20, %v5295_v62  ;;  %v5279_v16 = vpop.f32.mrf.mxu0  ;;  %v1571_v46 = vadd.f32 %v8746_v61, %v1556_v0 }
 0x398   : > { %5459 = vst.msk [vmem:[%s8781_s26] sm:$0xff] %vm459_vm4, %v5451_v10  ;;  %v5454_v17 = vadd.f32 %v5446_v22, %v1567_v48  ;;  %v5444_v30 = vmax.f32 %v5436_v12, 0.0  ;;  %v5412_v37 = vadd.f32 %v6642_v23, %v5298_v14  ;;  %v5296_v51 = vadd.f32 %v5279_v16, %v5182_v2 }
 0x399   : > { %v5441_v60 = vadd.f32 %v8757_v26, %v5426_v58  ;;  %v5424_v24 = vmul.f32 %v8741_v57, %v5409_v59 }
 0x39a   : > { %5462 = vst.msk [vmem:[%s8781_s26 + $0x18] sm:$0xff] %vm459_vm4, %v5454_v17  ;;  %v5452_v13 = vadd.f32 %v5444_v30, %v1565_v19  ;;  %v5427_v9 = vmul.f32 %v8741_v57, %v5412_v37  ;;  %v5410_v33 = vadd.f32 %v5393_v34, %v5296_v51 }
 0x39b   : > { %v5449_v28 = vmax.f32 %v5441_v60, 0.0  ;;  %v5439_v21 = vadd.f32 %v8757_v26, %v5424_v24 }
 0x39c   : > { %5460 = vst.msk [vmem:[%s8781_s26 + $0x8] sm:$0xff] %vm459_vm4, %v5452_v13  ;;  %v5442_v55 = vadd.f32 %v8757_v26, %v5427_v9  ;;  %v5425_v27 = vmul.f32 %v8741_v57, %v5410_v33  ;;  %v1569_v57 = vadd.f32 %v8746_v61, %v1554_v42 }
 0x39d   : > { %v5457_v20 = vadd.f32 %v5449_v28, %v1570_v15  ;;  %v5447_v45 = vmax.f32 %v5439_v21, 0.0 }
 0x39e   : > { %v5450_v53 = vmax.f32 %v5442_v55, 0.0  ;;  %v5440_v32 = vadd.f32 %v8757_v26, %v5425_v27 }
 0x39f   : > { %5465 = vst.msk [vmem:[%s8781_s26 + $0x30] sm:$0xff] %vm459_vm4, %v5457_v20  ;;  %v5455_v38 = vadd.f32 %v5447_v45, %v1568_v49 }
 0x3a0   : > { %v5458_v5 = vadd.f32 %v5450_v53, %v1571_v46  ;;  %v5448_v36 = vmax.f32 %v5440_v32, 0.0 }
 0x3a1   : > { %5463 = vst.msk [vmem:[%s8781_s26 + $0x20] sm:$0xff] %vm459_vm4, %v5455_v38 }
 0x3a2   : > { %5466 = vst.msk [vmem:[%s8781_s26 + $0x38] sm:$0xff] %vm459_vm4, %v5458_v5  ;;  %v5456_v26 = vadd.f32 %v5448_v36, %v1569_v57 }
 0x3a4   : > { %5464 = vst.msk [vmem:[%s8781_s26 + $0x28] sm:$0xff] %vm459_vm4, %v5456_v26 }
 0x3a5   : > { %6725 = shalt.err (!%p6722_p3)
}
 0x3a6   : > { %s6726_s16 = scalar_lea.hbm %s8822_s17, 1024  ;;  %s6730_s20 = scalar_lea.hbm %s8884_s12, 2048 }
 0x3a7   : > { %p6727_p4 = scmp.ne.s32.totalorder %s8822_s17, %s6726_s16  ;;  %p6731_p9 = scmp.lt.s32.totalorder %s8822_s17, %s8884_s12 }
 0x3a8   : > { %p6732_p10 = scmp.lt.s32.totalorder %s6730_s20, %s6726_s16 }
 0x3a9   : > { %p6728_p7 = pnand %p6727_p4, %p6881_p5 }
 0x3aa   : > { %p6733_p11 = por %p6732_p10, %p6731_p9 }
 0x3ab   : > { %p6729_p8 = pneg %p6728_p7 }
 0x3ad   : > { %p6734_p12 = pnand %p6733_p11, %p6729_p8 }
 0x3af   : > { %6737 = shalt.err (!%p6734_p12)
}
 0x3b0   : > { %s6776_s19 = smov 128   ;;  %s6777_s28 = smov 8  }
 0x3b1   : > { %6661 = dma.vmem_to_hbm [thread:$0]  (%p6881_p5), %s8824_s18, 1024, %s8822_s17, %s8832_s25, %s6776_s19, %s6776_s19, %s6777_s28  }
 0x3b2 PF: > { %p6667_p13 = scmp.ge.s32.totalorder %s6772_s24, 2  ;;  %s5496_s29 = sand.u32 1, %s6760_s21  }
 0x3b3   : > { %s5497_s0 = scalar_lea.sflag [#allocation5], %s5496_s29 }
 0x3b4   : > { %p6664_p0 = pnand %p6667_p13, %p6885_p6 }
 0x3b6   : > { %p6665_p1 = pneg %p6664_p0 }
 0x3b8   : > { %6755 = dma.done.wait (%p6665_p1), %s5497_s0, 1024  }
 0x3b9   : > { %6757 = vsyncadd (%p6665_p1), %s5497_s0, 4294966272  ;;  %p22_p2 = scmp.ge.s32.totalorder %s6868_s27, 4   ;;  %s9046_s21 = smov %s6764_s22 }
 0x3ba   : > { %s9047_s22 = smov %s6768_s23  ;;  %s9048_s23 = smov %s6879_s30 }
 0x3bb   : > { %s9049_s24 = smov %s6868_s27  ;;  %24 = sbr.rel (!%p22_p2) target bundleno = 6 (0x6), region = 271 }
 0x3c0   :  { %5502 = vsyncpa [#allocation5], 1 }
 0x3c1   :  { %5504 = vsyncpa [#allocation5 + $0x1], 1 }

</bundles_post_ra>
